<compile_context>
chip_gen: v7x
topology: tpu7x:2x2x1
jax: 0.10.0
libtpu: 0.0.40
codegen_flags: <defaults>
</compile_context>

<pallas_src>
import functools

import jax
import jax.numpy as jnp
import numpy as np
from jax import lax
from jax.experimental import pallas as pl
from jax.experimental.pallas import tpu as pltpu

_EPS = 1e-5
_VMEM_LIMIT = 32 * 1024 * 1024     # explicit scoped-VMEM limit, safe on v5e/v6e/v7x
_MAX_TILE_M = 1024                 # matmul M tile cap (multiple of 256)
_MAX_TILE_B = 256                  # fused pool+fc tail batch-tile cap


def _round_up(x, m):
    return ((x + m - 1) // m) * m


def _choose_tile_m(m, max_tile_m):
    """Pick an M tile: 16-aligned (bf16 sublane packing) for small M; for larger
    M use 256-aligned tiles split into >=2 grid steps (keeps both v7x
    TensorCores busy under dimension_semantics=('parallel',)), capped so
    double-buffered activations stay far under the scoped-VMEM limit."""
    if m <= 256:
        return _round_up(m, 16)
    if m <= 2 * max_tile_m:
        return min(max_tile_m, _round_up(pl.cdiv(m, 2), 256))
    return max_tile_m


# ----------------------------------------------------------------------------
# Pallas kernels
# ----------------------------------------------------------------------------
def _matmul_bias_kernel(x_ref, w_ref, b_ref, o_ref, *, apply_relu):
    """o = (relu)(x @ w + bias); bf16 MXU inputs, f32 accumulate, f32 epilogue."""
    acc = jnp.dot(x_ref[...], w_ref[...], preferred_element_type=jnp.float32)
    y = acc + b_ref[...]
    if apply_relu:
        y = jnp.maximum(y, 0.0)
    o_ref[...] = y.astype(o_ref.dtype)


def matmul_bias_act(x_bf16, w_pad, bias_pad, *, apply_relu, out_dtype,
                    max_tile_m=_MAX_TILE_M):
    """Fused (M,Kp)@(Kp,Np)+bias(+ReLU), tiled over M, weight VMEM-resident.

    `x_bf16` is already bf16 and already K-padded (the zero taps were appended
    inside im2col's concatenate, so there is no separate pad pass here); only
    a small M-tail pad remains.  `w_pad` (bf16) / `bias_pad` (f32) are padded
    to (Kp, Np) / (1, Np) with Kp, Np multiples of 128 (lane-dense loads and
    unmasked stores)."""
    x_bf16 = x_bf16.astype(jnp.bfloat16)
    M, Kp = x_bf16.shape
    Kw, Np = w_pad.shape
    assert Kw == Kp and bias_pad.shape == (1, Np)

    tile_m = _choose_tile_m(M, max_tile_m)
    Mp = _round_up(M, tile_m)
    if Mp != M:
        x_bf16 = jnp.pad(x_bf16, ((0, Mp - M), (0, 0)))     # small M-tail only

    out = pl.pallas_call(
        functools.partial(_matmul_bias_kernel, apply_relu=apply_relu),
        out_shape=jax.ShapeDtypeStruct((Mp, Np), out_dtype),
        grid=(Mp // tile_m,),
        in_specs=[
            pl.BlockSpec((tile_m, Kp), lambda i: (i, 0)),    # activations over M
            pl.BlockSpec((Kp, Np), lambda i: (0, 0)),        # weight: VMEM-resident
            pl.BlockSpec((1, Np), lambda i: (0, 0)),         # folded bias
        ],
        out_specs=pl.BlockSpec((tile_m, Np), lambda i: (i, 0)),
        compiler_params=pltpu.CompilerParams(
            dimension_semantics=("parallel",),               # megacore over M tiles
            vmem_limit_bytes=_VMEM_LIMIT,
        ),
    )(x_bf16, w_pad, bias_pad)
    return out                                               # (Mp, Np); caller slices


def _pool_fc_kernel(v0_ref, v1_ref, v2_ref, v3_ref,
                    w1_ref, b1_ref, w2_ref, b2_ref, o_ref):
    """MaxPool(2x2) + fc1 + ReLU + fc2 fused: elementwise max of the four
    shifted views (already NHWC-flattened), then two back-to-back MXU matmuls
    with f32 accumulation."""
    flat = jnp.maximum(jnp.maximum(v0_ref[...], v1_ref[...]),
                       jnp.maximum(v2_ref[...], v3_ref[...]))          # (tb, 1024) bf16
    h = jnp.dot(flat, w1_ref[...], preferred_element_type=jnp.float32) + b1_ref[...]
    h = jnp.maximum(h, 0.0)
    out = jnp.dot(h.astype(jnp.bfloat16), w2_ref[...],
                  preferred_element_type=jnp.float32) + b2_ref[...]
    o_ref[...] = out.astype(o_ref.dtype)


def pool_fc1_fc2(views, w1, b1, w2, b2, *, max_tile_b=_MAX_TILE_B):
    """One pallas_call for pool + fc1(+ReLU) + fc2, tiled over the batch."""
    B, D = views[0].shape
    Dw, H = w1.shape
    Hw, Np = w2.shape
    assert Dw == D and Hw == H and b1.shape == (1, H) and b2.shape == (1, Np)

    tile_b = _choose_tile_m(B, max_tile_b)
    Bp = _round_up(B, tile_b)
    if Bp != B:
        views = [jnp.pad(v, ((0, Bp - B), (0, 0))) for v in views]

    out = pl.pallas_call(
        _pool_fc_kernel,
        out_shape=jax.ShapeDtypeStruct((Bp, Np), jnp.float32),
        grid=(Bp // tile_b,),
        in_specs=[pl.BlockSpec((tile_b, D), lambda i: (i, 0))] * 4 + [
            pl.BlockSpec((D, H), lambda i: (0, 0)),          # fc1 weight (2 MiB bf16)
            pl.BlockSpec((1, H), lambda i: (0, 0)),
            pl.BlockSpec((H, Np), lambda i: (0, 0)),         # fc2 weight (256 KiB bf16)
            pl.BlockSpec((1, Np), lambda i: (0, 0)),
        ],
        out_specs=pl.BlockSpec((tile_b, Np), lambda i: (i, 0)),
        compiler_params=pltpu.CompilerParams(
            dimension_semantics=("parallel",),
            vmem_limit_bytes=_VMEM_LIMIT,
        ),
    )(*views, w1, b1, w2, b2)
    return out[:B]


# ----------------------------------------------------------------------------
# Plain-JAX glue (layout transforms only)
# ----------------------------------------------------------------------------
def im2col_padded(x_nhwc, kh, kw, stride, pad, k_pad_to):
    """Tap-major im2col (K index = (i*kw + j)*C + c) with the zero padding of K
    up to `k_pad_to` folded into the SAME concatenate (no extra pad pass)."""
    if pad:
        x_nhwc = jnp.pad(x_nhwc, ((0, 0), (pad, pad), (pad, pad), (0, 0)))
    B, H, W, C = x_nhwc.shape
    oh = (H - kh) // stride + 1
    ow = (W - kw) // stride + 1
    cols = [
        x_nhwc[:, i: i + (oh - 1) * stride + 1: stride,
                  j: j + (ow - 1) * stride + 1: stride, :]
        for i in range(kh) for j in range(kw)
    ]
    k = kh * kw * C
    if k_pad_to > k:
        cols.append(jnp.zeros((B, oh, ow, k_pad_to - k), x_nhwc.dtype))
    p = jnp.concatenate(cols, axis=-1)                        # (B, oh, ow, Kp)
    return p, oh, ow


# ----------------------------------------------------------------------------
# One-time host-side parameter preparation
# ----------------------------------------------------------------------------
def _conv_w_to_matmul(w_oihw):
    """torch (O, C, kh, kw) -> (kh*kw*C, O): tap-major K matching im2col_padded."""
    return jnp.transpose(w_oihw, (2, 3, 1, 0)).reshape(-1, w_oihw.shape[0])


def _pad_weight_bias(w, b):
    """Zero-pad a (K,N) weight to (Kp,Np) bf16 and bias to (1,Np) f32 (128-aligned)."""
    K, N = w.shape
    Kp, Np = _round_up(K, 128), _round_up(N, 128)
    w_p = jnp.zeros((Kp, Np), jnp.float32).at[:K, :N].set(w.astype(jnp.float32))
    b_p = jnp.zeros((1, Np), jnp.float32).at[0, :N].set(b.astype(jnp.float32))
    return w_p.astype(jnp.bfloat16), b_p


def prepare_params(params):
    """Fold eval-mode BN into the conv matmul weights/bias, re-layout conv
    weights to tap-major K, pre-transpose FC weights, bake torch's NCHW flatten
    permutation into fc1, pad K/N to 128 multiples and cast weights to bf16."""
    prep = {}
    # layer1: Conv(1->25, k12, s2) + BN
    s1 = params["bn1_gamma"] / jnp.sqrt(params["bn1_var"] + _EPS)
    w1 = _conv_w_to_matmul(params["w1"]) * s1[None, :]                   # (144, 25)
    b1 = (params["b1"] - params["bn1_mean"]) * s1 + params["bn1_beta"]
    prep["w1"], prep["b1"] = _pad_weight_bias(w1, b1)                    # (256, 128)
    # layer2: Conv(25->64, k5, s1, p2) + BN
    s2 = params["bn2_gamma"] / jnp.sqrt(params["bn2_var"] + _EPS)
    w2 = _conv_w_to_matmul(params["w2"]) * s2[None, :]                   # (625, 64)
    b2 = (params["b2"] - params["bn2_mean"]) * s2 + params["bn2_beta"]
    prep["w2"], prep["b2"] = _pad_weight_bias(w2, b2)                    # (640, 128)
    # fc1: permute the input axis from torch's NCHW flatten to our NHWC flatten
    w_fc1 = params["fc1_w"].reshape(1024, 64, 4, 4)                      # (out, c, h, w)
    w_fc1 = jnp.transpose(w_fc1, (2, 3, 1, 0)).reshape(1024, 1024)       # ((h,w,c), out)
    prep["fc1_w"], prep["fc1_b"] = _pad_weight_bias(w_fc1, params["fc1_b"])
    # fc2
    prep["fc2_w"], prep["fc2_b"] = _pad_weight_bias(params["fc2_w"].T, params["fc2_b"])
    return prep


# ----------------------------------------------------------------------------
# Model
# ----------------------------------------------------------------------------
def init_params(key):
    ks = jax.random.split(key, 16)

    def rnd(k, shape, fan_in):
        return (jax.random.normal(k, shape, jnp.float32) / np.sqrt(fan_in)).astype(
            jnp.float32
        )

    p = {}
    # layer1: Conv2d(1, 25, kernel_size=12, stride=2) + BatchNorm2d(25)
    p["w1"] = rnd(ks[0], (25, 1, 12, 12), 1 * 12 * 12)
    p["b1"] = rnd(ks[1], (25,), 1 * 12 * 12)
    p["bn1_gamma"] = 1.0 + 0.1 * jax.random.normal(ks[2], (25,), jnp.float32)
    p["bn1_beta"] = 0.1 * jax.random.normal(ks[3], (25,), jnp.float32)
    p["bn1_mean"] = 0.1 * jax.random.normal(ks[12], (25,), jnp.float32)
    p["bn1_var"] = jax.random.uniform(ks[13], (25,), jnp.float32, 0.5, 1.5)
    # layer2: Conv2d(25, 64, kernel_size=5, stride=1, padding=2) + BatchNorm2d(64)
    p["w2"] = rnd(ks[4], (64, 25, 5, 5), 25 * 5 * 5)
    p["b2"] = rnd(ks[5], (64,), 25 * 5 * 5)
    p["bn2_gamma"] = 1.0 + 0.1 * jax.random.normal(ks[6], (64,), jnp.float32)
    p["bn2_beta"] = 0.1 * jax.random.normal(ks[7], (64,), jnp.float32)
    p["bn2_mean"] = 0.1 * jax.random.normal(ks[14], (64,), jnp.float32)
    p["bn2_var"] = jax.random.uniform(ks[15], (64,), jnp.float32, 0.5, 1.5)
    # fc1: Linear(64*4*4 = 1024 -> 1024), fc2: Linear(1024 -> 10); torch (out, in)
    p["fc1_w"] = rnd(ks[8], (1024, 1024), 1024)
    p["fc1_b"] = rnd(ks[9], (1024,), 1024)
    p["fc2_w"] = rnd(ks[10], (10, 1024), 1024)
    p["fc2_b"] = rnd(ks[11], (10,), 1024)
    return p


def cnn_forward(prep, x_nchw):
    B = x_nchw.shape[0]
    x = jnp.transpose(x_nchw, (0, 2, 3, 1)).astype(jnp.bfloat16)         # NHWC, bf16

    # ---- layer1: Conv(1->25, k=12, s=2) + BN(eval, folded) + ReLU ----
    p1, oh1, ow1 = im2col_padded(x, 12, 12, stride=2, pad=0,
                                 k_pad_to=prep["w1"].shape[0])           # (B,9,9,256)
    y1 = matmul_bias_act(p1.reshape(B * oh1 * ow1, -1), prep["w1"], prep["b1"],
                         apply_relu=True, out_dtype=jnp.bfloat16)
    y1 = y1[: B * oh1 * ow1, :25].reshape(B, oh1, ow1, 25)               # bf16

    # ---- layer2: Conv(25->64, k=5, s=1, p=2) + BN(eval, folded) + ReLU ----
    p2, oh2, ow2 = im2col_padded(y1, 5, 5, stride=1, pad=2,
                                 k_pad_to=prep["w2"].shape[0])           # (B,9,9,640)
    y2 = matmul_bias_act(p2.reshape(B * oh2 * ow2, -1), prep["w2"], prep["b2"],
                         apply_relu=True, out_dtype=jnp.bfloat16)
    y2 = y2[: B * oh2 * ow2, :64].reshape(B, oh2, ow2, 64)               # (B,9,9,64) bf16

    # ---- MaxPool(2) + fc1 + ReLU + fc2, fused into ONE pallas_call ----
    # The four 2x2-shifted views are NHWC-flattened; fc1's weight has torch's
    # NCHW-flatten permutation baked in, so no activation transpose is needed.
    oph, opw = oh2 // 2, ow2 // 2
    views = [
        y2[:, dh: dh + 2 * oph: 2, dw: dw + 2 * opw: 2, :].reshape(B, -1)
        for dh in (0, 1) for dw in (0, 1)
    ]
    out = pool_fc1_fc2(views, prep["fc1_w"], prep["fc1_b"],
                       prep["fc2_w"], prep["fc2_b"])
    return out[:, :10]                                                   # (B, 10) f32


cnn_forward_pallas = jax.jit(cnn_forward)


# Pure-JAX reference with PyTorch semantics (eval-mode BN), raw param layout.
def cnn_forward_reference(params, x_nchw):
    x = x_nchw.astype(jnp.float32)

    def bn(y, g, b, m, v):
        return ((y - m[None, :, None, None]) / jnp.sqrt(v[None, :, None, None] + _EPS)
                * g[None, :, None, None] + b[None, :, None, None])

    y = lax.conv_general_dilated(x, params["w1"], (2, 2), "VALID",
                                 dimension_numbers=("NCHW", "OIHW", "NCHW"))
    y = y + params["b1"][None, :, None, None]
    y = jnp.maximum(bn(y, params["bn1_gamma"], params["bn1_beta"],
                       params["bn1_mean"], params["bn1_var"]), 0.0)
    y = lax.conv_general_dilated(y, params["w2"], (1, 1), ((2, 2), (2, 2)),
                                 dimension_numbers=("NCHW", "OIHW", "NCHW"))
    y = y + params["b2"][None, :, None, None]
    y = jnp.maximum(bn(y, params["bn2_gamma"], params["bn2_beta"],
                       params["bn2_mean"], params["bn2_var"]), 0.0)
    B = y.shape[0]
    y = y[:, :, :8, :8].reshape(B, 64, 4, 2, 4, 2).max(axis=(3, 5))      # MaxPool2d(2)
    flat = y.reshape(B, -1)                                              # NCHW flatten
    h = jnp.maximum(flat @ params["fc1_w"].T + params["fc1_b"], 0.0)
    return h @ params["fc2_w"].T + params["fc2_b"]


# ----------------------------------------------------------------------------
if __name__ == "__main__":
    key = jax.random.PRNGKey(0)
    pkey, xkey = jax.random.split(key)
    params = init_params(pkey)
    prep = prepare_params(params)     # one-time prep, outside the jitted forward

    # MNIST-style input implied by the 64*4*4 flatten: (B, 1, 28, 28), NCHW.
    x = jax.random.normal(xkey, (4, 1, 28, 28), jnp.float32)

    out = jax.block_until_ready(cnn_forward_pallas(prep, x))
    ref = jax.block_until_ready(jax.jit(cnn_forward_reference)(params, x))

    assert out.shape == (4, 10) and out.dtype == jnp.float32
    assert bool(jnp.all(jnp.isfinite(out)))
    np.testing.assert_allclose(np.asarray(out), np.asarray(ref), rtol=5e-2, atol=5e-2)

    print("KERNEL_OK")
</pallas_src>

<mosaic_0001>
module attributes {stable_mosaic.version = 11 : i64} {
  func.func @_matmul_bias_kernel(%arg0: i32, %arg1: memref<256x256xbf16, #tpu.memory_space<vmem>>, %arg2: memref<256x128xbf16, #tpu.memory_space<vmem>>, %arg3: memref<1x128xf32, #tpu.memory_space<vmem>>, %arg4: memref<256x128xbf16, #tpu.memory_space<vmem>>) attributes {dimension_semantics = [#tpu.dimension_semantics<parallel>], iteration_bounds = array<i64: 2>, scalar_prefetch = 0 : i64, scratch_operands = 0 : i64, tpu.core_type = #tpu.core_type<tc>, window_params = [{transform_indices = @transform_0, window_bounds = array<i64: 256, 256>}, {pipeline_mode = #tpu.pipeline_mode<synchronous>, transform_indices = @transform_1, window_bounds = array<i64: 256, 128>}, {pipeline_mode = #tpu.pipeline_mode<synchronous>, transform_indices = @transform_2, window_bounds = array<i64: 1, 128>}, {transform_indices = @transform_3, window_bounds = array<i64: 256, 128>}]} {
    %c0 = arith.constant 0 : index
    %c0_0 = arith.constant 0 : index
    %0 = vector.load %arg1[%c0, %c0_0] : memref<256x256xbf16, #tpu.memory_space<vmem>>, vector<256x256xbf16>
    %c0_1 = arith.constant 0 : index
    %c0_2 = arith.constant 0 : index
    %1 = vector.load %arg2[%c0_1, %c0_2] : memref<256x128xbf16, #tpu.memory_space<vmem>>, vector<256x128xbf16>
    %cst = arith.constant dense<0.000000e+00> : vector<256x128xf32>
    %2 = tpu.matmul %0, %1, %cst {dimension_numbers = #tpu.dot_dimension_numbers<[1], [0], [0], [1], [0, 0, 1, 1], [], []>} : vector<256x256xbf16>, vector<256x128xbf16>, vector<256x128xf32> -> vector<256x128xf32>
    %c0_3 = arith.constant 0 : index
    %c0_4 = arith.constant 0 : index
    %3 = vector.load %arg3[%c0_3, %c0_4] : memref<1x128xf32, #tpu.memory_space<vmem>>, vector<1x128xf32>
    %4 = vector.broadcast %3 : vector<1x128xf32> to vector<256x128xf32>
    %5 = arith.addf %2, %4 : vector<256x128xf32>
    %cst_5 = arith.constant 0.000000e+00 : f32
    %6 = vector.broadcast %cst_5 : f32 to vector<256x128xf32>
    %7 = arith.maximumf %5, %6 : vector<256x128xf32>
    %8 = arith.truncf %7 : vector<256x128xf32> to vector<256x128xbf16>
    %c0_6 = arith.constant 0 : index
    %c0_7 = arith.constant 0 : index
    %9 = vector.load %arg4[%c0_6, %c0_7] : memref<256x128xbf16, #tpu.memory_space<vmem>>, vector<256x128xbf16>
    tpu.vector_store %arg4[%c0_6, %c0_7], %8 {strides = array<i32>} : memref<256x128xbf16, #tpu.memory_space<vmem>>, vector<256x128xbf16>,
    return
  }
  func.func @transform_0(%arg0: i32) -> (i32, i32) {
    %c0_i32 = arith.constant 0 : i32
    %c0_i32_0 = arith.constant 0 : i32
    return %arg0, %c0_i32 : i32, i32
  }
  func.func @transform_1(%arg0: i32) -> (i32, i32) {
    %c0_i32 = arith.constant 0 : i32
    %c0_i32_0 = arith.constant 0 : i32
    %c0_i32_1 = arith.constant 0 : i32
    return %c0_i32, %c0_i32_0 : i32, i32
  }
  func.func @transform_2(%arg0: i32) -> (i32, i32) {
    %c0_i32 = arith.constant 0 : i32
    %c0_i32_0 = arith.constant 0 : i32
    %c0_i32_1 = arith.constant 0 : i32
    return %c0_i32, %c0_i32_0 : i32, i32
  }
  func.func @transform_3(%arg0: i32) -> (i32, i32) {
    %c0_i32 = arith.constant 0 : i32
    %c0_i32_0 = arith.constant 0 : i32
    return %arg0, %c0_i32 : i32, i32
  }
}

module attributes {stable_mosaic.version = 11 : i64} {
  func.func @_matmul_bias_kernel(%arg0: i32, %arg1: memref<256x640xbf16, #tpu.memory_space<vmem>>, %arg2: memref<640x128xbf16, #tpu.memory_space<vmem>>, %arg3: memref<1x128xf32, #tpu.memory_space<vmem>>, %arg4: memref<256x128xbf16, #tpu.memory_space<vmem>>) attributes {dimension_semantics = [#tpu.dimension_semantics<parallel>], iteration_bounds = array<i64: 2>, scalar_prefetch = 0 : i64, scratch_operands = 0 : i64, tpu.core_type = #tpu.core_type<tc>, window_params = [{transform_indices = @transform_0, window_bounds = array<i64: 256, 640>}, {pipeline_mode = #tpu.pipeline_mode<synchronous>, transform_indices = @transform_1, window_bounds = array<i64: 640, 128>}, {pipeline_mode = #tpu.pipeline_mode<synchronous>, transform_indices = @transform_2, window_bounds = array<i64: 1, 128>}, {transform_indices = @transform_3, window_bounds = array<i64: 256, 128>}]} {
    %c0 = arith.constant 0 : index
    %c0_0 = arith.constant 0 : index
    %0 = vector.load %arg1[%c0, %c0_0] : memref<256x640xbf16, #tpu.memory_space<vmem>>, vector<256x640xbf16>
    %c0_1 = arith.constant 0 : index
    %c0_2 = arith.constant 0 : index
    %1 = vector.load %arg2[%c0_1, %c0_2] : memref<640x128xbf16, #tpu.memory_space<vmem>>, vector<640x128xbf16>
    %cst = arith.constant dense<0.000000e+00> : vector<256x128xf32>
    %2 = tpu.matmul %0, %1, %cst {dimension_numbers = #tpu.dot_dimension_numbers<[1], [0], [0], [1], [0, 0, 1, 1], [], []>} : vector<256x640xbf16>, vector<640x128xbf16>, vector<256x128xf32> -> vector<256x128xf32>
    %c0_3 = arith.constant 0 : index
    %c0_4 = arith.constant 0 : index
    %3 = vector.load %arg3[%c0_3, %c0_4] : memref<1x128xf32, #tpu.memory_space<vmem>>, vector<1x128xf32>
    %4 = vector.broadcast %3 : vector<1x128xf32> to vector<256x128xf32>
    %5 = arith.addf %2, %4 : vector<256x128xf32>
    %cst_5 = arith.constant 0.000000e+00 : f32
    %6 = vector.broadcast %cst_5 : f32 to vector<256x128xf32>
    %7 = arith.maximumf %5, %6 : vector<256x128xf32>
    %8 = arith.truncf %7 : vector<256x128xf32> to vector<256x128xbf16>
    %c0_6 = arith.constant 0 : index
    %c0_7 = arith.constant 0 : index
    %9 = vector.load %arg4[%c0_6, %c0_7] : memref<256x128xbf16, #tpu.memory_space<vmem>>, vector<256x128xbf16>
    tpu.vector_store %arg4[%c0_6, %c0_7], %8 {strides = array<i32>} : memref<256x128xbf16, #tpu.memory_space<vmem>>, vector<256x128xbf16>,
    return
  }
  func.func @transform_0(%arg0: i32) -> (i32, i32) {
    %c0_i32 = arith.constant 0 : i32
    %c0_i32_0 = arith.constant 0 : i32
    return %arg0, %c0_i32 : i32, i32
  }
  func.func @transform_1(%arg0: i32) -> (i32, i32) {
    %c0_i32 = arith.constant 0 : i32
    %c0_i32_0 = arith.constant 0 : i32
    %c0_i32_1 = arith.constant 0 : i32
    return %c0_i32, %c0_i32_0 : i32, i32
  }
  func.func @transform_2(%arg0: i32) -> (i32, i32) {
    %c0_i32 = arith.constant 0 : i32
    %c0_i32_0 = arith.constant 0 : i32
    %c0_i32_1 = arith.constant 0 : i32
    return %c0_i32, %c0_i32_0 : i32, i32
  }
  func.func @transform_3(%arg0: i32) -> (i32, i32) {
    %c0_i32 = arith.constant 0 : i32
    %c0_i32_0 = arith.constant 0 : i32
    return %arg0, %c0_i32 : i32, i32
  }
}

module attributes {stable_mosaic.version = 11 : i64} {
  func.func @_pool_fc_kernel(%arg0: i32, %arg1: memref<16x1024xbf16, #tpu.memory_space<vmem>>, %arg2: memref<16x1024xbf16, #tpu.memory_space<vmem>>, %arg3: memref<16x1024xbf16, #tpu.memory_space<vmem>>, %arg4: memref<16x1024xbf16, #tpu.memory_space<vmem>>, %arg5: memref<1024x1024xbf16, #tpu.memory_space<vmem>>, %arg6: memref<1x1024xf32, #tpu.memory_space<vmem>>, %arg7: memref<1024x128xbf16, #tpu.memory_space<vmem>>, %arg8: memref<1x128xf32, #tpu.memory_space<vmem>>, %arg9: memref<16x128xf32, #tpu.memory_space<vmem>>) attributes {dimension_semantics = [#tpu.dimension_semantics<parallel>], iteration_bounds = array<i64: 1>, scalar_prefetch = 0 : i64, scratch_operands = 0 : i64, tpu.core_type = #tpu.core_type<tc>, window_params = [{transform_indices = @transform_0, window_bounds = array<i64: 16, 1024>}, {transform_indices = @transform_1, window_bounds = array<i64: 16, 1024>}, {transform_indices = @transform_2, window_bounds = array<i64: 16, 1024>}, {transform_indices = @transform_3, window_bounds = array<i64: 16, 1024>}, {pipeline_mode = #tpu.pipeline_mode<synchronous>, transform_indices = @transform_4, window_bounds = array<i64: 1024, 1024>}, {pipeline_mode = #tpu.pipeline_mode<synchronous>, transform_indices = @transform_5, window_bounds = array<i64: 1, 1024>}, {pipeline_mode = #tpu.pipeline_mode<synchronous>, transform_indices = @transform_6, window_bounds = array<i64: 1024, 128>}, {pipeline_mode = #tpu.pipeline_mode<synchronous>, transform_indices = @transform_7, window_bounds = array<i64: 1, 128>}, {transform_indices = @transform_8, window_bounds = array<i64: 16, 128>}]} {
    %c0 = arith.constant 0 : index
    %c0_0 = arith.constant 0 : index
    %0 = vector.load %arg1[%c0, %c0_0] : memref<16x1024xbf16, #tpu.memory_space<vmem>>, vector<16x1024xbf16>
    %c0_1 = arith.constant 0 : index
    %c0_2 = arith.constant 0 : index
    %1 = vector.load %arg2[%c0_1, %c0_2] : memref<16x1024xbf16, #tpu.memory_space<vmem>>, vector<16x1024xbf16>
    %2 = arith.maximumf %0, %1 : vector<16x1024xbf16>
    %c0_3 = arith.constant 0 : index
    %c0_4 = arith.constant 0 : index
    %3 = vector.load %arg3[%c0_3, %c0_4] : memref<16x1024xbf16, #tpu.memory_space<vmem>>, vector<16x1024xbf16>
    %c0_5 = arith.constant 0 : index
    %c0_6 = arith.constant 0 : index
    %4 = vector.load %arg4[%c0_5, %c0_6] : memref<16x1024xbf16, #tpu.memory_space<vmem>>, vector<16x1024xbf16>
    %5 = arith.maximumf %3, %4 : vector<16x1024xbf16>
    %6 = arith.maximumf %2, %5 : vector<16x1024xbf16>
    %c0_7 = arith.constant 0 : index
    %c0_8 = arith.constant 0 : index
    %7 = vector.load %arg5[%c0_7, %c0_8] : memref<1024x1024xbf16, #tpu.memory_space<vmem>>, vector<1024x1024xbf16>
    %cst = arith.constant dense<0.000000e+00> : vector<16x1024xf32>
    %8 = tpu.matmul %6, %7, %cst {dimension_numbers = #tpu.dot_dimension_numbers<[1], [0], [0], [1], [0, 0, 1, 1], [], []>} : vector<16x1024xbf16>, vector<1024x1024xbf16>, vector<16x1024xf32> -> vector<16x1024xf32>
    %c0_9 = arith.constant 0 : index
    %c0_10 = arith.constant 0 : index
    %9 = vector.load %arg6[%c0_9, %c0_10] : memref<1x1024xf32, #tpu.memory_space<vmem>>, vector<1x1024xf32>
    %10 = vector.broadcast %9 : vector<1x1024xf32> to vector<16x1024xf32>
    %11 = arith.addf %8, %10 : vector<16x1024xf32>
    %cst_11 = arith.constant 0.000000e+00 : f32
    %12 = vector.broadcast %cst_11 : f32 to vector<16x1024xf32>
    %13 = arith.maximumf %11, %12 : vector<16x1024xf32>
    %14 = arith.truncf %13 : vector<16x1024xf32> to vector<16x1024xbf16>
    %c0_12 = arith.constant 0 : index
    %c0_13 = arith.constant 0 : index
    %15 = vector.load %arg7[%c0_12, %c0_13] : memref<1024x128xbf16, #tpu.memory_space<vmem>>, vector<1024x128xbf16>
    %cst_14 = arith.constant dense<0.000000e+00> : vector<16x128xf32>
    %16 = tpu.matmul %14, %15, %cst_14 {dimension_numbers = #tpu.dot_dimension_numbers<[1], [0], [0], [1], [0, 0, 1, 1], [], []>} : vector<16x1024xbf16>, vector<1024x128xbf16>, vector<16x128xf32> -> vector<16x128xf32>
    %c0_15 = arith.constant 0 : index
    %c0_16 = arith.constant 0 : index
    %17 = vector.load %arg8[%c0_15, %c0_16] : memref<1x128xf32, #tpu.memory_space<vmem>>, vector<1x128xf32>
    %18 = vector.broadcast %17 : vector<1x128xf32> to vector<16x128xf32>
    %19 = arith.addf %16, %18 : vector<16x128xf32>
    %c0_17 = arith.constant 0 : index
    %c0_18 = arith.constant 0 : index
    %20 = vector.load %arg9[%c0_17, %c0_18] : memref<16x128xf32, #tpu.memory_space<vmem>>, vector<16x128xf32>
    tpu.vector_store %arg9[%c0_17, %c0_18], %19 {strides = array<i32>} : memref<16x128xf32, #tpu.memory_space<vmem>>, vector<16x128xf32>,
    return
  }
  func.func @transform_0(%arg0: i32) -> (i32, i32) {
    %c0_i32 = arith.constant 0 : i32
    %c0_i32_0 = arith.constant 0 : i32
    return %arg0, %c0_i32 : i32, i32
  }
  func.func @transform_1(%arg0: i32) -> (i32, i32) {
    %c0_i32 = arith.constant 0 : i32
    %c0_i32_0 = arith.constant 0 : i32
    return %arg0, %c0_i32 : i32, i32
  }
  func.func @transform_2(%arg0: i32) -> (i32, i32) {
    %c0_i32 = arith.constant 0 : i32
    %c0_i32_0 = arith.constant 0 : i32
    return %arg0, %c0_i32 : i32, i32
  }
  func.func @transform_3(%arg0: i32) -> (i32, i32) {
    %c0_i32 = arith.constant 0 : i32
    %c0_i32_0 = arith.constant 0 : i32
    return %arg0, %c0_i32 : i32, i32
  }
  func.func @transform_4(%arg0: i32) -> (i32, i32) {
    %c0_i32 = arith.constant 0 : i32
    %c0_i32_0 = arith.constant 0 : i32
    %c0_i32_1 = arith.constant 0 : i32
    return %c0_i32, %c0_i32_0 : i32, i32
  }
  func.func @transform_5(%arg0: i32) -> (i32, i32) {
    %c0_i32 = arith.constant 0 : i32
    %c0_i32_0 = arith.constant 0 : i32
    %c0_i32_1 = arith.constant 0 : i32
    return %c0_i32, %c0_i32_0 : i32, i32
  }
  func.func @transform_6(%arg0: i32) -> (i32, i32) {
    %c0_i32 = arith.constant 0 : i32
    %c0_i32_0 = arith.constant 0 : i32
    %c0_i32_1 = arith.constant 0 : i32
    return %c0_i32, %c0_i32_0 : i32, i32
  }
  func.func @transform_7(%arg0: i32) -> (i32, i32) {
    %c0_i32 = arith.constant 0 : i32
    %c0_i32_0 = arith.constant 0 : i32
    %c0_i32_1 = arith.constant 0 : i32
    return %c0_i32, %c0_i32_0 : i32, i32
  }
  func.func @transform_8(%arg0: i32) -> (i32, i32) {
    %c0_i32 = arith.constant 0 : i32
    %c0_i32_0 = arith.constant 0 : i32
    return %arg0, %c0_i32 : i32, i32
  }
}

</mosaic_0001>

<bundles_post_ra>
// kernel: cnn_forward.3
= control target key start
LH: loop header
LB: loop body
LE: loop exit
PB: predicated region body
PF: predicated region fallthrough
CT: control target
= control target key end

     0   :  { %s1363_s12 = smov 0   ;;  %s1521_s0 = inlined_call_operand.vmem [shape: bf16[512,256], index: 0, kind: input, shape index: {}]   ;;  %s1522_s1 = inlined_call_operand.vmem [shape: bf16[256,128], index: 1, kind: input, shape index: {}]   ;;  %s1523_s2 = inlined_call_operand.vmem [shape: f32[1,128], index: 2, kind: input, shape index: {}]   ;;  %s1524_s3 = inlined_call_operand.vmem [shape: bf16[512,128], index: 3, kind: output, shape index: {}]  }
   0x1 LB: > { %s914_s13 = sadd.s32 4294967295, %s1341_s12   ;;  %p918_p0 = scmp.ge.s32.totalorder %s1341_s12, 1  ;;  %s1341_s12 = sphi %s1363_s12, %s13_s12  }
   0x2   : > { %p139_p1 = scmp.lt.s32.totalorder %s1341_s12, 3 }
   0x4   : > { %p140_p2 = pnand %p918_p0, %p139_p1 }
   0x5   : > { %v1271_v0 = vld [vmem:[%s1522_s1 + $0x40] sm:$0xff] (!%p140_p2)   ;;  %s919_s16 = sshll.u32 (!%p140_p2), %s914_s13, 5  ;;  %v1273_v2 = vld [vmem:[%s1522_s1 + $0x48] sm:$0xff] (!%p140_p2)   ;;  %v1275_v4 = vld [vmem:[%s1522_s1 + $0x50] sm:$0xff] (!%p140_p2)  }
   0x6   : > { %143 = sbr.rel (%p140_p2) target bundleno = 319 (0x13f), region = 32  ;;  %v1272_v1 = vld [vmem:[%s1522_s1] sm:$0xff] (!%p140_p2)   ;;  %1135 = vmatprep.subr.bf16.mxu0 (!%p140_p2), %v1271_v0  ;;  %1247 = vmatprep.subr.bf16.mxu1 (!%p140_p2), %v1271_v0  ;;  %v1274_v3 = vld [vmem:[%s1522_s1 + $0x8] sm:$0xff] (!%p140_p2)   ;;  %p165_p3 = scmp.lt.s32.totalorder (!%p140_p2), %s919_s16, 63  ;;  %v1276_v5 = vld [vmem:[%s1522_s1 + $0x10] sm:$0xff] (!%p140_p2)  }
   0x7   : > { %1136 = vmatpush3.bf16.msra.mxu0 (!%p140_p2), %v1272_v1  ;;  %1255 = vmatpush3.bf16.msra.mxu1 (!%p140_p2), %v1272_v1  ;;  %v1277_v6 = vld [vmem:[%s1522_s1 + $0x58] sm:$0xff] (!%p140_p2)   ;;  %v1279_v8 = vld [vmem:[%s1522_s1 + $0x60] sm:$0xff] (!%p140_p2)   ;;  %v1281_v10 = vld [vmem:[%s1522_s1 + $0x68] sm:$0xff] (!%p140_p2)  }
   0x8   : > { %1137 = vmatprep.subr.bf16.mxu0 (!%p140_p2), %v1273_v2  ;;  %1248 = vmatprep.subr.bf16.mxu1 (!%p140_p2), %v1273_v2  ;;  %v1278_v7 = vld [vmem:[%s1522_s1 + $0x18] sm:$0xff] (!%p140_p2)   ;;  %v1280_v9 = vld [vmem:[%s1522_s1 + $0x20] sm:$0xff] (!%p140_p2)   ;;  %v1282_v13 = vld [vmem:[%s1522_s1 + $0x28] sm:$0xff] (!%p140_p2)  }
   0x9   : > { %v1283_v14 = vld [vmem:[%s1522_s1 + $0x70] sm:$0xff] (!%p140_p2)   ;;  %v1285_v16 = vld [vmem:[%s1522_s1 + $0x78] sm:$0xff] (!%p140_p2)   ;;  %v1462_v50 = vld [vmem:[%s1523_s2] ss:$0 sm:$0xff] (!%p140_p2) }
   0xa   : > { %v1284_v15 = vld [vmem:[%s1522_s1 + $0x30] sm:$0xff] (!%p140_p2)   ;;  %v1286_v17 = vld [vmem:[%s1522_s1 + $0x38] sm:$0xff] (!%p140_p2)  }
   0xb   : > { %1138 = vmatpush3.bf16.msra.mxu0 (!%p140_p2), %v1274_v3  ;;  %1256 = vmatpush3.bf16.msra.mxu1 (!%p140_p2), %v1274_v3 }
   0xc   : > { %1139 = vmatprep.subr.bf16.mxu0 (!%p140_p2), %v1275_v4  ;;  %1249 = vmatprep.subr.bf16.mxu1 (!%p140_p2), %v1275_v4 }
   0xd   : > { %s1526_s16 = smov (!%p165_p3, %s919_s16), 63 }
   0xe   : > { %s1007_s4 = sshll.u32 %s1526_s16, 3  ;;  %s923_s28 = sshll.u32 %s1526_s16, 2 }
   0xf   : > { %1140 = vmatpush3.bf16.msra.mxu0 %v1276_v5  ;;  %1257 = vmatpush3.bf16.msra.mxu1 %v1276_v5  ;;  %s1404_s9 = scalar_lea.vmem %s1521_s0, %s1007_s4  ;;  %s1472_s4 = scalar_lea.vmem %s1524_s3, %s923_s28 }
  0x10   : > { %1141 = vmatprep.subr.bf16.mxu0 %v1277_v6  ;;  %1250 = vmatprep.subr.bf16.mxu1 %v1277_v6  ;;  %v1289_v11 = vld [vmem:[%s1404_s9 + $0x4] ss:$8 sps:$4 sm:$0xff]   ;;  %v1287_v18 = vld [vmem:[%s1404_s9] ss:$8 sps:$4 sm:$0xff]   ;;  %v1293_v20 = vld [vmem:[%s1404_s9 + $0x14] ss:$8 sps:$4 sm:$0xff]  }
  0x11   : > { %v1292_v12 = vld [vmem:[%s1404_s9 + $0x84] ss:$8 sps:$4 sm:$0xff]   ;;  %537 = vmatprep.mubr.bf16.mxu0 %v1289_v11  ;;  %v1290_v19 = vld [vmem:[%s1404_s9 + $0x80] ss:$8 sps:$4 sm:$0xff]   ;;  %v1295_v21 = vld [vmem:[%s1404_s9 + $0x94] ss:$8 sps:$4 sm:$0xff]  }
  0x12   : > { %601 = vmatprep.mubr.bf16.mxu1 %v1292_v12  ;;  %v1297_v22 = vld [vmem:[%s1404_s9 + $0x10] ss:$8 sps:$4 sm:$0xff]   ;;  %v1299_v24 = vld [vmem:[%s1404_s9 + $0x24] ss:$8 sps:$4 sm:$0xff]   ;;  %v1303_v26 = vld [vmem:[%s1404_s9 + $0x20] ss:$8 sps:$4 sm:$0xff]  }
  0x13   : > { %1142 = vmatpush3.bf16.msra.mxu0 %v1278_v7  ;;  %1258 = vmatpush3.bf16.msra.mxu1 %v1278_v7  ;;  %v1298_v23 = vld [vmem:[%s1404_s9 + $0x90] ss:$8 sps:$4 sm:$0xff]   ;;  %v1301_v25 = vld [vmem:[%s1404_s9 + $0xa4] ss:$8 sps:$4 sm:$0xff]   ;;  %v1304_v27 = vld [vmem:[%s1404_s9 + $0xa0] ss:$8 sps:$4 sm:$0xff]  }
  0x14   : > { %1143 = vmatprep.subr.bf16.mxu0 %v1279_v8  ;;  %1251 = vmatprep.subr.bf16.mxu1 %v1279_v8  ;;  %v1305_v28 = vld [vmem:[%s1404_s9 + $0x34] ss:$8 sps:$4 sm:$0xff]   ;;  %v1309_v30 = vld [vmem:[%s1404_s9 + $0x30] ss:$8 sps:$4 sm:$0xff]   ;;  %v1311_v32 = vld [vmem:[%s1404_s9 + $0x44] ss:$8 sps:$4 sm:$0xff]  }
  0x15   : > { %v1307_v29 = vld [vmem:[%s1404_s9 + $0xb4] ss:$8 sps:$4 sm:$0xff]   ;;  %v1310_v31 = vld [vmem:[%s1404_s9 + $0xb0] ss:$8 sps:$4 sm:$0xff]   ;;  %v1313_v33 = vld [vmem:[%s1404_s9 + $0xc4] ss:$8 sps:$4 sm:$0xff]  }
  0x16   : > { %v1315_v34 = vld [vmem:[%s1404_s9 + $0x40] ss:$8 sps:$4 sm:$0xff]   ;;  %v1317_v36 = vld [vmem:[%s1404_s9 + $0x54] ss:$8 sps:$4 sm:$0xff]   ;;  %v1321_v38 = vld [vmem:[%s1404_s9 + $0x50] ss:$8 sps:$4 sm:$0xff]  }
  0x17   : > { %1144 = vmatpush3.bf16.msra.mxu0 %v1280_v9  ;;  %1259 = vmatpush3.bf16.msra.mxu1 %v1280_v9  ;;  %v1316_v35 = vld [vmem:[%s1404_s9 + $0xc0] ss:$8 sps:$4 sm:$0xff]   ;;  %v1319_v37 = vld [vmem:[%s1404_s9 + $0xd4] ss:$8 sps:$4 sm:$0xff]   ;;  %v1322_v39 = vld [vmem:[%s1404_s9 + $0xd0] ss:$8 sps:$4 sm:$0xff]  }
  0x18   : > { %1145 = vmatprep.subr.bf16.mxu0 %v1281_v10  ;;  %1252 = vmatprep.subr.bf16.mxu1 %v1281_v10  ;;  %v1323_v40 = vld [vmem:[%s1404_s9 + $0x64] ss:$8 sps:$4 sm:$0xff]   ;;  %v1327_v42 = vld [vmem:[%s1404_s9 + $0x60] ss:$8 sps:$4 sm:$0xff]   ;;  %v1329_v44 = vld [vmem:[%s1404_s9 + $0x74] ss:$8 sps:$4 sm:$0xff]  }
  0x19   : > { %v1325_v41 = vld [vmem:[%s1404_s9 + $0xe4] ss:$8 sps:$4 sm:$0xff]   ;;  %v1328_v43 = vld [vmem:[%s1404_s9 + $0xe0] ss:$8 sps:$4 sm:$0xff]   ;;  %v1331_v45 = vld [vmem:[%s1404_s9 + $0xf4] ss:$8 sps:$4 sm:$0xff]  }
  0x1a   : > { %v1333_v46 = vld [vmem:[%s1404_s9 + $0x70] ss:$8 sps:$4 sm:$0xff]  }
  0x1b   : > { %1146 = vmatpush3.bf16.msra.mxu0 %v1282_v13  ;;  %1260 = vmatpush3.bf16.msra.mxu1 %v1282_v13  ;;  %v1334_v47 = vld [vmem:[%s1404_s9 + $0xf0] ss:$8 sps:$4 sm:$0xff]  }
  0x1c   : > { %1147 = vmatprep.subr.bf16.mxu0 %v1283_v14  ;;  %1253 = vmatprep.subr.bf16.mxu1 %v1283_v14 }
  0x1f   : > { %1148 = vmatpush3.bf16.msra.mxu0 %v1284_v15  ;;  %1261 = vmatpush3.bf16.msra.mxu1 %v1284_v15 }
  0x20   : > { %1149 = vmatprep.subr.bf16.mxu0 %v1285_v16  ;;  %1254 = vmatprep.subr.bf16.mxu1 %v1285_v16 }
  0x23   : > { %1150 = vmatpush3.bf16.msra.mxu0 %v1286_v17  ;;  %1262 = vmatpush3.bf16.msra.mxu1 %v1286_v17 }
  0x26   : > { %538 = vmatmul.mubr.bf16.vlgmr.msra.gmra.mrb[0].mxu0 %v1287_v18  ;;  %602 = vmatmul.mubr.bf16.vlgmr.msra.gmra.mrb[0].mxu1 %v1290_v19 }
  0x27   : > { %545 = vmatprep.mubr.bf16.mxu0 %v1293_v20  ;;  %609 = vmatprep.mubr.bf16.mxu1 %v1295_v21 }
  0x2e   : > { %546 = vmatmul.mubr.bf16.gmra.mrb[4].mxu0 %v1297_v22  ;;  %610 = vmatmul.mubr.bf16.gmra.mrb[4].mxu1 %v1298_v23 }
  0x2f   : > { %553 = vmatprep.mubr.bf16.mxu0 %v1299_v24  ;;  %617 = vmatprep.mubr.bf16.mxu1 %v1301_v25 }
  0x36   : > { %554 = vmatmul.mubr.bf16.gmra.mrb[8].mxu0 %v1303_v26  ;;  %618 = vmatmul.mubr.bf16.gmra.mrb[8].mxu1 %v1304_v27 }
  0x37   : > { %561 = vmatprep.mubr.bf16.mxu0 %v1305_v28  ;;  %625 = vmatprep.mubr.bf16.mxu1 %v1307_v29 }
  0x3e   : > { %562 = vmatmul.mubr.bf16.gmra.mrb[12].mxu0 %v1309_v30  ;;  %626 = vmatmul.mubr.bf16.gmra.mrb[12].mxu1 %v1310_v31 }
  0x3f   : > { %569 = vmatprep.mubr.bf16.mxu0 %v1311_v32  ;;  %633 = vmatprep.mubr.bf16.mxu1 %v1313_v33 }
  0x46   : > { %570 = vmatmul.mubr.bf16.gmra.mrb[16].mxu0 %v1315_v34  ;;  %634 = vmatmul.mubr.bf16.gmra.mrb[16].mxu1 %v1316_v35 }
  0x47   : > { %577 = vmatprep.mubr.bf16.mxu0 %v1317_v36  ;;  %641 = vmatprep.mubr.bf16.mxu1 %v1319_v37 }
  0x4e   : > { %578 = vmatmul.mubr.bf16.gmra.mrb[20].mxu0 %v1321_v38  ;;  %642 = vmatmul.mubr.bf16.gmra.mrb[20].mxu1 %v1322_v39 }
  0x4f   : > { %585 = vmatprep.mubr.bf16.mxu0 %v1323_v40  ;;  %649 = vmatprep.mubr.bf16.mxu1 %v1325_v41 }
  0x56   : > { %586 = vmatmul.mubr.bf16.gmra.mrb[24].mxu0 %v1327_v42  ;;  %650 = vmatmul.mubr.bf16.gmra.mrb[24].mxu1 %v1328_v43 }
  0x57   : > { %593 = vmatprep.mubr.bf16.mxu0 %v1329_v44  ;;  %657 = vmatprep.mubr.bf16.mxu1 %v1331_v45 }
  0x5e   : > { %594 = vmatmul.mubr.bf16.gmra.mrb[28].mxu0 %v1333_v46  ;;  %658 = vmatmul.mubr.bf16.gmra.mrb[28].mxu1 %v1334_v47 }
  0xf9   : > { %v1151_v48 = vpop.f32.mrb[0].mxu0  ;;  %v1199_v49 = vpop.f32.mrb[0].mxu1 }
  0xfa   : > { %v1152_v51 = vpop.f32.mrb[1].mxu0  ;;  %v1200_v52 = vpop.f32.mrb[1].mxu1 }
  0xfb   : > { %v1153_v53 = vadd.f32 %v1152_v51, %v1151_v48  ;;  %v1201_v54 = vadd.f32 %v1200_v52, %v1199_v49  ;;  %v1154_v55 = vpop.f32.mrb[2].mxu0  ;;  %v1202_v56 = vpop.f32.mrb[2].mxu1 }
  0xfc   : > { %v1155_v57 = vpop.f32.mrb[3].mxu0  ;;  %v1203_v58 = vpop.f32.mrb[3].mxu1 }
  0xfd   : > { %v540_v59 = vadd.f32 %v1153_v53, %v1462_v50  ;;  %v604_v60 = vadd.f32 %v1201_v54, %v1462_v50  ;;  %v1156_v61 = vadd.f32 %v1155_v57, %v1154_v55  ;;  %v1204_v62 = vadd.f32 %v1203_v58, %v1202_v56 }
  0xff   : > { %v543_v63 = vadd.f32 %v1156_v61, %v1462_v50  ;;  %v607_v0 = vadd.f32 %v1204_v62, %v1462_v50  ;;  %v666_v1 = vmax.f32 %v540_v59, 0.0  ;;  %v682_v2 = vmax.f32 %v604_v60, 0.0 }
 0x101   : > { %v667_v3 = vmax.f32 %v543_v63, 0.0  ;;  %v683_v4 = vmax.f32 %v607_v0, 0.0  ;;  %v1157_v5 = vpop.f32.mrb[4].mxu0  ;;  %v1205_v6 = vpop.f32.mrb[4].mxu1 }
 0x102   : > { %v1158_v7 = vpop.f32.mrb[5].mxu0  ;;  %v1206_v8 = vpop.f32.mrb[5].mxu1 }
 0x103   : > { %v1043_v9 = vpack.c.bf16 %v667_v3, %v666_v1  ;;  %v1083_v10 = vpack.c.bf16 %v683_v4, %v682_v2  ;;  %v1159_v11 = vadd.f32 %v1158_v7, %v1157_v5  ;;  %v1207_v12 = vadd.f32 %v1206_v8, %v1205_v6  ;;  %v1160_v13 = vpop.f32.mrb[6].mxu0  ;;  %v1208_v14 = vpop.f32.mrb[6].mxu1 }
 0x104   : > { %v1161_v15 = vpop.f32.mrb[7].mxu0  ;;  %v1209_v16 = vpop.f32.mrb[7].mxu1 }
 0x105   : > { %1044 = vst [vmem:[%s1472_s4] sm:$0xff] %v1043_v9   ;;  %1127 = vst [vmem:[%s1472_s4 + $0x40] sm:$0xff] %v1083_v10   ;;  %v548_v17 = vadd.f32 %v1159_v11, %v1462_v50  ;;  %v612_v18 = vadd.f32 %v1207_v12, %v1462_v50  ;;  %v1162_v19 = vadd.f32 %v1161_v15, %v1160_v13 }
 0x106   : > { %v1210_v20 = vadd.f32 %v1209_v16, %v1208_v14 }
 0x107   : > { %v551_v21 = vadd.f32 %v1162_v19, %v1462_v50  ;;  %v668_v23 = vmax.f32 %v548_v17, 0.0  ;;  %v684_v24 = vmax.f32 %v612_v18, 0.0 }
 0x108   : > { %v615_v22 = vadd.f32 %v1210_v20, %v1462_v50 }
 0x109   : > { %v669_v25 = vmax.f32 %v551_v21, 0.0  ;;  %v1163_v27 = vpop.f32.mrb[8].mxu0  ;;  %v1211_v28 = vpop.f32.mrb[8].mxu1 }
 0x10a   : > { %v685_v26 = vmax.f32 %v615_v22, 0.0  ;;  %v1164_v29 = vpop.f32.mrb[9].mxu0  ;;  %v1212_v30 = vpop.f32.mrb[9].mxu1 }
 0x10b   : > { %v1048_v31 = vpack.c.bf16 %v669_v25, %v668_v23  ;;  %v1165_v33 = vadd.f32 %v1164_v29, %v1163_v27  ;;  %v1213_v34 = vadd.f32 %v1212_v30, %v1211_v28  ;;  %v1166_v35 = vpop.f32.mrb[10].mxu0  ;;  %v1214_v36 = vpop.f32.mrb[10].mxu1 }
 0x10c   : > { %v1088_v32 = vpack.c.bf16 %v685_v26, %v684_v24  ;;  %v1167_v37 = vpop.f32.mrb[11].mxu0  ;;  %v1215_v38 = vpop.f32.mrb[11].mxu1 }
 0x10d   : > { %1120 = vst [vmem:[%s1472_s4 + $0x8] sm:$0xff] %v1048_v31   ;;  %v556_v39 = vadd.f32 %v1165_v33, %v1462_v50  ;;  %v620_v40 = vadd.f32 %v1213_v34, %v1462_v50  ;;  %v1168_v41 = vadd.f32 %v1167_v37, %v1166_v35  ;;  %v1216_v42 = vadd.f32 %v1215_v38, %v1214_v36 }
 0x10e   : > { %1128 = vst [vmem:[%s1472_s4 + $0x48] sm:$0xff] %v1088_v32  }
 0x10f   : > { %v559_v43 = vadd.f32 %v1168_v41, %v1462_v50  ;;  %v623_v44 = vadd.f32 %v1216_v42, %v1462_v50  ;;  %v670_v45 = vmax.f32 %v556_v39, 0.0  ;;  %v686_v46 = vmax.f32 %v620_v40, 0.0 }
 0x111   : > { %v671_v47 = vmax.f32 %v559_v43, 0.0  ;;  %v687_v48 = vmax.f32 %v623_v44, 0.0  ;;  %v1169_v49 = vpop.f32.mrb[12].mxu0  ;;  %v1217_v51 = vpop.f32.mrb[12].mxu1 }
 0x112   : > { %v1170_v52 = vpop.f32.mrb[13].mxu0  ;;  %v1218_v53 = vpop.f32.mrb[13].mxu1 }
 0x113   : > { %v1053_v54 = vpack.c.bf16 %v671_v47, %v670_v45  ;;  %v1093_v55 = vpack.c.bf16 %v687_v48, %v686_v46  ;;  %v1171_v56 = vadd.f32 %v1170_v52, %v1169_v49  ;;  %v1219_v57 = vadd.f32 %v1218_v53, %v1217_v51  ;;  %v1172_v58 = vpop.f32.mrb[14].mxu0  ;;  %v1220_v59 = vpop.f32.mrb[14].mxu1 }
 0x114   : > { %v1173_v60 = vpop.f32.mrb[15].mxu0  ;;  %v1221_v61 = vpop.f32.mrb[15].mxu1 }
 0x115   : > { %1121 = vst [vmem:[%s1472_s4 + $0x10] sm:$0xff] %v1053_v54   ;;  %1129 = vst [vmem:[%s1472_s4 + $0x50] sm:$0xff] %v1093_v55   ;;  %v564_v62 = vadd.f32 %v1171_v56, %v1462_v50  ;;  %v628_v63 = vadd.f32 %v1219_v57, %v1462_v50  ;;  %v1174_v0 = vadd.f32 %v1173_v60, %v1172_v58 }
 0x116   : > { %v1222_v1 = vadd.f32 %v1221_v61, %v1220_v59 }
 0x117   : > { %v567_v2 = vadd.f32 %v1174_v0, %v1462_v50  ;;  %v672_v4 = vmax.f32 %v564_v62, 0.0  ;;  %v688_v5 = vmax.f32 %v628_v63, 0.0 }
 0x118   : > { %v631_v3 = vadd.f32 %v1222_v1, %v1462_v50 }
 0x119   : > { %v673_v6 = vmax.f32 %v567_v2, 0.0  ;;  %v1175_v8 = vpop.f32.mrb[16].mxu0  ;;  %v1223_v9 = vpop.f32.mrb[16].mxu1 }
 0x11a   : > { %v689_v7 = vmax.f32 %v631_v3, 0.0  ;;  %v1176_v10 = vpop.f32.mrb[17].mxu0  ;;  %v1224_v11 = vpop.f32.mrb[17].mxu1 }
 0x11b   : > { %v1058_v12 = vpack.c.bf16 %v673_v6, %v672_v4  ;;  %v1177_v14 = vadd.f32 %v1176_v10, %v1175_v8  ;;  %v1225_v15 = vadd.f32 %v1224_v11, %v1223_v9  ;;  %v1178_v16 = vpop.f32.mrb[18].mxu0  ;;  %v1226_v17 = vpop.f32.mrb[18].mxu1 }
 0x11c   : > { %v1098_v13 = vpack.c.bf16 %v689_v7, %v688_v5  ;;  %v1179_v18 = vpop.f32.mrb[19].mxu0  ;;  %v1227_v19 = vpop.f32.mrb[19].mxu1 }
 0x11d   : > { %1122 = vst [vmem:[%s1472_s4 + $0x18] sm:$0xff] %v1058_v12   ;;  %v572_v20 = vadd.f32 %v1177_v14, %v1462_v50  ;;  %v636_v21 = vadd.f32 %v1225_v15, %v1462_v50  ;;  %v1180_v22 = vadd.f32 %v1179_v18, %v1178_v16  ;;  %v1228_v23 = vadd.f32 %v1227_v19, %v1226_v17 }
 0x11e   : > { %1130 = vst [vmem:[%s1472_s4 + $0x58] sm:$0xff] %v1098_v13  }
 0x11f   : > { %v575_v24 = vadd.f32 %v1180_v22, %v1462_v50  ;;  %v639_v25 = vadd.f32 %v1228_v23, %v1462_v50  ;;  %v674_v26 = vmax.f32 %v572_v20, 0.0  ;;  %v690_v27 = vmax.f32 %v636_v21, 0.0 }
 0x121   : > { %v675_v28 = vmax.f32 %v575_v24, 0.0  ;;  %v691_v29 = vmax.f32 %v639_v25, 0.0  ;;  %v1181_v30 = vpop.f32.mrb[20].mxu0  ;;  %v1229_v31 = vpop.f32.mrb[20].mxu1 }
 0x122   : > { %v1182_v32 = vpop.f32.mrb[21].mxu0  ;;  %v1230_v33 = vpop.f32.mrb[21].mxu1 }
 0x123   : > { %v1063_v34 = vpack.c.bf16 %v675_v28, %v674_v26  ;;  %v1103_v35 = vpack.c.bf16 %v691_v29, %v690_v27  ;;  %v1183_v36 = vadd.f32 %v1182_v32, %v1181_v30  ;;  %v1231_v37 = vadd.f32 %v1230_v33, %v1229_v31  ;;  %v1184_v38 = vpop.f32.mrb[22].mxu0  ;;  %v1232_v39 = vpop.f32.mrb[22].mxu1 }
 0x124   : > { %v1185_v40 = vpop.f32.mrb[23].mxu0  ;;  %v1233_v41 = vpop.f32.mrb[23].mxu1 }
 0x125   : > { %1123 = vst [vmem:[%s1472_s4 + $0x20] sm:$0xff] %v1063_v34   ;;  %1131 = vst [vmem:[%s1472_s4 + $0x60] sm:$0xff] %v1103_v35   ;;  %v580_v42 = vadd.f32 %v1183_v36, %v1462_v50  ;;  %v644_v43 = vadd.f32 %v1231_v37, %v1462_v50  ;;  %v1186_v44 = vadd.f32 %v1185_v40, %v1184_v38 }
 0x126   : > { %v1234_v45 = vadd.f32 %v1233_v41, %v1232_v39 }
 0x127   : > { %v583_v46 = vadd.f32 %v1186_v44, %v1462_v50  ;;  %v676_v48 = vmax.f32 %v580_v42, 0.0  ;;  %v692_v49 = vmax.f32 %v644_v43, 0.0 }
 0x128   : > { %v647_v47 = vadd.f32 %v1234_v45, %v1462_v50 }
 0x129   : > { %v677_v51 = vmax.f32 %v583_v46, 0.0  ;;  %v1187_v53 = vpop.f32.mrb[24].mxu0  ;;  %v1235_v54 = vpop.f32.mrb[24].mxu1 }
 0x12a   : > { %v693_v52 = vmax.f32 %v647_v47, 0.0  ;;  %v1188_v55 = vpop.f32.mrb[25].mxu0  ;;  %v1236_v56 = vpop.f32.mrb[25].mxu1 }
 0x12b   : > { %v1068_v57 = vpack.c.bf16 %v677_v51, %v676_v48  ;;  %v1189_v59 = vadd.f32 %v1188_v55, %v1187_v53  ;;  %v1237_v60 = vadd.f32 %v1236_v56, %v1235_v54  ;;  %v1190_v61 = vpop.f32.mrb[26].mxu0  ;;  %v1238_v62 = vpop.f32.mrb[26].mxu1 }
 0x12c   : > { %v1108_v58 = vpack.c.bf16 %v693_v52, %v692_v49  ;;  %v1191_v63 = vpop.f32.mrb[27].mxu0  ;;  %v1239_v0 = vpop.f32.mrb[27].mxu1 }
 0x12d   : > { %1124 = vst [vmem:[%s1472_s4 + $0x28] sm:$0xff] %v1068_v57   ;;  %v588_v1 = vadd.f32 %v1189_v59, %v1462_v50  ;;  %v652_v2 = vadd.f32 %v1237_v60, %v1462_v50  ;;  %v1192_v3 = vadd.f32 %v1191_v63, %v1190_v61  ;;  %v1240_v4 = vadd.f32 %v1239_v0, %v1238_v62 }
 0x12e   : > { %1132 = vst [vmem:[%s1472_s4 + $0x68] sm:$0xff] %v1108_v58  }
 0x12f   : > { %v591_v5 = vadd.f32 %v1192_v3, %v1462_v50  ;;  %v655_v6 = vadd.f32 %v1240_v4, %v1462_v50  ;;  %v678_v7 = vmax.f32 %v588_v1, 0.0  ;;  %v694_v8 = vmax.f32 %v652_v2, 0.0 }
 0x131   : > { %v679_v9 = vmax.f32 %v591_v5, 0.0  ;;  %v695_v10 = vmax.f32 %v655_v6, 0.0  ;;  %v1193_v11 = vpop.f32.mrb[28].mxu0  ;;  %v1241_v12 = vpop.f32.mrb[28].mxu1 }
 0x132   : > { %v1194_v13 = vpop.f32.mrb[29].mxu0  ;;  %v1242_v14 = vpop.f32.mrb[29].mxu1 }
 0x133   : > { %v1073_v15 = vpack.c.bf16 %v679_v9, %v678_v7  ;;  %v1113_v16 = vpack.c.bf16 %v695_v10, %v694_v8  ;;  %v1195_v17 = vadd.f32 %v1194_v13, %v1193_v11  ;;  %v1243_v18 = vadd.f32 %v1242_v14, %v1241_v12  ;;  %v1196_v19 = vpop.f32.mrb[30].mxu0  ;;  %v1244_v20 = vpop.f32.mrb[30].mxu1 }
 0x134   : > { %v1197_v21 = vpop.f32.mrb[31].mxu0  ;;  %v1245_v22 = vpop.f32.mrb[31].mxu1 }
 0x135   : > { %1125 = vst [vmem:[%s1472_s4 + $0x30] sm:$0xff] %v1073_v15   ;;  %1133 = vst [vmem:[%s1472_s4 + $0x70] sm:$0xff] %v1113_v16   ;;  %v596_v23 = vadd.f32 %v1195_v17, %v1462_v50  ;;  %v660_v24 = vadd.f32 %v1243_v18, %v1462_v50  ;;  %v1198_v25 = vadd.f32 %v1197_v21, %v1196_v19 }
 0x136   : > { %v1246_v26 = vadd.f32 %v1245_v22, %v1244_v20 }
 0x137   : > { %v599_v27 = vadd.f32 %v1198_v25, %v1462_v50  ;;  %v680_v29 = vmax.f32 %v596_v23, 0.0  ;;  %v696_v30 = vmax.f32 %v660_v24, 0.0 }
 0x138   : > { %v663_v28 = vadd.f32 %v1246_v26, %v1462_v50 }
 0x139   : > { %v681_v31 = vmax.f32 %v599_v27, 0.0 }
 0x13a   : > { %v697_v32 = vmax.f32 %v663_v28, 0.0 }
 0x13b   : > { %v1078_v33 = vpack.c.bf16 %v681_v31, %v680_v29 }
 0x13c   : > { %v1118_v34 = vpack.c.bf16 %v697_v32, %v696_v30 }
 0x13d   : > { %1126 = vst [vmem:[%s1472_s4 + $0x38] sm:$0xff] %v1078_v33  }
 0x13e   : > { %1134 = vst [vmem:[%s1472_s4 + $0x78] sm:$0xff] %v1118_v34  }
 0x13f PF: > { %s13_s12 = sadd.s32 1, %s1341_s12  }
 0x140   : > { %p10_p4 = scmp.ge.s32.totalorder %s13_s12, 4  }
 0x142   :  { %12 = sbr.rel (!%p10_p4) target bundleno = 1 (0x1), region = 62 }

// kernel: cnn_forward.4
= control target key start
LH: loop header
LB: loop body
LE: loop exit
PB: predicated region body
PF: predicated region fallthrough
CT: control target
= control target key end

     0   :  { %s2540_s12 = smov 0   ;;  %s2929_s0 = inlined_call_operand.vmem [shape: bf16[512,640], index: 0, kind: input, shape index: {}]   ;;  %s2930_s1 = inlined_call_operand.vmem [shape: bf16[640,128], index: 1, kind: input, shape index: {}]   ;;  %s2931_s2 = inlined_call_operand.vmem [shape: f32[1,128], index: 2, kind: input, shape index: {}]   ;;  %s2932_s3 = inlined_call_operand.vmem [shape: bf16[512,128], index: 3, kind: output, shape index: {}]  }
   0x1 LB: > { %s1748_s13 = sadd.s32 4294967295, %s2518_s12   ;;  %p1752_p0 = scmp.ge.s32.totalorder %s2518_s12, 1  ;;  %s2518_s12 = sphi %s2540_s12, %s13_s12  }
   0x2   : > { %p139_p1 = scmp.lt.s32.totalorder %s2518_s12, 3 }
   0x4   : > { %p140_p2 = pnand %p1752_p0, %p139_p1 }
   0x5   : > { %v2360_v0 = vld [vmem:[%s2930_s1 + $0x40] sm:$0xff] (!%p140_p2)   ;;  %s1753_s16 = sshll.u32 (!%p140_p2), %s1748_s13, 5  ;;  %v2362_v2 = vld [vmem:[%s2930_s1 + $0x48] sm:$0xff] (!%p140_p2)   ;;  %v2364_v4 = vld [vmem:[%s2930_s1 + $0x50] sm:$0xff] (!%p140_p2)  }
   0x6   : > { %143 = sbr.rel (%p140_p2) target bundleno = 416 (0x1a0), region = 32  ;;  %v2361_v1 = vld [vmem:[%s2930_s1] sm:$0xff] (!%p140_p2)   ;;  %2039 = vmatprep.subr.bf16.mxu0 (!%p140_p2), %v2360_v0  ;;  %2335 = vmatprep.subr.bf16.mxu1 (!%p140_p2), %v2360_v0  ;;  %p165_p3 = scmp.lt.s32.totalorder (!%p140_p2), %s1753_s16, 63  ;;  %v2363_v3 = vld [vmem:[%s2930_s1 + $0x8] sm:$0xff] (!%p140_p2)   ;;  %v2365_v5 = vld [vmem:[%s2930_s1 + $0x10] sm:$0xff] (!%p140_p2)  }
   0x7   : > { %2040 = vmatpush3.bf16.msra.mxu0 (!%p140_p2), %v2361_v1  ;;  %2343 = vmatpush3.bf16.msra.mxu1 (!%p140_p2), %v2361_v1  ;;  %v2366_v6 = vld [vmem:[%s2930_s1 + $0x58] sm:$0xff] (!%p140_p2)   ;;  %v2368_v8 = vld [vmem:[%s2930_s1 + $0x60] sm:$0xff] (!%p140_p2)   ;;  %v2370_v10 = vld [vmem:[%s2930_s1 + $0x68] sm:$0xff] (!%p140_p2)  }
   0x8   : > { %2041 = vmatprep.subr.bf16.mxu0 (!%p140_p2), %v2362_v2  ;;  %2336 = vmatprep.subr.bf16.mxu1 (!%p140_p2), %v2362_v2  ;;  %v2367_v7 = vld [vmem:[%s2930_s1 + $0x18] sm:$0xff] (!%p140_p2)   ;;  %v2369_v9 = vld [vmem:[%s2930_s1 + $0x20] sm:$0xff] (!%p140_p2)   ;;  %v2371_v13 = vld [vmem:[%s2930_s1 + $0x28] sm:$0xff] (!%p140_p2)  }
   0x9   : > { %v2372_v14 = vld [vmem:[%s2930_s1 + $0x70] sm:$0xff] (!%p140_p2)   ;;  %v2374_v16 = vld [vmem:[%s2930_s1 + $0x78] sm:$0xff] (!%p140_p2)   ;;  %v2382_v18 = vld [vmem:[%s2930_s1 + $0xc0] sm:$0xff] (!%p140_p2)  }
   0xa   : > { %v2373_v15 = vld [vmem:[%s2930_s1 + $0x30] sm:$0xff] (!%p140_p2)   ;;  %v2375_v17 = vld [vmem:[%s2930_s1 + $0x38] sm:$0xff] (!%p140_p2)   ;;  %v2385_v19 = vld [vmem:[%s2930_s1 + $0x100] sm:$0xff] (!%p140_p2)  }
   0xb   : > { %2042 = vmatpush3.bf16.msra.mxu0 (!%p140_p2), %v2363_v3  ;;  %2344 = vmatpush3.bf16.msra.mxu1 (!%p140_p2), %v2363_v3  ;;  %v2383_v22 = vld [vmem:[%s2930_s1 + $0x80] sm:$0xff] (!%p140_p2)   ;;  %v2384_v23 = vld [vmem:[%s2930_s1 + $0xc8] sm:$0xff] (!%p140_p2)   ;;  %v2393_v29 = vld [vmem:[%s2930_s1 + $0xd0] sm:$0xff] (!%p140_p2)  }
   0xc   : > { %2043 = vmatprep.subr.bf16.mxu0 (!%p140_p2), %v2364_v4  ;;  %2337 = vmatprep.subr.bf16.mxu1 (!%p140_p2), %v2364_v4  ;;  %v2404_v26 = vld [vmem:[%s2930_s1 + $0x108] sm:$0xff] (!%p140_p2)   ;;  %v2394_v31 = vld [vmem:[%s2930_s1 + $0x90] sm:$0xff] (!%p140_p2)   ;;  %v2395_v33 = vld [vmem:[%s2930_s1 + $0xd8] sm:$0xff] (!%p140_p2)  }
   0xd   : > { %s2934_s16 = smov (!%p165_p3, %s1753_s16), 63  ;;  %v2386_v27 = vld [vmem:[%s2930_s1 + $0x88] sm:$0xff]   ;;  %v2396_v35 = vld [vmem:[%s2930_s1 + $0x98] sm:$0xff]   ;;  %v2403_v36 = vld [vmem:[%s2930_s1 + $0xe0] sm:$0xff]  }
   0xe   : > { %s2351_s29 = smul.u32 20, %s2934_s16  ;;  %v2417_v38 = vld [vmem:[%s2930_s1 + $0x110] sm:$0xff]   ;;  %v2405_v40 = vld [vmem:[%s2930_s1 + $0xa0] sm:$0xff]   ;;  %v2406_v41 = vld [vmem:[%s2930_s1 + $0xe8] sm:$0xff]   ;;  %s1756_s27 = sshll.u32 %s2934_s16, 2 }
   0xf   : > { %2044 = vmatpush3.bf16.msra.mxu0 %v2365_v5  ;;  %2345 = vmatpush3.bf16.msra.mxu1 %v2365_v5  ;;  %v2407_v44 = vld [vmem:[%s2930_s1 + $0xa8] sm:$0xff]   ;;  %v2431_v45 = vld [vmem:[%s2930_s1 + $0x118] sm:$0xff]   ;;  %v2414_v48 = vld [vmem:[%s2930_s1 + $0xf0] sm:$0xff]   ;;  %s2852_s30 = scalar_lea.vmem %s2932_s3, %s1756_s27 }
  0x10   : > { %2045 = vmatprep.subr.bf16.mxu0 %v2366_v6  ;;  %2338 = vmatprep.subr.bf16.mxu1 %v2366_v6  ;;  %s2581_s9 = scalar_lea.vmem %s2929_s0, %s2351_s29  ;;  %v2415_v49 = vld [vmem:[%s2930_s1 + $0xb0] sm:$0xff]   ;;  %v2416_v50 = vld [vmem:[%s2930_s1 + $0xf8] sm:$0xff]   ;;  %v2438_v52 = vld [vmem:[%s2930_s1 + $0x120] sm:$0xff]  }
  0x11   : > { %v2378_v11 = vld [vmem:[%s2581_s9 + $0x4] ss:$20 sps:$4 sm:$0xff]   ;;  %v2376_v20 = vld [vmem:[%s2581_s9] ss:$20 sps:$4 sm:$0xff]   ;;  %v2391_v28 = vld [vmem:[%s2581_s9 + $0x28] ss:$20 sps:$4 sm:$0xff]  }
  0x12   : > { %v2381_v12 = vld [vmem:[%s2581_s9 + $0x1e4] ss:$20 sps:$4 sm:$0xff]   ;;  %1049 = vmatprep.mubr.bf16.mxu0 %v2378_v11  ;;  %v2379_v21 = vld [vmem:[%s2581_s9 + $0x1e0] ss:$20 sps:$4 sm:$0xff]   ;;  %v2392_v30 = vld [vmem:[%s2581_s9 + $0x208] ss:$20 sps:$4 sm:$0xff]  }
  0x13   : > { %2046 = vmatpush3.bf16.msra.mxu0 %v2367_v7  ;;  %2346 = vmatpush3.bf16.msra.mxu1 %v2367_v7  ;;  %v2387_v24 = vld [vmem:[%s2581_s9 + $0x2c] ss:$20 sps:$4 sm:$0xff]   ;;  %v2397_v32 = vld [vmem:[%s2581_s9 + $0x54] ss:$20 sps:$4 sm:$0xff]   ;;  %v2401_v37 = vld [vmem:[%s2581_s9 + $0x50] ss:$20 sps:$4 sm:$0xff]  }
  0x14   : > { %2047 = vmatprep.subr.bf16.mxu0 %v2368_v8  ;;  %2339 = vmatprep.subr.bf16.mxu1 %v2368_v8  ;;  %v2389_v25 = vld [vmem:[%s2581_s9 + $0x20c] ss:$20 sps:$4 sm:$0xff]   ;;  %v2399_v34 = vld [vmem:[%s2581_s9 + $0x234] ss:$20 sps:$4 sm:$0xff]   ;;  %v2402_v39 = vld [vmem:[%s2581_s9 + $0x230] ss:$20 sps:$4 sm:$0xff]  }
  0x15   : > { %1145 = vmatprep.mubr.bf16.mxu1 %v2381_v12  ;;  %v2408_v42 = vld [vmem:[%s2581_s9 + $0x7c] ss:$20 sps:$4 sm:$0xff]   ;;  %v2412_v46 = vld [vmem:[%s2581_s9 + $0x78] ss:$20 sps:$4 sm:$0xff]   ;;  %v2424_v56 = vld [vmem:[%s2581_s9 + $0xa0] ss:$20 sps:$4 sm:$0xff]  }
  0x16   : > { %v2410_v43 = vld [vmem:[%s2581_s9 + $0x25c] ss:$20 sps:$4 sm:$0xff]   ;;  %v2413_v47 = vld [vmem:[%s2581_s9 + $0x258] ss:$20 sps:$4 sm:$0xff]   ;;  %v2427_v59 = vld [vmem:[%s2581_s9 + $0x34] ss:$20 sps:$4 sm:$0xff]  }
  0x17   : > { %2048 = vmatpush3.bf16.msra.mxu0 %v2369_v9  ;;  %2347 = vmatpush3.bf16.msra.mxu1 %v2369_v9  ;;  %v2419_v51 = vld [vmem:[%s2581_s9 + $0xa4] ss:$20 sps:$4 sm:$0xff]   ;;  %v2423_v53 = vld [vmem:[%s2581_s9 + $0xc] ss:$20 sps:$4 sm:$0xff]   ;;  %v2421_v55 = vld [vmem:[%s2581_s9 + $0x8] ss:$20 sps:$4 sm:$0xff]  }
  0x18   : > { %2049 = vmatprep.subr.bf16.mxu0 %v2370_v10  ;;  %2340 = vmatprep.subr.bf16.mxu1 %v2370_v10  ;;  %v2418_v54 = vld [vmem:[%s2930_s1 + $0xb8] sm:$0xff]   ;;  %v2451_v57 = vld [vmem:[%s2930_s1 + $0x128] sm:$0xff]   ;;  %v2458_v60 = vld [vmem:[%s2930_s1 + $0x130] sm:$0xff]  }
  0x19   : > { %v2425_v58 = vld [vmem:[%s2581_s9 + $0xcc] ss:$20 sps:$4 sm:$0xff]   ;;  %v2429_v61 = vld [vmem:[%s2581_s9 + $0xc8] ss:$20 sps:$4 sm:$0xff]   ;;  %v2430_v62 = vld [vmem:[%s2581_s9 + $0x30] ss:$20 sps:$4 sm:$0xff]  }
  0x1a   : > { %v2432_v63 = vld [vmem:[%s2581_s9 + $0xf4] ss:$20 sps:$4 sm:$0xff]   ;;  %v2434_v0 = vld [vmem:[%s2581_s9 + $0x5c] ss:$20 sps:$4 sm:$0xff]   ;;  %v2437_v3 = vld [vmem:[%s2581_s9 + $0x58] ss:$20 sps:$4 sm:$0xff]  }
  0x1b   : > { %2050 = vmatpush3.bf16.msra.mxu0 %v2371_v13  ;;  %2348 = vmatpush3.bf16.msra.mxu1 %v2371_v13  ;;  %v2471_v1 = vld [vmem:[%s2930_s1 + $0x138] sm:$0xff]   ;;  %v2436_v2 = vld [vmem:[%s2581_s9 + $0xf0] ss:$20 sps:$4 sm:$0xff]   ;;  %v2444_v7 = vld [vmem:[%s2581_s9 + $0x80] ss:$20 sps:$4 sm:$0xff]  }
  0x1c   : > { %2051 = vmatprep.subr.bf16.mxu0 %v2372_v14  ;;  %2341 = vmatprep.subr.bf16.mxu1 %v2372_v14  ;;  %v2439_v4 = vld [vmem:[%s2581_s9 + $0x11c] ss:$20 sps:$4 sm:$0xff]   ;;  %v2441_v5 = vld [vmem:[%s2581_s9 + $0x84] ss:$20 sps:$4 sm:$0xff]   ;;  %v2447_v9 = vld [vmem:[%s2581_s9 + $0xac] ss:$20 sps:$4 sm:$0xff]  }
  0x1d   : > { %v2443_v6 = vld [vmem:[%s2581_s9 + $0x118] ss:$20 sps:$4 sm:$0xff]   ;;  %v2449_v10 = vld [vmem:[%s2581_s9 + $0x140] ss:$20 sps:$4 sm:$0xff]   ;;  %v2450_v11 = vld [vmem:[%s2581_s9 + $0xa8] ss:$20 sps:$4 sm:$0xff]  }
  0x1e   : > { %v2445_v8 = vld [vmem:[%s2581_s9 + $0x144] ss:$20 sps:$4 sm:$0xff]   ;;  %v2452_v12 = vld [vmem:[%s2581_s9 + $0x16c] ss:$20 sps:$4 sm:$0xff]   ;;  %v2454_v13 = vld [vmem:[%s2581_s9 + $0xd4] ss:$20 sps:$4 sm:$0xff]  }
  0x1f   : > { %2052 = vmatpush3.bf16.msra.mxu0 %v2373_v15  ;;  %2349 = vmatpush3.bf16.msra.mxu1 %v2373_v15  ;;  %v2456_v14 = vld [vmem:[%s2581_s9 + $0x168] ss:$20 sps:$4 sm:$0xff]   ;;  %v2457_v15 = vld [vmem:[%s2581_s9 + $0xd0] ss:$20 sps:$4 sm:$0xff]  }
  0x20   : > { %2053 = vmatprep.subr.bf16.mxu0 %v2374_v16  ;;  %2342 = vmatprep.subr.bf16.mxu1 %v2374_v16  ;;  %v2459_v16 = vld [vmem:[%s2581_s9 + $0x194] ss:$20 sps:$4 sm:$0xff]  }
  0x23   : > { %2054 = vmatpush3.bf16.msra.mxu0 %v2375_v17  ;;  %2350 = vmatpush3.bf16.msra.mxu1 %v2375_v17  ;;  %v2461_v17 = vld [vmem:[%s2581_s9 + $0xfc] ss:$20 sps:$4 sm:$0xff]  }
  0x24   : > { %2151 = vmatprep.subr.bf16.mxu1 %v2382_v18  ;;  %2287 = vmatprep.subr.bf16.mxu0 %v2385_v19  ;;  %v2463_v18 = vld [vmem:[%s2581_s9 + $0x190] ss:$20 sps:$4 sm:$0xff]  }
  0x26   : > { %1050 = vmatmul.mubr.bf16.vlgmr.msra.gmra.mrb[0].mxu0 %v2376_v20  ;;  %1146 = vmatmul.mubr.bf16.vlgmr.msra.gmra.mrb[0].mxu1 %v2379_v21  ;;  %v2465_v20 = vld [vmem:[%s2581_s9 + $0x1bc] ss:$20 sps:$4 sm:$0xff]   ;;  %v2467_v21 = vld [vmem:[%s2581_s9 + $0x124] ss:$20 sps:$4 sm:$0xff]  }
  0x27   : > { %2152 = vmatpush3.bf16.msra.mxu1 %v2383_v22  ;;  %2288 = vmatpush3.bf16.msra.mxu0 %v2385_v19  ;;  %v2464_v19 = vld [vmem:[%s2581_s9 + $0xf8] ss:$20 sps:$4 sm:$0xff]  }
  0x28   : > { %2153 = vmatprep.subr.bf16.mxu1 %v2384_v23  ;;  %1057 = vmatprep.mubr.bf16.mxu0 %v2387_v24  ;;  %v2469_v22 = vld [vmem:[%s2581_s9 + $0x1b8] ss:$20 sps:$4 sm:$0xff]   ;;  %v2470_v23 = vld [vmem:[%s2581_s9 + $0x120] ss:$20 sps:$4 sm:$0xff]  }
  0x29   : > { %1153 = vmatprep.mubr.bf16.mxu1 %v2389_v25  ;;  %2289 = vmatprep.subr.bf16.mxu0 %v2404_v26  ;;  %v2472_v24 = vld [vmem:[%s2581_s9 + $0x14c] ss:$20 sps:$4 sm:$0xff]   ;;  %v2474_v25 = vld [vmem:[%s2581_s9 + $0x10] ss:$20 sps:$4 sm:$0xff]  }
  0x2b   : > { %2154 = vmatpush3.bf16.msra.mxu1 %v2386_v27  ;;  %2290 = vmatpush3.bf16.msra.mxu0 %v2404_v26  ;;  %v2475_v26 = vld [vmem:[%s2581_s9 + $0x148] ss:$20 sps:$4 sm:$0xff]   ;;  %v2476_v27 = vld [vmem:[%s2581_s9 + $0x38] ss:$20 sps:$4 sm:$0xff]  }
  0x2c   : > { %2155 = vmatprep.subr.bf16.mxu1 %v2393_v29  ;;  %2291 = vmatprep.subr.bf16.mxu0 %v2417_v38  ;;  %v2479_v29 = vld [vmem:[%s2581_s9 + $0x60] ss:$20 sps:$4 sm:$0xff]  }
  0x2e   : > { %1058 = vmatmul.mubr.bf16.gmra.mrb[4].mxu0 %v2391_v28  ;;  %1154 = vmatmul.mubr.bf16.gmra.mrb[4].mxu1 %v2392_v30  ;;  %v2477_v28 = vld [vmem:[%s2581_s9 + $0x174] ss:$20 sps:$4 sm:$0xff]   ;;  %v2480_v30 = vld [vmem:[%s2581_s9 + $0x170] ss:$20 sps:$4 sm:$0xff]  }
  0x2f   : > { %2156 = vmatpush3.bf16.msra.mxu1 %v2394_v31  ;;  %1065 = vmatprep.mubr.bf16.mxu0 %v2397_v32  ;;  %v2481_v31 = vld [vmem:[%s2581_s9 + $0x88] ss:$20 sps:$4 sm:$0xff]  }
  0x30   : > { %2157 = vmatprep.subr.bf16.mxu1 %v2395_v33  ;;  %1161 = vmatprep.mubr.bf16.mxu1 %v2399_v34  ;;  %v2482_v32 = vld [vmem:[%s2581_s9 + $0x19c] ss:$20 sps:$4 sm:$0xff]   ;;  %v2485_v34 = vld [vmem:[%s2581_s9 + $0x198] ss:$20 sps:$4 sm:$0xff]  }
  0x31   : > { %2292 = vmatpush3.bf16.msra.mxu0 %v2417_v38  ;;  %v2484_v33 = vld [vmem:[%s2581_s9 + $0xb0] ss:$20 sps:$4 sm:$0xff]   ;;  %v2490_v38 = vld [vmem:[%s2581_s9 + $0x1c0] ss:$20 sps:$4 sm:$0xff]  }
  0x32   : > { %2293 = vmatprep.subr.bf16.mxu0 %v2431_v45 }
  0x33   : > { %2158 = vmatpush3.bf16.msra.mxu1 %v2396_v35  ;;  %v2486_v35 = vld [vmem:[%s2581_s9 + $0xd8] ss:$20 sps:$4 sm:$0xff]  }
  0x34   : > { %2159 = vmatprep.subr.bf16.mxu1 %v2403_v36  ;;  %v2487_v36 = vld [vmem:[%s2581_s9 + $0x1c4] ss:$20 sps:$4 sm:$0xff]  }
  0x35   : > { %2294 = vmatpush3.bf16.msra.mxu0 %v2431_v45  ;;  %v2499_v45 = vld [vmem:[%s2581_s9 + $0x1a0] ss:$20 sps:$4 sm:$0xff]  }
  0x36   : > { %1066 = vmatmul.mubr.bf16.gmra.mrb[8].mxu0 %v2401_v37  ;;  %1162 = vmatmul.mubr.bf16.gmra.mrb[8].mxu1 %v2402_v39  ;;  %v2489_v37 = vld [vmem:[%s2581_s9 + $0x100] ss:$20 sps:$4 sm:$0xff]   ;;  %v2491_v39 = vld [vmem:[%s2581_s9 + $0x128] ss:$20 sps:$4 sm:$0xff]  }
  0x37   : > { %2160 = vmatpush3.bf16.msra.mxu1 %v2405_v40  ;;  %1073 = vmatprep.mubr.bf16.mxu0 %v2408_v42  ;;  %v2492_v40 = vld [vmem:[%s2581_s9 + $0x1ec] ss:$20 sps:$4 sm:$0xff]   ;;  %v2495_v42 = vld [vmem:[%s2581_s9 + $0x1e8] ss:$20 sps:$4 sm:$0xff]  }
  0x38   : > { %2161 = vmatprep.subr.bf16.mxu1 %v2406_v41  ;;  %1169 = vmatprep.mubr.bf16.mxu1 %v2410_v43  ;;  %v2494_v41 = vld [vmem:[%s2581_s9 + $0x150] ss:$20 sps:$4 sm:$0xff]   ;;  %v2496_v43 = vld [vmem:[%s2581_s9 + $0x178] ss:$20 sps:$4 sm:$0xff]  }
  0x39   : > { %2295 = vmatprep.subr.bf16.mxu0 %v2438_v52 }
  0x3a   : > { %2296 = vmatpush3.bf16.msra.mxu0 %v2438_v52  ;;  %v2507_v52 = vld [vmem:[%s2581_s9 + $0x264] ss:$20 sps:$4 sm:$0xff]  }
  0x3b   : > { %2162 = vmatpush3.bf16.msra.mxu1 %v2407_v44  ;;  %2297 = vmatprep.subr.bf16.mxu0 %v2451_v57  ;;  %v2497_v44 = vld [vmem:[%s2581_s9 + $0x214] ss:$20 sps:$4 sm:$0xff]  }
  0x3c   : > { %2163 = vmatprep.subr.bf16.mxu1 %v2414_v48  ;;  %v2502_v48 = vld [vmem:[%s2581_s9 + $0x23c] ss:$20 sps:$4 sm:$0xff]  }
  0x3e   : > { %1074 = vmatmul.mubr.bf16.gmra.mrb[12].mxu0 %v2412_v46  ;;  %1170 = vmatmul.mubr.bf16.gmra.mrb[12].mxu1 %v2413_v47  ;;  %v2500_v46 = vld [vmem:[%s2581_s9 + $0x210] ss:$20 sps:$4 sm:$0xff]   ;;  %v2501_v47 = vld [vmem:[%s2581_s9 + $0x1c8] ss:$20 sps:$4 sm:$0xff]  }
  0x3f   : > { %2164 = vmatpush3.bf16.msra.mxu1 %v2415_v49  ;;  %1081 = vmatprep.mubr.bf16.mxu0 %v2419_v51  ;;  %v2504_v49 = vld [vmem:[%s2581_s9 + $0x1f0] ss:$20 sps:$4 sm:$0xff]   ;;  %v2506_v51 = vld [vmem:[%s2581_s9 + $0x218] ss:$20 sps:$4 sm:$0xff]  }
  0x40   : > { %2165 = vmatprep.subr.bf16.mxu1 %v2416_v50  ;;  %1210 = vmatprep.mubr.bf16.mxu1 %v2423_v53  ;;  %v2505_v50 = vld [vmem:[%s2581_s9 + $0x238] ss:$20 sps:$4 sm:$0xff]   ;;  %v2509_v53 = vld [vmem:[%s2581_s9 + $0x240] ss:$20 sps:$4 sm:$0xff]  }
  0x41   : > { %2298 = vmatpush3.bf16.msra.mxu0 %v2451_v57 }
  0x42   : > { %2299 = vmatprep.subr.bf16.mxu0 %v2458_v60 }
  0x43   : > { %2166 = vmatpush3.bf16.msra.mxu1 %v2418_v54  ;;  %v2510_v54 = vld [vmem:[%s2581_s9 + $0x260] ss:$20 sps:$4 sm:$0xff]  }
  0x45   : > { %2300 = vmatpush3.bf16.msra.mxu0 %v2458_v60 }
  0x46   : > { %1082 = vmatmul.mubr.bf16.gmra.mrb[16].mxu0 %v2424_v56  ;;  %1211 = vmatmul.mubr.bf16.vlgmr.msra.gmra.mrb[16].mxu1 %v2421_v55  ;;  %v2511_v55 = vld [vmem:[%s2581_s9 + $0x268] ss:$20 sps:$4 sm:$0xff]  }
  0x47   : > { %1089 = vmatprep.mubr.bf16.mxu0 %v2425_v58  ;;  %1218 = vmatprep.mubr.bf16.mxu1 %v2427_v59 }
  0x48   : > { %2301 = vmatprep.subr.bf16.mxu0 %v2471_v1 }
  0x49   : > { %2302 = vmatpush3.bf16.msra.mxu0 %v2471_v1 }
  0x4e   : > { %1090 = vmatmul.mubr.bf16.gmra.mrb[20].mxu0 %v2429_v61  ;;  %1219 = vmatmul.mubr.bf16.gmra.mrb[20].mxu1 %v2430_v62 }
  0x4f   : > { %1097 = vmatprep.mubr.bf16.mxu0 %v2432_v63  ;;  %1226 = vmatprep.mubr.bf16.mxu1 %v2434_v0 }
  0x56   : > { %1098 = vmatmul.mubr.bf16.gmra.mrb[24].mxu0 %v2436_v2  ;;  %1227 = vmatmul.mubr.bf16.gmra.mrb[24].mxu1 %v2437_v3 }
  0x57   : > { %1105 = vmatprep.mubr.bf16.mxu0 %v2439_v4  ;;  %1234 = vmatprep.mubr.bf16.mxu1 %v2441_v5 }
  0x5e   : > { %1106 = vmatmul.mubr.bf16.gmra.mrb[28].mxu0 %v2443_v6  ;;  %1235 = vmatmul.mubr.bf16.gmra.mrb[28].mxu1 %v2444_v7 }
  0x5f   : > { %1113 = vmatprep.mubr.bf16.mxu0 %v2445_v8  ;;  %1242 = vmatprep.mubr.bf16.mxu1 %v2447_v9 }
  0x66   : > { %1114 = vmatmul.mubr.bf16.gmra.mrb[32].mxu0 %v2449_v10  ;;  %1243 = vmatmul.mubr.bf16.gmra.mrb[32].mxu1 %v2450_v11 }
  0x67   : > { %1121 = vmatprep.mubr.bf16.mxu0 %v2452_v12  ;;  %1250 = vmatprep.mubr.bf16.mxu1 %v2454_v13 }
  0x6e   : > { %1122 = vmatmul.mubr.bf16.gmra.mrb[36].mxu0 %v2456_v14  ;;  %1251 = vmatmul.mubr.bf16.gmra.mrb[36].mxu1 %v2457_v15 }
  0x6f   : > { %1129 = vmatprep.mubr.bf16.mxu0 %v2459_v16  ;;  %1258 = vmatprep.mubr.bf16.mxu1 %v2461_v17 }
  0x76   : > { %1130 = vmatmul.mubr.bf16.gmra.mrb[40].mxu0 %v2463_v18  ;;  %1259 = vmatmul.mubr.bf16.gmra.mrb[40].mxu1 %v2464_v19 }
  0x77   : > { %1137 = vmatprep.mubr.bf16.mxu0 %v2465_v20  ;;  %1266 = vmatprep.mubr.bf16.mxu1 %v2467_v21 }
  0x7e   : > { %1138 = vmatmul.mubr.bf16.gmra.mrb[44].mxu0 %v2469_v22  ;;  %1267 = vmatmul.mubr.bf16.gmra.mrb[44].mxu1 %v2470_v23 }
  0x7f   : > { %1274 = vmatprep.mubr.bf16.mxu1 %v2472_v24  ;;  %2303 = vmatprep.mubr.bf16.mxu0 %v2474_v25 }
  0x86   : > { %1275 = vmatmul.mubr.bf16.gmra.mrb[48].mxu1 %v2475_v26  ;;  %2304 = vmatmul.mubr.bf16.vlgmr.msra.gmra.mrb[48].mxu0 %v2476_v27 }
  0x87   : > { %1282 = vmatprep.mubr.bf16.mxu1 %v2477_v28  ;;  %2307 = vmatprep.mubr.bf16.mxu0 %v2479_v29 }
  0x8e   : > { %1283 = vmatmul.mubr.bf16.gmra.mrb[52].mxu1 %v2480_v30  ;;  %2308 = vmatmul.mubr.bf16.gmra.mrb[52].mxu0 %v2481_v31 }
  0x8f   : > { %1290 = vmatprep.mubr.bf16.mxu1 %v2482_v32  ;;  %2311 = vmatprep.mubr.bf16.mxu0 %v2484_v33 }
  0x96   : > { %1291 = vmatmul.mubr.bf16.gmra.mrb[56].mxu1 %v2485_v34  ;;  %2312 = vmatmul.mubr.bf16.gmra.mrb[56].mxu0 %v2486_v35 }
  0x97   : > { %1298 = vmatprep.mubr.bf16.mxu1 %v2487_v36  ;;  %2315 = vmatprep.mubr.bf16.mxu0 %v2489_v37 }
  0x9e   : > { %1299 = vmatmul.mubr.bf16.gmra.mrb[60].mxu1 %v2490_v38  ;;  %2316 = vmatmul.mubr.bf16.gmra.mrb[60].mxu0 %v2491_v39 }
  0x9f   : > { %1306 = vmatprep.mubr.bf16.mxu1 %v2492_v40  ;;  %2319 = vmatprep.mubr.bf16.mxu0 %v2494_v41 }
  0xa6   : > { %1307 = vmatmul.mubr.bf16.gmra.mrb[64].mxu1 %v2495_v42  ;;  %2320 = vmatmul.mubr.bf16.gmra.mrb[64].mxu0 %v2496_v43  ;;  %v2775_v42 = vld [vmem:[%s2931_s2] ss:$0 sm:$0xff] }
  0xa7   : > { %1314 = vmatprep.mubr.bf16.mxu1 %v2497_v44  ;;  %2323 = vmatprep.mubr.bf16.mxu0 %v2499_v45 }
  0xae   : > { %1315 = vmatmul.mubr.bf16.gmra.mrb[68].mxu1 %v2500_v46  ;;  %2324 = vmatmul.mubr.bf16.gmra.mrb[68].mxu0 %v2501_v47 }
  0xaf   : > { %1322 = vmatprep.mubr.bf16.mxu1 %v2502_v48  ;;  %2327 = vmatprep.mubr.bf16.mxu0 %v2504_v49 }
  0xb6   : > { %1323 = vmatmul.mubr.bf16.gmra.mrb[72].mxu1 %v2505_v50  ;;  %2328 = vmatmul.mubr.bf16.gmra.mrb[72].mxu0 %v2506_v51 }
  0xb7   : > { %1330 = vmatprep.mubr.bf16.mxu1 %v2507_v52  ;;  %2331 = vmatprep.mubr.bf16.mxu0 %v2509_v53 }
  0xbe   : > { %1331 = vmatmul.mubr.bf16.gmra.mrb[76].mxu1 %v2510_v54  ;;  %2332 = vmatmul.mubr.bf16.gmra.mrb[76].mxu0 %v2511_v55 }
  0xf9   : > { %v2127_v56 = vpop.f32.mrb[0].mxu1  ;;  %v2055_v57 = vpop.f32.mrb[0].mxu0 }
  0xfa   : > { %v2128_v58 = vpop.f32.mrb[1].mxu1  ;;  %v2056_v59 = vpop.f32.mrb[1].mxu0 }
  0xfb   : > { %v2756_v60 = vadd.f32 %v2128_v58, %v2127_v56  ;;  %v2130_v61 = vpop.f32.mrb[2].mxu1  ;;  %v2057_v62 = vadd.f32 %v2056_v59, %v2055_v57  ;;  %v2058_v63 = vpop.f32.mrb[2].mxu0 }
  0xfc   : > { %v2131_v0 = vpop.f32.mrb[3].mxu1  ;;  %v2059_v1 = vpop.f32.mrb[3].mxu0 }
  0xfd   : > { %v2758_v2 = vadd.f32 %v2131_v0, %v2130_v61  ;;  %v2060_v3 = vadd.f32 %v2059_v1, %v2058_v63  ;;  %v1052_v45 = vadd.f32 %v2057_v62, %v2775_v42 }
  0xff   : > { %v1055_v52 = vadd.f32 %v2060_v3, %v2775_v42 }
 0x101   : > { %v2133_v4 = vpop.f32.mrb[4].mxu1  ;;  %v2061_v5 = vpop.f32.mrb[4].mxu0 }
 0x102   : > { %v2134_v6 = vpop.f32.mrb[5].mxu1  ;;  %v2062_v7 = vpop.f32.mrb[5].mxu0 }
 0x103   : > { %v2760_v8 = vadd.f32 %v2134_v6, %v2133_v4  ;;  %v2136_v9 = vpop.f32.mrb[6].mxu1  ;;  %v2063_v10 = vadd.f32 %v2062_v7, %v2061_v5  ;;  %v2064_v11 = vpop.f32.mrb[6].mxu0 }
 0x104   : > { %v2137_v12 = vpop.f32.mrb[7].mxu1  ;;  %v2065_v13 = vpop.f32.mrb[7].mxu0 }
 0x105   : > { %v2762_v14 = vadd.f32 %v2137_v12, %v2136_v9  ;;  %v2066_v15 = vadd.f32 %v2065_v13, %v2064_v11  ;;  %v1060_v62 = vadd.f32 %v2063_v10, %v2775_v42 }
 0x107   : > { %v1063_v3 = vadd.f32 %v2066_v15, %v2775_v42 }
 0x109   : > { %v2139_v16 = vpop.f32.mrb[8].mxu1  ;;  %v2067_v17 = vpop.f32.mrb[8].mxu0 }
 0x10a   : > { %v2140_v18 = vpop.f32.mrb[9].mxu1  ;;  %v2068_v19 = vpop.f32.mrb[9].mxu0 }
 0x10b   : > { %v2764_v20 = vadd.f32 %v2140_v18, %v2139_v16  ;;  %v2142_v21 = vpop.f32.mrb[10].mxu1  ;;  %v2069_v22 = vadd.f32 %v2068_v19, %v2067_v17  ;;  %v2070_v23 = vpop.f32.mrb[10].mxu0 }
 0x10c   : > { %v2143_v24 = vpop.f32.mrb[11].mxu1  ;;  %v2071_v25 = vpop.f32.mrb[11].mxu0 }
 0x10d   : > { %v2766_v26 = vadd.f32 %v2143_v24, %v2142_v21  ;;  %v2072_v27 = vadd.f32 %v2071_v25, %v2070_v23  ;;  %v1068_v10 = vadd.f32 %v2069_v22, %v2775_v42 }
 0x10f   : > { %v1071_v15 = vadd.f32 %v2072_v27, %v2775_v42 }
 0x111   : > { %v2145_v28 = vpop.f32.mrb[12].mxu1  ;;  %v2073_v29 = vpop.f32.mrb[12].mxu0 }
 0x112   : > { %v2146_v30 = vpop.f32.mrb[13].mxu1  ;;  %v2074_v31 = vpop.f32.mrb[13].mxu0 }
 0x113   : > { %v2768_v32 = vadd.f32 %v2146_v30, %v2145_v28  ;;  %v2148_v33 = vpop.f32.mrb[14].mxu1  ;;  %v2075_v34 = vadd.f32 %v2074_v31, %v2073_v29  ;;  %v2076_v35 = vpop.f32.mrb[14].mxu0 }
 0x114   : > { %v2149_v36 = vpop.f32.mrb[15].mxu1  ;;  %v2077_v37 = vpop.f32.mrb[15].mxu0 }
 0x115   : > { %v2770_v38 = vadd.f32 %v2149_v36, %v2148_v33  ;;  %v2078_v39 = vadd.f32 %v2077_v37, %v2076_v35  ;;  %v1076_v22 = vadd.f32 %v2075_v34, %v2775_v42 }
 0x117   : > { %v1079_v27 = vadd.f32 %v2078_v39, %v2775_v42 }
 0x119   : > { %v2167_v40 = vpop.f32.mrb[16].mxu1  ;;  %v2079_v41 = vpop.f32.mrb[16].mxu0 }
 0x11a   : > { %v2168_v43 = vpop.f32.mrb[17].mxu1  ;;  %v2080_v44 = vpop.f32.mrb[17].mxu0 }
 0x11b   : > { %v2169_v46 = vadd.f32 %v2168_v43, %v2167_v40  ;;  %v2170_v47 = vpop.f32.mrb[18].mxu1  ;;  %v2081_v48 = vadd.f32 %v2080_v44, %v2079_v41  ;;  %v2082_v49 = vpop.f32.mrb[18].mxu0 }
 0x11c   : > { %v2171_v50 = vpop.f32.mrb[19].mxu1  ;;  %v2083_v51 = vpop.f32.mrb[19].mxu0 }
 0x11d   : > { %v2172_v53 = vadd.f32 %v2171_v50, %v2170_v47  ;;  %v2084_v54 = vadd.f32 %v2083_v51, %v2082_v49  ;;  %v2779_v55 = vadd.f32 %v2169_v46, %v1052_v45  ;;  %v1084_v34 = vadd.f32 %v2081_v48, %v2775_v42 }
 0x11f   : > { %v2781_v56 = vadd.f32 %v2172_v53, %v1055_v52  ;;  %v1087_v39 = vadd.f32 %v2084_v54, %v2775_v42 }
 0x121   : > { %v2173_v57 = vpop.f32.mrb[20].mxu1  ;;  %v2085_v58 = vpop.f32.mrb[20].mxu0 }
 0x122   : > { %v2174_v59 = vpop.f32.mrb[21].mxu1  ;;  %v2086_v61 = vpop.f32.mrb[21].mxu0 }
 0x123   : > { %v2175_v63 = vadd.f32 %v2174_v59, %v2173_v57  ;;  %v2176_v0 = vpop.f32.mrb[22].mxu1  ;;  %v2087_v1 = vadd.f32 %v2086_v61, %v2085_v58  ;;  %v2088_v4 = vpop.f32.mrb[22].mxu0 }
 0x124   : > { %v2177_v5 = vpop.f32.mrb[23].mxu1  ;;  %v2089_v6 = vpop.f32.mrb[23].mxu0 }
 0x125   : > { %v2178_v7 = vadd.f32 %v2177_v5, %v2176_v0  ;;  %v2090_v9 = vadd.f32 %v2089_v6, %v2088_v4  ;;  %v2785_v11 = vadd.f32 %v2175_v63, %v1060_v62  ;;  %v1092_v48 = vadd.f32 %v2087_v1, %v2775_v42 }
 0x127   : > { %v2787_v12 = vadd.f32 %v2178_v7, %v1063_v3 }
 0x129   : > { %v2179_v13 = vpop.f32.mrb[24].mxu1  ;;  %v2091_v16 = vpop.f32.mrb[24].mxu0 }
 0x12a   : > { %v2180_v17 = vpop.f32.mrb[25].mxu1  ;;  %v2092_v18 = vpop.f32.mrb[25].mxu0 }
 0x12b   : > { %v2181_v19 = vadd.f32 %v2180_v17, %v2179_v13  ;;  %v2182_v21 = vpop.f32.mrb[26].mxu1  ;;  %v2093_v23 = vadd.f32 %v2092_v18, %v2091_v16  ;;  %v2094_v24 = vpop.f32.mrb[26].mxu0 }
 0x12c   : > { %v2183_v25 = vpop.f32.mrb[27].mxu1  ;;  %v2095_v28 = vpop.f32.mrb[27].mxu0 }
 0x12d   : > { %v2184_v29 = vadd.f32 %v2183_v25, %v2182_v21  ;;  %v2096_v30 = vadd.f32 %v2095_v28, %v2094_v24  ;;  %v2791_v31 = vadd.f32 %v2181_v19, %v1068_v10 }
 0x12f   : > { %v2793_v33 = vadd.f32 %v2184_v29, %v1071_v15  ;;  %v1095_v15 = vadd.f32 %v2090_v9, %v2775_v42 }
 0x131   : > { %v2185_v35 = vpop.f32.mrb[28].mxu1  ;;  %v2097_v36 = vpop.f32.mrb[28].mxu0 }
 0x132   : > { %v2186_v37 = vpop.f32.mrb[29].mxu1  ;;  %v2098_v40 = vpop.f32.mrb[29].mxu0 }
 0x133   : > { %v2187_v41 = vadd.f32 %v2186_v37, %v2185_v35  ;;  %v2188_v43 = vpop.f32.mrb[30].mxu1  ;;  %v2099_v44 = vadd.f32 %v2098_v40, %v2097_v36  ;;  %v2100_v45 = vpop.f32.mrb[30].mxu0 }
 0x134   : > { %v2189_v46 = vpop.f32.mrb[31].mxu1  ;;  %v2101_v47 = vpop.f32.mrb[31].mxu0 }
 0x135   : > { %v2190_v49 = vadd.f32 %v2189_v46, %v2188_v43  ;;  %v2102_v50 = vadd.f32 %v2101_v47, %v2100_v45  ;;  %v2797_v51 = vadd.f32 %v2187_v41, %v1076_v22  ;;  %v1100_v43 = vadd.f32 %v2093_v23, %v2775_v42 }
 0x137   : > { %v2799_v52 = vadd.f32 %v2190_v49, %v1079_v27 }
 0x139   : > { %v2191_v53 = vpop.f32.mrb[32].mxu1  ;;  %v2103_v57 = vpop.f32.mrb[32].mxu0 }
 0x13a   : > { %v2192_v58 = vpop.f32.mrb[33].mxu1  ;;  %v2104_v59 = vpop.f32.mrb[33].mxu0 }
 0x13b   : > { %v2193_v61 = vadd.f32 %v2192_v58, %v2191_v53  ;;  %v2194_v62 = vpop.f32.mrb[34].mxu1  ;;  %v2105_v63 = vadd.f32 %v2104_v59, %v2103_v57  ;;  %v2106_v0 = vpop.f32.mrb[34].mxu0  ;;  %v1103_v53 = vadd.f32 %v2096_v30, %v2775_v42 }
 0x13c   : > { %v2195_v4 = vpop.f32.mrb[35].mxu1  ;;  %v2107_v5 = vpop.f32.mrb[35].mxu0 }
 0x13d   : > { %v2196_v6 = vadd.f32 %v2195_v4, %v2194_v62  ;;  %v2803_v3 = vadd.f32 %v2107_v5, %v2106_v0  ;;  %v2805_v7 = vadd.f32 %v2193_v61, %v1084_v34  ;;  %v1108_v4 = vadd.f32 %v2099_v44, %v2775_v42 }
 0x13f   : > { %v2807_v13 = vadd.f32 %v2196_v6, %v1087_v39 }
 0x141   : > { %v2197_v16 = vpop.f32.mrb[36].mxu1  ;;  %v2109_v17 = vpop.f32.mrb[36].mxu0 }
 0x142   : > { %v2198_v18 = vpop.f32.mrb[37].mxu1  ;;  %v2110_v10 = vpop.f32.mrb[37].mxu0 }
 0x143   : > { %v2199_v19 = vadd.f32 %v2198_v18, %v2197_v16  ;;  %v2200_v21 = vpop.f32.mrb[38].mxu1  ;;  %v2810_v24 = vadd.f32 %v2110_v10, %v2109_v17  ;;  %v2112_v25 = vpop.f32.mrb[38].mxu0  ;;  %v1111_v18 = vadd.f32 %v2102_v50, %v2775_v42 }
 0x144   : > { %v2201_v28 = vpop.f32.mrb[39].mxu1  ;;  %v2113_v54 = vpop.f32.mrb[39].mxu0 }
 0x145   : > { %v2202_v29 = vadd.f32 %v2201_v28, %v2200_v21  ;;  %v2813_v35 = vadd.f32 %v2113_v54, %v2112_v25  ;;  %v2815_v36 = vadd.f32 %v2199_v19, %v1092_v48 }
 0x147   : > { %v2817_v37 = vadd.f32 %v2202_v29, %v1095_v15  ;;  %v1116_v29 = vadd.f32 %v2105_v63, %v2775_v42 }
 0x149   : > { %v2203_v40 = vpop.f32.mrb[40].mxu1  ;;  %v2115_v22 = vpop.f32.mrb[40].mxu0 }
 0x14a   : > { %v2204_v41 = vpop.f32.mrb[41].mxu1  ;;  %v2116_v1 = vpop.f32.mrb[41].mxu0 }
 0x14b   : > { %v2205_v45 = vadd.f32 %v2204_v41, %v2203_v40  ;;  %v2206_v46 = vpop.f32.mrb[42].mxu1  ;;  %v2820_v47 = vadd.f32 %v2116_v1, %v2115_v22  ;;  %v2118_v27 = vpop.f32.mrb[42].mxu0 }
 0x14c   : > { %v2207_v49 = vpop.f32.mrb[43].mxu1  ;;  %v2119_v9 = vpop.f32.mrb[43].mxu0 }
 0x14d   : > { %v2208_v57 = vadd.f32 %v2207_v49, %v2206_v46  ;;  %v2823_v58 = vadd.f32 %v2119_v9, %v2118_v27  ;;  %v2825_v59 = vadd.f32 %v2205_v45, %v1100_v43  ;;  %v1119_v46 = vadd.f32 %v2803_v3, %v2775_v42 }
 0x14f   : > { %v2827_v34 = vadd.f32 %v2208_v57, %v1103_v53 }
 0x151   : > { %v2209_v61 = vpop.f32.mrb[44].mxu1  ;;  %v2121_v62 = vpop.f32.mrb[44].mxu0 }
 0x152   : > { %v2210_v0 = vpop.f32.mrb[45].mxu1  ;;  %v2122_v23 = vpop.f32.mrb[45].mxu0 }
 0x153   : > { %v2211_v5 = vadd.f32 %v2210_v0, %v2209_v61  ;;  %v2212_v39 = vpop.f32.mrb[46].mxu1  ;;  %v2830_v6 = vadd.f32 %v2122_v23, %v2121_v62  ;;  %v2124_v16 = vpop.f32.mrb[46].mxu0 }
 0x154   : > { %v2213_v17 = vpop.f32.mrb[47].mxu1  ;;  %v2125_v30 = vpop.f32.mrb[47].mxu0 }
 0x155   : > { %v2214_v10 = vadd.f32 %v2213_v17, %v2212_v39  ;;  %v2833_v48 = vadd.f32 %v2125_v30, %v2124_v16  ;;  %v2835_v19 = vadd.f32 %v2211_v5, %v1108_v4  ;;  %v1124_v4 = vadd.f32 %v2810_v24, %v2775_v42 }
 0x157   : > { %v2837_v21 = vadd.f32 %v2214_v10, %v1111_v18 }
 0x159   : > { %v2215_v25 = vpop.f32.mrb[48].mxu1  ;;  %v2305_v28 = vpop.f32.mrb[48].mxu0 }
 0x15a   : > { %v1382_v44 = vadd.f32 %v2305_v28, %v2785_v11  ;;  %v2216_v54 = vpop.f32.mrb[49].mxu1  ;;  %v1373_v15 = vpop.f32.mrb[49].mxu0 }
 0x15b   : > { %v2217_v40 = vadd.f32 %v2216_v54, %v2215_v25  ;;  %v1374_v22 = vadd.f32 %v1373_v15, %v2779_v55  ;;  %v2218_v41 = vpop.f32.mrb[50].mxu1  ;;  %v2306_v50 = vpop.f32.mrb[50].mxu0  ;;  %v1127_v25 = vadd.f32 %v2813_v35, %v2775_v42 }
 0x15c   : > { %v1385_v1 = vadd.f32 %v2306_v50, %v2787_v12  ;;  %v2219_v43 = vpop.f32.mrb[51].mxu1  ;;  %v1376_v45 = vpop.f32.mrb[51].mxu0  ;;  %v1502_v9 = vmax.f32 %v1382_v44, 0.0 }
 0x15d   : > { %v2220_v27 = vadd.f32 %v2219_v43, %v2218_v41  ;;  %v1377_v11 = vadd.f32 %v1376_v45, %v2781_v56  ;;  %v2847_v49 = vadd.f32 %v2217_v40, %v1116_v29  ;;  %v1500_v53 = vmax.f32 %v1374_v22, 0.0 }
 0x15e   : > { %v1503_v63 = vmax.f32 %v1385_v1, 0.0 }
 0x15f   : > { %v1501_v55 = vmax.f32 %v1377_v11, 0.0  ;;  %v2854_v12 = vadd.f32 %v2220_v27, %v1119_v46 }
 0x160   : > { %v1952_v57 = vpack.c.bf16 %v1503_v63, %v1502_v9 }
 0x161   : > { %v1947_v3 = vpack.c.bf16 %v1501_v55, %v1500_v53  ;;  %v2221_v61 = vpop.f32.mrb[52].mxu1  ;;  %v2309_v62 = vpop.f32.mrb[52].mxu0  ;;  %v1135_v53 = vadd.f32 %v2823_v58, %v2775_v42 }
 0x162   : > { %2024 = vst [vmem:[%s2852_s30 + $0x8] sm:$0xff] %v1952_v57   ;;  %v1398_v56 = vadd.f32 %v2309_v62, %v2797_v51  ;;  %v2222_v0 = vpop.f32.mrb[53].mxu1  ;;  %v1389_v23 = vpop.f32.mrb[53].mxu0 }
 0x163   : > { %1948 = vst [vmem:[%s2852_s30] sm:$0xff] %v1947_v3   ;;  %v2223_v5 = vadd.f32 %v2222_v0, %v2221_v61  ;;  %v1390_v39 = vadd.f32 %v1389_v23, %v2791_v31  ;;  %v2224_v16 = vpop.f32.mrb[54].mxu1  ;;  %v2310_v17 = vpop.f32.mrb[54].mxu0 }
 0x164   : > { %v1401_v30 = vadd.f32 %v2310_v17, %v2799_v52  ;;  %v2225_v18 = vpop.f32.mrb[55].mxu1  ;;  %v1392_v10 = vpop.f32.mrb[55].mxu0  ;;  %v1506_v24 = vmax.f32 %v1398_v56, 0.0 }
 0x165   : > { %v2226_v51 = vadd.f32 %v2225_v18, %v2224_v16  ;;  %v1393_v28 = vadd.f32 %v1392_v10, %v2793_v33  ;;  %v2866_v44 = vadd.f32 %v2223_v5, %v1124_v4  ;;  %v1504_v15 = vmax.f32 %v1390_v39, 0.0 }
 0x166   : > { %v1507_v54 = vmax.f32 %v1401_v30, 0.0  ;;  %v1132_v33 = vadd.f32 %v2820_v47, %v2775_v42 }
 0x167   : > { %v1505_v31 = vmax.f32 %v1393_v28, 0.0  ;;  %v2868_v29 = vadd.f32 %v2226_v51, %v1127_v25  ;;  %v1143_v51 = vadd.f32 %v2833_v48, %v2775_v42  ;;  %v1148_v48 = vadd.f32 %v2756_v60, %v2775_v42 }
 0x168   : > { %v1962_v40 = vpack.c.bf16 %v1507_v54, %v1506_v24 }
 0x169   : > { %v1957_v52 = vpack.c.bf16 %v1505_v31, %v1504_v15  ;;  %v2227_v22 = vpop.f32.mrb[56].mxu1  ;;  %v2313_v41 = vpop.f32.mrb[56].mxu0 }
 0x16a   : > { %2026 = vst [vmem:[%s2852_s30 + $0x18] sm:$0xff] %v1962_v40   ;;  %v1414_v50 = vadd.f32 %v2313_v41, %v2815_v36  ;;  %v2228_v35 = vpop.f32.mrb[57].mxu1  ;;  %v1405_v1 = vpop.f32.mrb[57].mxu0 }
 0x16b   : > { %2025 = vst [vmem:[%s2852_s30 + $0x10] sm:$0xff] %v1957_v52   ;;  %v2229_v43 = vadd.f32 %v2228_v35, %v2227_v22  ;;  %v1406_v45 = vadd.f32 %v1405_v1, %v2805_v7  ;;  %v2230_v46 = vpop.f32.mrb[58].mxu1  ;;  %v2314_v27 = vpop.f32.mrb[58].mxu0 }
 0x16c   : > { %v1417_v11 = vadd.f32 %v2314_v27, %v2817_v37  ;;  %v2231_v9 = vpop.f32.mrb[59].mxu1  ;;  %v1408_v63 = vpop.f32.mrb[59].mxu0  ;;  %v1510_v47 = vmax.f32 %v1414_v50, 0.0 }
 0x16d   : > { %v2232_v36 = vadd.f32 %v2231_v9, %v2230_v46  ;;  %v1409_v55 = vadd.f32 %v1408_v63, %v2807_v13  ;;  %v2880_v57 = vadd.f32 %v2229_v43, %v1132_v33  ;;  %v1508_v61 = vmax.f32 %v1406_v45, 0.0 }
 0x16e   : > { %v1511_v3 = vmax.f32 %v1417_v11, 0.0  ;;  %v1140_v13 = vadd.f32 %v2830_v6, %v2775_v42  ;;  %v1151_v11 = vadd.f32 %v2758_v2, %v2775_v42  ;;  %v1156_v2 = vadd.f32 %v2760_v8, %v2775_v42 }
 0x16f   : > { %v1509_v7 = vmax.f32 %v1409_v55, 0.0  ;;  %v2882_v62 = vadd.f32 %v2232_v36, %v1135_v53 }
 0x170   : > { %v1972_v56 = vpack.c.bf16 %v1511_v3, %v1510_v47 }
 0x171   : > { %v1967_v37 = vpack.c.bf16 %v1509_v7, %v1508_v61  ;;  %v2233_v0 = vpop.f32.mrb[60].mxu1  ;;  %v2317_v23 = vpop.f32.mrb[60].mxu0 }
 0x172   : > { %2028 = vst [vmem:[%s2852_s30 + $0x28] sm:$0xff] %v1972_v56   ;;  %v1430_v4 = vadd.f32 %v2317_v23, %v2835_v19  ;;  %v2234_v58 = vpop.f32.mrb[61].mxu1  ;;  %v1421_v5 = vpop.f32.mrb[61].mxu0 }
 0x173   : > { %2027 = vst [vmem:[%s2852_s30 + $0x20] sm:$0xff] %v1967_v37   ;;  %v2235_v39 = vadd.f32 %v2234_v58, %v2233_v0  ;;  %v1422_v16 = vadd.f32 %v1421_v5, %v2825_v59  ;;  %v2236_v17 = vpop.f32.mrb[62].mxu1  ;;  %v2318_v30 = vpop.f32.mrb[62].mxu0 }
 0x174   : > { %v1433_v18 = vadd.f32 %v2318_v30, %v2837_v21  ;;  %v2237_v10 = vpop.f32.mrb[63].mxu1  ;;  %v1424_v25 = vpop.f32.mrb[63].mxu0  ;;  %v1514_v6 = vmax.f32 %v1430_v4, 0.0 }
 0x175   : > { %v2238_v19 = vadd.f32 %v2237_v10, %v2236_v17  ;;  %v1425_v28 = vadd.f32 %v1424_v25, %v2827_v34  ;;  %v1301_v24 = vadd.f32 %v2235_v39, %v1140_v13  ;;  %v1512_v15 = vmax.f32 %v1422_v16, 0.0 }
 0x176   : > { %v1515_v54 = vmax.f32 %v1433_v18, 0.0  ;;  %v1159_v39 = vadd.f32 %v2762_v14, %v2775_v42  ;;  %v1164_v14 = vadd.f32 %v2764_v20, %v2775_v42 }
 0x177   : > { %v1513_v31 = vmax.f32 %v1425_v28, 0.0  ;;  %v1304_v59 = vadd.f32 %v2238_v19, %v1143_v51 }
 0x178   : > { %v1982_v40 = vpack.c.bf16 %v1515_v54, %v1514_v6 }
 0x179   : > { %v1977_v52 = vpack.c.bf16 %v1513_v31, %v1512_v15  ;;  %v2239_v22 = vpop.f32.mrb[64].mxu1  ;;  %v2321_v21 = vpop.f32.mrb[64].mxu0 }
 0x17a   : > { %2030 = vst [vmem:[%s2852_s30 + $0x38] sm:$0xff] %v1982_v40   ;;  %v1446_v41 = vadd.f32 %v2321_v21, %v2866_v44  ;;  %v2240_v50 = vpop.f32.mrb[65].mxu1  ;;  %v1437_v35 = vpop.f32.mrb[65].mxu0 }
 0x17b   : > { %2029 = vst [vmem:[%s2852_s30 + $0x30] sm:$0xff] %v1977_v52   ;;  %v2241_v34 = vadd.f32 %v2240_v50, %v2239_v22  ;;  %v1438_v1 = vadd.f32 %v1437_v35, %v2847_v49  ;;  %v2242_v33 = vpop.f32.mrb[66].mxu1  ;;  %v2322_v43 = vpop.f32.mrb[66].mxu0 }
 0x17c   : > { %v1449_v45 = vadd.f32 %v2322_v43, %v2868_v29  ;;  %v2243_v46 = vpop.f32.mrb[67].mxu1  ;;  %v1440_v27 = vpop.f32.mrb[67].mxu0  ;;  %v1518_v60 = vmax.f32 %v1446_v41, 0.0  ;;  %v1167_v41 = vadd.f32 %v2766_v26, %v2775_v42 }
 0x17d   : > { %v2244_v44 = vadd.f32 %v2243_v46, %v2242_v33  ;;  %v1441_v9 = vadd.f32 %v1440_v27, %v2854_v12  ;;  %v1309_v63 = vadd.f32 %v2241_v34, %v1148_v48  ;;  %v1516_v36 = vmax.f32 %v1438_v1, 0.0 }
 0x17e   : > { %v1519_v53 = vmax.f32 %v1449_v45, 0.0 }
 0x17f   : > { %v1517_v55 = vmax.f32 %v1441_v9, 0.0  ;;  %v1312_v49 = vadd.f32 %v2244_v44, %v1151_v11 }
 0x180   : > { %v1992_v47 = vpack.c.bf16 %v1519_v53, %v1518_v60 }
 0x181   : > { %v1987_v3 = vpack.c.bf16 %v1517_v55, %v1516_v36  ;;  %v2245_v61 = vpop.f32.mrb[68].mxu1  ;;  %v2325_v29 = vpop.f32.mrb[68].mxu0 }
 0x182   : > { %2032 = vst [vmem:[%s2852_s30 + $0x48] sm:$0xff] %v1992_v47   ;;  %v1462_v7 = vadd.f32 %v2325_v29, %v1301_v24  ;;  %v2246_v56 = vpop.f32.mrb[69].mxu1  ;;  %v1453_v37 = vpop.f32.mrb[69].mxu0  ;;  %v1175_v47 = vadd.f32 %v2770_v38, %v2775_v42 }
 0x183   : > { %2031 = vst [vmem:[%s2852_s30 + $0x40] sm:$0xff] %v1987_v3   ;;  %v2247_v12 = vadd.f32 %v2246_v56, %v2245_v61  ;;  %v1454_v0 = vadd.f32 %v1453_v37, %v2880_v57  ;;  %v2248_v23 = vpop.f32.mrb[70].mxu1  ;;  %v2326_v4 = vpop.f32.mrb[70].mxu0 }
 0x184   : > { %v1465_v58 = vadd.f32 %v2326_v4, %v1304_v59  ;;  %v2249_v5 = vpop.f32.mrb[71].mxu1  ;;  %v1456_v13 = vpop.f32.mrb[71].mxu0  ;;  %v1522_v18 = vmax.f32 %v1462_v7, 0.0 }
 0x185   : > { %v2250_v16 = vadd.f32 %v2249_v5, %v2248_v23  ;;  %v1457_v17 = vadd.f32 %v1456_v13, %v2882_v62  ;;  %v1317_v30 = vadd.f32 %v2247_v12, %v1156_v2  ;;  %v1520_v10 = vmax.f32 %v1454_v0, 0.0 }
 0x186   : > { %v1523_v8 = vmax.f32 %v1465_v58, 0.0 }
 0x187   : > { %v1521_v25 = vmax.f32 %v1457_v17, 0.0  ;;  %v1320_v51 = vadd.f32 %v2250_v16, %v1159_v39 }
 0x188   : > { %v2002_v57 = vpack.c.bf16 %v1523_v8, %v1522_v18 }
 0x189   : > { %v1997_v19 = vpack.c.bf16 %v1521_v25, %v1520_v10  ;;  %v2251_v28 = vpop.f32.mrb[72].mxu1  ;;  %v2329_v24 = vpop.f32.mrb[72].mxu0 }
 0x18a   : > { %2034 = vst [vmem:[%s2852_s30 + $0x58] sm:$0xff] %v2002_v57   ;;  %v1478_v6 = vadd.f32 %v2329_v24, %v1317_v30  ;;  %v2252_v54 = vpop.f32.mrb[73].mxu1  ;;  %v1469_v15 = vpop.f32.mrb[73].mxu0 }
 0x18b   : > { %2033 = vst [vmem:[%s2852_s30 + $0x50] sm:$0xff] %v1997_v19   ;;  %v2253_v62 = vadd.f32 %v2252_v54, %v2251_v28  ;;  %v1470_v31 = vadd.f32 %v1469_v15, %v1309_v63  ;;  %v2254_v59 = vpop.f32.mrb[74].mxu1  ;;  %v2330_v40 = vpop.f32.mrb[74].mxu0  ;;  %v1172_v63 = vadd.f32 %v2768_v32, %v2775_v42 }
 0x18c   : > { %v1481_v52 = vadd.f32 %v2330_v40, %v1320_v51  ;;  %v2255_v22 = vpop.f32.mrb[75].mxu1  ;;  %v1472_v21 = vpop.f32.mrb[75].mxu0  ;;  %v1526_v34 = vmax.f32 %v1478_v6, 0.0 }
 0x18d   : > { %v2256_v50 = vadd.f32 %v2255_v22, %v2254_v59  ;;  %v1473_v35 = vadd.f32 %v1472_v21, %v1312_v49  ;;  %v1325_v48 = vadd.f32 %v2253_v62, %v1164_v14  ;;  %v1524_v33 = vmax.f32 %v1470_v31, 0.0 }
 0x18e   : > { %v1527_v1 = vmax.f32 %v1481_v52, 0.0 }
 0x18f   : > { %v1525_v20 = vmax.f32 %v1473_v35, 0.0  ;;  %v1328_v43 = vadd.f32 %v2256_v50, %v1167_v41 }
 0x190   : > { %v2012_v45 = vpack.c.bf16 %v1527_v1, %v1526_v34 }
 0x191   : > { %v2007_v46 = vpack.c.bf16 %v1525_v20, %v1524_v33  ;;  %v2257_v27 = vpop.f32.mrb[76].mxu1  ;;  %v2333_v11 = vpop.f32.mrb[76].mxu0 }
 0x192   : > { %2036 = vst [vmem:[%s2852_s30 + $0x68] sm:$0xff] %v2012_v45   ;;  %v2258_v44 = vpop.f32.mrb[77].mxu1  ;;  %v1485_v9 = vpop.f32.mrb[77].mxu0 }
 0x193   : > { %2035 = vst [vmem:[%s2852_s30 + $0x60] sm:$0xff] %v2007_v46   ;;  %v2259_v26 = vadd.f32 %v2258_v44, %v2257_v27  ;;  %v1486_v60 = vadd.f32 %v1485_v9, %v1325_v48  ;;  %v2260_v53 = vpop.f32.mrb[78].mxu1  ;;  %v2334_v36 = vpop.f32.mrb[78].mxu0 }
 0x194   : > { %v2261_v55 = vpop.f32.mrb[79].mxu1  ;;  %v1488_v49 = vpop.f32.mrb[79].mxu0 }
 0x195   : > { %v1333_v3 = vadd.f32 %v2259_v26, %v1172_v63  ;;  %v2262_v61 = vadd.f32 %v2261_v55, %v2260_v53  ;;  %v1489_v29 = vadd.f32 %v1488_v49, %v1328_v43  ;;  %v1528_v56 = vmax.f32 %v1486_v60, 0.0 }
 0x197   : > { %v1494_v7 = vadd.f32 %v2333_v11, %v1333_v3  ;;  %v1336_v37 = vadd.f32 %v2262_v61, %v1175_v47  ;;  %v1529_v2 = vmax.f32 %v1489_v29, 0.0 }
 0x199   : > { %v1497_v32 = vadd.f32 %v2334_v36, %v1336_v37  ;;  %v2017_v12 = vpack.c.bf16 %v1529_v2, %v1528_v56  ;;  %v1530_v0 = vmax.f32 %v1494_v7, 0.0 }
 0x19b   : > { %v1531_v23 = vmax.f32 %v1497_v32, 0.0  ;;  %2037 = vst [vmem:[%s2852_s30 + $0x70] sm:$0xff] %v2017_v12  }
 0x19d   : > { %v2022_v4 = vpack.c.bf16 %v1531_v23, %v1530_v0 }
 0x19f   : > { %2038 = vst [vmem:[%s2852_s30 + $0x78] sm:$0xff] %v2022_v4  }
 0x1a0 PF: > { %s13_s12 = sadd.s32 1, %s2518_s12  }
 0x1a1   : > { %p10_p4 = scmp.ge.s32.totalorder %s13_s12, 4  }
 0x1a3   :  { %12 = sbr.rel (!%p10_p4) target bundleno = 1 (0x1), region = 62 }

// kernel: cnn_forward.5
= control target key start
LH: loop header
LB: loop body
LE: loop exit
PB: predicated region body
PF: predicated region fallthrough
CT: control target
= control target key end

     0   :  { %s7435_s4 = inlined_call_operand.vmem [shape: bf16[1024,1024], index: 4, kind: input, shape index: {}]   ;;  %s7436_s0 = inlined_call_operand.vmem [shape: bf16[16,1024], index: 0, kind: input, shape index: {}]   ;;  %s7437_s1 = inlined_call_operand.vmem [shape: bf16[16,1024], index: 1, kind: input, shape index: {}]   ;;  %s7438_s2 = inlined_call_operand.vmem [shape: bf16[16,1024], index: 2, kind: input, shape index: {}]   ;;  %s7439_s3 = inlined_call_operand.vmem [shape: bf16[16,1024], index: 3, kind: input, shape index: {}]   ;;  %s7440_s6 = inlined_call_operand.vmem [shape: bf16[1024,128], index: 6, kind: input, shape index: {}]   ;;  %s7441_s5 = inlined_call_operand.vmem [shape: f32[1,1024], index: 5, kind: input, shape index: {}]   ;;  %s7442_s7 = inlined_call_operand.vmem [shape: f32[1,128], index: 7, kind: input, shape index: {}]   ;;  %s7443_s8 = inlined_call_operand.vmem [shape: f32[16,128], index: 8, kind: output, shape index: {}]  }
   0x1   :  { %v86_v0 = vld [vmem:[%s7435_s4] sm:$0xff]  ;;  %v87_v2 = vld [vmem:[%s7435_s4 + $0x8] sm:$0xff] }
   0x2   :  { %v90_v1 = vld [vmem:[%s7435_s4 + $0x20] sm:$0xff]  ;;  %v91_v4 = vld [vmem:[%s7435_s4 + $0x28] sm:$0xff] }
   0x3   :  { %v4650_v3 = vcombine.high %v86_v0, %v90_v1  ;;  %v4649_v5 = vcombine.low %v86_v0, %v90_v1  ;;  %v94_v6 = vld [vmem:[%s7435_s4 + $0x40] sm:$0xff]  ;;  %v4652_v8 = vcombine.high %v87_v2, %v91_v4  ;;  %v4651_v9 = vcombine.low %v87_v2, %v91_v4  ;;  %v95_v11 = vld [vmem:[%s7435_s4 + $0x48] sm:$0xff] }
   0x4   :  { %v98_v7 = vld [vmem:[%s7435_s4 + $0x60] sm:$0xff]  ;;  %v99_v12 = vld [vmem:[%s7435_s4 + $0x68] sm:$0xff] }
   0x5   :  { %v4658_v10 = vcombine.high %v94_v6, %v98_v7  ;;  %v102_v13 = vld [vmem:[%s7435_s4 + $0x80] sm:$0xff]  ;;  %3240 = vmatprep.subr.bf16.mxu0 %v4650_v3  ;;  %v4660_v14 = vcombine.high %v95_v11, %v99_v12  ;;  %v103_v16 = vld [vmem:[%s7435_s4 + $0x88] sm:$0xff]  ;;  %3412 = vmatprep.subr.bf16.mxu1 %v4652_v8  ;;  %v4657_v18 = vcombine.low %v94_v6, %v98_v7 }
   0x6   :  { %v106_v15 = vld [vmem:[%s7435_s4 + $0xa0] sm:$0xff]  ;;  %v107_v17 = vld [vmem:[%s7435_s4 + $0xa8] sm:$0xff]  ;;  %3241 = vmatpush1.bf16.msra.mxu0 %v4649_v5  ;;  %3413 = vmatpush1.bf16.msra.mxu1 %v4651_v9  ;;  %v4659_v19 = vcombine.low %v95_v11, %v99_v12 }
   0x7   :  { %3242 = vmatprep.subr.bf16.mxu0 %v4658_v10  ;;  %v4666_v20 = vcombine.high %v102_v13, %v106_v15  ;;  %3414 = vmatprep.subr.bf16.mxu1 %v4660_v14  ;;  %v4668_v21 = vcombine.high %v103_v16, %v107_v17  ;;  %v110_v22 = vld [vmem:[%s7435_s4 + $0xc0] sm:$0xff]  ;;  %v111_v24 = vld [vmem:[%s7435_s4 + $0xc8] sm:$0xff]  ;;  %v4665_v26 = vcombine.low %v102_v13, %v106_v15 }
   0x8   :  { %v114_v23 = vld [vmem:[%s7435_s4 + $0xe0] sm:$0xff]  ;;  %v115_v25 = vld [vmem:[%s7435_s4 + $0xe8] sm:$0xff]  ;;  %v4667_v27 = vcombine.low %v103_v16, %v107_v17 }
   0x9   :  { %v4674_v28 = vcombine.high %v110_v22, %v114_v23  ;;  %v4676_v29 = vcombine.high %v111_v24, %v115_v25  ;;  %v118_v30 = vld [vmem:[%s7435_s4 + $0x100] sm:$0xff]  ;;  %v119_v32 = vld [vmem:[%s7435_s4 + $0x108] sm:$0xff]  ;;  %v4673_v34 = vcombine.low %v110_v22, %v114_v23  ;;  %v4675_v35 = vcombine.low %v111_v24, %v115_v25 }
   0xa   :  { %3243 = vmatpush1.bf16.msra.mxu0 %v4657_v18  ;;  %3415 = vmatpush1.bf16.msra.mxu1 %v4659_v19  ;;  %v122_v31 = vld [vmem:[%s7435_s4 + $0x120] sm:$0xff]  ;;  %v123_v33 = vld [vmem:[%s7435_s4 + $0x128] sm:$0xff] }
   0xb   :  { %3244 = vmatprep.subr.bf16.mxu0 %v4666_v20  ;;  %3416 = vmatprep.subr.bf16.mxu1 %v4668_v21  ;;  %v4682_v36 = vcombine.high %v118_v30, %v122_v31  ;;  %v4684_v37 = vcombine.high %v119_v32, %v123_v33  ;;  %v126_v38 = vld [vmem:[%s7435_s4 + $0x140] sm:$0xff]  ;;  %v127_v40 = vld [vmem:[%s7435_s4 + $0x148] sm:$0xff]  ;;  %v4681_v42 = vcombine.low %v118_v30, %v122_v31 }
   0xc   :  { %v130_v39 = vld [vmem:[%s7435_s4 + $0x160] sm:$0xff]  ;;  %v131_v41 = vld [vmem:[%s7435_s4 + $0x168] sm:$0xff]  ;;  %v4683_v43 = vcombine.low %v119_v32, %v123_v33 }
   0xd   :  { %v4690_v44 = vcombine.high %v126_v38, %v130_v39  ;;  %v4692_v45 = vcombine.high %v127_v40, %v131_v41  ;;  %v134_v46 = vld [vmem:[%s7435_s4 + $0x180] sm:$0xff]  ;;  %v135_v48 = vld [vmem:[%s7435_s4 + $0x188] sm:$0xff]  ;;  %v4689_v50 = vcombine.low %v126_v38, %v130_v39  ;;  %v4691_v53 = vcombine.low %v127_v40, %v131_v41 }
   0xe   :  { %3245 = vmatpush1.bf16.msra.mxu0 %v4665_v26  ;;  %3417 = vmatpush1.bf16.msra.mxu1 %v4667_v27  ;;  %v138_v47 = vld [vmem:[%s7435_s4 + $0x1a0] sm:$0xff]  ;;  %v139_v49 = vld [vmem:[%s7435_s4 + $0x1a8] sm:$0xff] }
   0xf   :  { %3246 = vmatprep.subr.bf16.mxu0 %v4674_v28  ;;  %3418 = vmatprep.subr.bf16.mxu1 %v4676_v29  ;;  %v142_v51 = vld [vmem:[%s7435_s4 + $0x1c0] sm:$0xff]  ;;  %v4698_v54 = vcombine.high %v134_v46, %v138_v47  ;;  %v143_v55 = vld [vmem:[%s7435_s4 + $0x1c8] sm:$0xff]  ;;  %v4700_v59 = vcombine.high %v135_v48, %v139_v49  ;;  %v4697_v4 = vcombine.low %v134_v46, %v138_v47 }
  0x10   :  { %v146_v52 = vld [vmem:[%s7435_s4 + $0x1e0] sm:$0xff]  ;;  %v147_v56 = vld [vmem:[%s7435_s4 + $0x1e8] sm:$0xff]  ;;  %v4699_v7 = vcombine.low %v135_v48, %v139_v49 }
  0x11   :  { %v30_v57 = vld [vmem:[%s7436_s0] sm:$0xff]  ;;  %v4706_v8 = vcombine.high %v142_v51, %v146_v52  ;;  %v4708_v9 = vcombine.high %v143_v55, %v147_v56  ;;  %v151_v14 = vld [vmem:[%s7435_s4 + $0x208] sm:$0xff]  ;;  %v4705_v16 = vcombine.low %v142_v51, %v146_v52  ;;  %v4707_v18 = vcombine.low %v143_v55, %v147_v56 }
  0x12   :  { %3247 = vmatpush1.bf16.msra.mxu0 %v4673_v34  ;;  %3419 = vmatpush1.bf16.msra.mxu1 %v4675_v35  ;;  %v34_v58 = vld [vmem:[%s7436_s0 + $0x20] sm:$0xff]  ;;  %v155_v15 = vld [vmem:[%s7435_s4 + $0x228] sm:$0xff] }
  0x13   :  { %3248 = vmatprep.subr.bf16.mxu0 %v4682_v36  ;;  %3420 = vmatprep.subr.bf16.mxu1 %v4684_v37  ;;  %v38_v60 = vld [vmem:[%s7437_s1] sm:$0xff]  ;;  %v4716_v20 = vcombine.high %v151_v14, %v155_v15  ;;  %v159_v23 = vld [vmem:[%s7435_s4 + $0x248] sm:$0xff]  ;;  %v4715_v26 = vcombine.low %v151_v14, %v155_v15 }
  0x14   :  { %v42_v61 = vld [vmem:[%s7437_s1 + $0x20] sm:$0xff]  ;;  %v46_v63 = vmax.bf16 %v38_v60, %v30_v57  ;;  %v163_v24 = vld [vmem:[%s7435_s4 + $0x268] sm:$0xff] }
  0x15   :  { %v54_v62 = vld [vmem:[%s7438_s2] sm:$0xff]  ;;  %v50_v0 = vmax.bf16 %v42_v61, %v34_v58  ;;  %v4724_v28 = vcombine.high %v159_v23, %v163_v24  ;;  %v167_v31 = vld [vmem:[%s7435_s4 + $0x288] sm:$0xff]  ;;  %v4723_v34 = vcombine.low %v159_v23, %v163_v24 }
  0x16   :  { %3249 = vmatpush1.bf16.msra.mxu0 %v4681_v42  ;;  %3421 = vmatpush1.bf16.msra.mxu1 %v4683_v43  ;;  %v58_v1 = vld [vmem:[%s7438_s2 + $0x20] sm:$0xff]  ;;  %v171_v32 = vld [vmem:[%s7435_s4 + $0x2a8] sm:$0xff] }
  0x17   :  { %3250 = vmatprep.subr.bf16.mxu0 %v4690_v44  ;;  %3422 = vmatprep.subr.bf16.mxu1 %v4692_v45  ;;  %v62_v2 = vld [vmem:[%s7439_s3] sm:$0xff]  ;;  %v4732_v36 = vcombine.high %v167_v31, %v171_v32  ;;  %v175_v39 = vld [vmem:[%s7435_s4 + $0x2c8] sm:$0xff]  ;;  %v4731_v42 = vcombine.low %v167_v31, %v171_v32 }
  0x18   :  { %v66_v3 = vld [vmem:[%s7439_s3 + $0x20] sm:$0xff]  ;;  %v70_v5 = vmax.bf16 %v62_v2, %v54_v62  ;;  %v179_v40 = vld [vmem:[%s7435_s4 + $0x2e8] sm:$0xff] }
  0x19   :  { %v74_v6 = vmax.bf16 %v66_v3, %v58_v1  ;;  %v150_v10 = vld [vmem:[%s7435_s4 + $0x200] sm:$0xff]  ;;  %v4740_v44 = vcombine.high %v175_v39, %v179_v40  ;;  %v183_v47 = vld [vmem:[%s7435_s4 + $0x308] sm:$0xff] }
  0x1a   :  { %3251 = vmatpush1.bf16.msra.mxu0 %v4689_v50  ;;  %3423 = vmatpush1.bf16.msra.mxu1 %v4691_v53  ;;  %v154_v11 = vld [vmem:[%s7435_s4 + $0x220] sm:$0xff]  ;;  %v5613_v12 = vmax.bf16 %v70_v5, %v46_v63  ;;  %v187_v48 = vld [vmem:[%s7435_s4 + $0x328] sm:$0xff]  ;;  %v4739_v50 = vcombine.low %v175_v39, %v179_v40 }
  0x1b   :  { %3252 = vmatprep.subr.bf16.mxu0 %v4698_v54  ;;  %3424 = vmatprep.subr.bf16.mxu1 %v4700_v59  ;;  %v5615_v13 = vmax.bf16 %v74_v6, %v50_v0  ;;  %v4714_v19 = vcombine.high %v150_v10, %v154_v11  ;;  %v158_v21 = vld [vmem:[%s7435_s4 + $0x240] sm:$0xff]  ;;  %v4713_v25 = vcombine.low %v150_v10, %v154_v11  ;;  %v191_v55 = vld [vmem:[%s7435_s4 + $0x348] sm:$0xff] }
  0x1c   :  { %v162_v22 = vld [vmem:[%s7435_s4 + $0x260] sm:$0xff]  ;;  %v4748_v52 = vcombine.high %v183_v47, %v187_v48  ;;  %v195_v56 = vld [vmem:[%s7435_s4 + $0x368] sm:$0xff]  ;;  %v4747_v58 = vcombine.low %v183_v47, %v187_v48 }
  0x1d   :  { %v5625_v17 = vcombine.high %v5613_v12, %v5615_v13  ;;  %v4722_v27 = vcombine.high %v158_v21, %v162_v22  ;;  %v166_v29 = vld [vmem:[%s7435_s4 + $0x280] sm:$0xff]  ;;  %v4721_v33 = vcombine.low %v158_v21, %v162_v22  ;;  %v4756_v60 = vcombine.high %v191_v55, %v195_v56  ;;  %v199_v63 = vld [vmem:[%s7435_s4 + $0x388] sm:$0xff] }
  0x1e   :  { %3253 = vmatpush1.bf16.msra.mxu0 %v4697_v4  ;;  %3425 = vmatpush1.bf16.msra.mxu1 %v4699_v7  ;;  %v170_v30 = vld [vmem:[%s7435_s4 + $0x2a0] sm:$0xff]  ;;  %v203_v0 = vld [vmem:[%s7435_s4 + $0x3a8] sm:$0xff]  ;;  %v4755_v5 = vcombine.low %v191_v55, %v195_v56  ;;  %v5761_v40 = vcombine.low %v5613_v12, %v5615_v13 }
  0x1f   :  { %3254 = vmatprep.subr.bf16.mxu0 %v4706_v8  ;;  %3426 = vmatprep.subr.bf16.mxu1 %v4708_v9  ;;  %v4730_v35 = vcombine.high %v166_v29, %v170_v30  ;;  %v174_v37 = vld [vmem:[%s7435_s4 + $0x2c0] sm:$0xff]  ;;  %v4729_v41 = vcombine.low %v166_v29, %v170_v30  ;;  %v207_v4 = vld [vmem:[%s7435_s4 + $0x3c8] sm:$0xff]  ;;  %v4764_v10 = vcombine.high %v199_v63, %v203_v0 }
  0x20   :  { %3272 = vmatprep.mubr.bf16.mxu0 %v5625_v17  ;;  %3444 = vmatprep.mubr.bf16.mxu1 %v5625_v17  ;;  %v178_v38 = vld [vmem:[%s7435_s4 + $0x2e0] sm:$0xff]  ;;  %v211_v7 = vld [vmem:[%s7435_s4 + $0x3e8] sm:$0xff]  ;;  %v4763_v21 = vcombine.low %v199_v63, %v203_v0 }
  0x21   :  { %v4738_v43 = vcombine.high %v174_v37, %v178_v38  ;;  %v182_v45 = vld [vmem:[%s7435_s4 + $0x300] sm:$0xff]  ;;  %v4737_v49 = vcombine.low %v174_v37, %v178_v38  ;;  %v31_v8 = vld [vmem:[%s7436_s0 + $0x8] sm:$0xff]  ;;  %v4772_v23 = vcombine.high %v207_v4, %v211_v7 }
  0x22   :  { %3255 = vmatpush1.bf16.msra.mxu0 %v4705_v16  ;;  %3427 = vmatpush1.bf16.msra.mxu1 %v4707_v18  ;;  %v186_v46 = vld [vmem:[%s7435_s4 + $0x320] sm:$0xff]  ;;  %v35_v9 = vld [vmem:[%s7436_s0 + $0x28] sm:$0xff] }
  0x23   :  { %3256 = vmatprep.subr.bf16.mxu0 %v4714_v19  ;;  %3428 = vmatprep.subr.bf16.mxu1 %v4716_v20  ;;  %v4746_v51 = vcombine.high %v182_v45, %v186_v46  ;;  %v190_v53 = vld [vmem:[%s7435_s4 + $0x340] sm:$0xff]  ;;  %v4745_v57 = vcombine.low %v182_v45, %v186_v46  ;;  %v39_v11 = vld [vmem:[%s7437_s1 + $0x8] sm:$0xff] }
  0x24   :  { %v194_v54 = vld [vmem:[%s7435_s4 + $0x360] sm:$0xff]  ;;  %v43_v14 = vld [vmem:[%s7437_s1 + $0x28] sm:$0xff] }
  0x25   :  { %v4754_v59 = vcombine.high %v190_v53, %v194_v54  ;;  %v198_v61 = vld [vmem:[%s7435_s4 + $0x380] sm:$0xff]  ;;  %v4753_v1 = vcombine.low %v190_v53, %v194_v54  ;;  %v55_v15 = vld [vmem:[%s7438_s2 + $0x8] sm:$0xff] }
  0x26   :  { %3257 = vmatpush1.bf16.msra.mxu0 %v4713_v25  ;;  %3429 = vmatpush1.bf16.msra.mxu1 %v4715_v26  ;;  %v202_v62 = vld [vmem:[%s7435_s4 + $0x3a0] sm:$0xff]  ;;  %v59_v16 = vld [vmem:[%s7438_s2 + $0x28] sm:$0xff]  ;;  %v47_v26 = vmax.bf16 %v39_v11, %v31_v8 }
  0x27   :  { %3258 = vmatprep.subr.bf16.mxu0 %v4722_v27  ;;  %3430 = vmatprep.subr.bf16.mxu1 %v4724_v28  ;;  %v206_v2 = vld [vmem:[%s7435_s4 + $0x3c0] sm:$0xff]  ;;  %v4762_v6 = vcombine.high %v198_v61, %v202_v62  ;;  %v63_v18 = vld [vmem:[%s7439_s3 + $0x8] sm:$0xff]  ;;  %v4761_v20 = vcombine.low %v198_v61, %v202_v62  ;;  %v51_v27 = vmax.bf16 %v43_v14, %v35_v9 }
  0x28   :  { %v210_v3 = vld [vmem:[%s7435_s4 + $0x3e0] sm:$0xff]  ;;  %v67_v19 = vld [vmem:[%s7439_s3 + $0x28] sm:$0xff]  ;;  %v71_v28 = vmax.bf16 %v63_v18, %v55_v15 }
  0x29   :  { %v4770_v22 = vcombine.high %v206_v2, %v210_v3  ;;  %v214_v24 = vld [vmem:[%s7435_s4 + $0x400] sm:$0xff]  ;;  %v75_v29 = vmax.bf16 %v67_v19, %v59_v16  ;;  %v215_v30 = vld [vmem:[%s7435_s4 + $0x408] sm:$0xff]  ;;  %v4769_v32 = vcombine.low %v206_v2, %v210_v3 }
  0x2a   :  { %3259 = vmatpush1.bf16.msra.mxu0 %v4721_v33  ;;  %3431 = vmatpush1.bf16.msra.mxu1 %v4723_v34  ;;  %v218_v25 = vld [vmem:[%s7435_s4 + $0x420] sm:$0xff]  ;;  %v219_v31 = vld [vmem:[%s7435_s4 + $0x428] sm:$0xff]  ;;  %v4771_v33 = vcombine.low %v207_v4, %v211_v7  ;;  %v5755_v38 = vmax.bf16 %v71_v28, %v47_v26 }
  0x2b   :  { %3260 = vmatprep.subr.bf16.mxu0 %v4730_v35  ;;  %3432 = vmatprep.subr.bf16.mxu1 %v4732_v36  ;;  %v4778_v34 = vcombine.high %v214_v24, %v218_v25  ;;  %v4780_v35 = vcombine.high %v215_v30, %v219_v31  ;;  %v222_v36 = vld [vmem:[%s7435_s4 + $0x440] sm:$0xff]  ;;  %v5757_v39 = vmax.bf16 %v75_v29, %v51_v27  ;;  %v231_v48 = vld [vmem:[%s7435_s4 + $0x488] sm:$0xff] }
  0x2c   :  { %v226_v37 = vld [vmem:[%s7435_s4 + $0x460] sm:$0xff]  ;;  %v239_v56 = vld [vmem:[%s7435_s4 + $0x4c8] sm:$0xff] }
  0x2d   :  { %v4786_v45 = vcombine.high %v222_v36, %v226_v37  ;;  %v230_v12 = vld [vmem:[%s7435_s4 + $0x480] sm:$0xff]  ;;  %v5777_v47 = vcombine.high %v5755_v38, %v5757_v39  ;;  %v247_v0 = vld [vmem:[%s7435_s4 + $0x508] sm:$0xff] }
  0x2e   :  { %3261 = vmatpush1.bf16.msra.mxu0 %v4729_v41  ;;  %3433 = vmatpush1.bf16.msra.mxu1 %v4731_v42  ;;  %v223_v41 = vld [vmem:[%s7435_s4 + $0x448] sm:$0xff]  ;;  %v234_v13 = vld [vmem:[%s7435_s4 + $0x4a0] sm:$0xff] }
  0x2f   :  { %3262 = vmatprep.subr.bf16.mxu0 %v4738_v43  ;;  %3434 = vmatprep.subr.bf16.mxu1 %v4740_v44  ;;  %v227_v42 = vld [vmem:[%s7435_s4 + $0x468] sm:$0xff]  ;;  %v4777_v43 = vcombine.low %v214_v24, %v218_v25  ;;  %v4779_v44 = vcombine.low %v215_v30, %v219_v31  ;;  %v238_v54 = vld [vmem:[%s7435_s4 + $0x4c0] sm:$0xff] }
  0x30   :  { %v4788_v46 = vcombine.high %v223_v41, %v227_v42  ;;  %v242_v55 = vld [vmem:[%s7435_s4 + $0x4e0] sm:$0xff]  ;;  %v255_v8 = vld [vmem:[%s7435_s4 + $0x548] sm:$0xff] }
  0x31   :  { %v246_v62 = vld [vmem:[%s7435_s4 + $0x500] sm:$0xff]  ;;  %v4801_v2 = vcombine.low %v238_v54, %v242_v55  ;;  %v259_v9 = vld [vmem:[%s7435_s4 + $0x568] sm:$0xff] }
  0x32   :  { %3263 = vmatpush1.bf16.msra.mxu0 %v4737_v49  ;;  %3435 = vmatpush1.bf16.msra.mxu1 %v4739_v50  ;;  %v235_v49 = vld [vmem:[%s7435_s4 + $0x4a8] sm:$0xff]  ;;  %v4785_v50 = vcombine.low %v222_v36, %v226_v37  ;;  %v250_v63 = vld [vmem:[%s7435_s4 + $0x520] sm:$0xff]  ;;  %v4820_v15 = vcombine.high %v255_v8, %v259_v9 }
  0x33   :  { %3264 = vmatprep.subr.bf16.mxu0 %v4746_v51  ;;  %3436 = vmatprep.subr.bf16.mxu1 %v4748_v52  ;;  %v4787_v51 = vcombine.low %v223_v41, %v227_v42  ;;  %v4794_v52 = vcombine.high %v230_v12, %v234_v13  ;;  %v4796_v53 = vcombine.high %v231_v48, %v235_v49  ;;  %v258_v7 = vld [vmem:[%s7435_s4 + $0x560] sm:$0xff]  ;;  %v263_v19 = vld [vmem:[%s7435_s4 + $0x588] sm:$0xff] }
  0x34   :  { %v4810_v4 = vcombine.high %v246_v62, %v250_v63  ;;  %v262_v16 = vld [vmem:[%s7435_s4 + $0x580] sm:$0xff]  ;;  %v271_v27 = vld [vmem:[%s7435_s4 + $0x5c8] sm:$0xff] }
  0x35   :  { %v266_v18 = vld [vmem:[%s7435_s4 + $0x5a0] sm:$0xff]  ;;  %v275_v28 = vld [vmem:[%s7435_s4 + $0x5e8] sm:$0xff] }
  0x36   :  { %3265 = vmatpush1.bf16.msra.mxu0 %v4745_v57  ;;  %3437 = vmatpush1.bf16.msra.mxu1 %v4747_v58  ;;  %v243_v57 = vld [vmem:[%s7435_s4 + $0x4e8] sm:$0xff]  ;;  %v4793_v58 = vcombine.low %v230_v12, %v234_v13  ;;  %v270_v25 = vld [vmem:[%s7435_s4 + $0x5c0] sm:$0xff]  ;;  %v4825_v29 = vcombine.low %v262_v16, %v266_v18  ;;  %v4835_v41 = vcombine.low %v271_v27, %v275_v28 }
  0x37   :  { %3266 = vmatprep.subr.bf16.mxu0 %v4754_v59  ;;  %3438 = vmatprep.subr.bf16.mxu1 %v4756_v60  ;;  %v4795_v59 = vcombine.low %v231_v48, %v235_v49  ;;  %v4802_v60 = vcombine.high %v238_v54, %v242_v55  ;;  %v4804_v61 = vcombine.high %v239_v56, %v243_v57  ;;  %v274_v26 = vld [vmem:[%s7435_s4 + $0x5e0] sm:$0xff]  ;;  %v283_v36 = vld [vmem:[%s7435_s4 + $0x628] sm:$0xff] }
  0x38   :  { %v4803_v3 = vcombine.low %v239_v56, %v243_v57  ;;  %v4834_v31 = vcombine.high %v270_v25, %v274_v26  ;;  %v4833_v37 = vcombine.low %v270_v25, %v274_v26  ;;  %v291_v12 = vld [vmem:[%s7435_s4 + $0x668] sm:$0xff] }
  0x39   :  { %v299_v54 = vld [vmem:[%s7435_s4 + $0x6a8] sm:$0xff] }
  0x3a   :  { %3267 = vmatpush1.bf16.msra.mxu0 %v4753_v1  ;;  %3439 = vmatpush1.bf16.msra.mxu1 %v4755_v5  ;;  %v251_v1 = vld [vmem:[%s7435_s4 + $0x528] sm:$0xff] }
  0x3b   :  { %3268 = vmatprep.subr.bf16.mxu0 %v4762_v6  ;;  %3440 = vmatprep.subr.bf16.mxu1 %v4764_v10  ;;  %v4812_v5 = vcombine.high %v247_v0, %v251_v1  ;;  %v254_v6 = vld [vmem:[%s7435_s4 + $0x540] sm:$0xff]  ;;  %v4809_v10 = vcombine.low %v246_v62, %v250_v63  ;;  %v4811_v11 = vcombine.low %v247_v0, %v251_v1  ;;  %v307_v62 = vld [vmem:[%s7435_s4 + $0x6e8] sm:$0xff] }
  0x3c   :  { %v4818_v14 = vcombine.high %v254_v6, %v258_v7  ;;  %v331_v25 = vld [vmem:[%s7435_s4 + $0x7a8] sm:$0xff] }
  0x3e   :  { %3269 = vmatpush1.bf16.msra.mxu0 %v4761_v20  ;;  %3441 = vmatpush1.bf16.msra.mxu1 %v4763_v21  ;;  %v267_v20 = vld [vmem:[%s7435_s4 + $0x5a8] sm:$0xff]  ;;  %v4817_v21 = vcombine.low %v254_v6, %v258_v7 }
  0x3f   :  { %3270 = vmatprep.subr.bf16.mxu0 %v4770_v22  ;;  %3442 = vmatprep.subr.bf16.mxu1 %v4772_v23  ;;  %v4819_v22 = vcombine.low %v255_v8, %v259_v9  ;;  %v4826_v23 = vcombine.high %v262_v16, %v266_v18  ;;  %v4828_v24 = vcombine.high %v263_v19, %v267_v20  ;;  %v315_v6 = vld [vmem:[%s7435_s4 + $0x728] sm:$0xff] }
  0x40   :  { %v4827_v30 = vcombine.low %v263_v19, %v267_v20  ;;  %v323_v16 = vld [vmem:[%s7435_s4 + $0x768] sm:$0xff] }
  0x42   :  { %3271 = vmatpush1.bf16.msra.mxu0 %v4769_v32  ;;  %3443 = vmatpush1.bf16.msra.mxu1 %v4771_v33  ;;  %v4836_v32 = vcombine.high %v271_v27, %v275_v28  ;;  %v278_v33 = vld [vmem:[%s7435_s4 + $0x600] sm:$0xff] }
  0x43   :  { %3283 = vmatprep.subr.bf16.mxu0 %v4778_v34  ;;  %3455 = vmatprep.subr.bf16.mxu1 %v4780_v35  ;;  %v282_v34 = vld [vmem:[%s7435_s4 + $0x620] sm:$0xff]  ;;  %v279_v35 = vld [vmem:[%s7435_s4 + $0x608] sm:$0xff] }
  0x44   :  { %v4842_v42 = vcombine.high %v278_v33, %v282_v34  ;;  %v4841_v13 = vcombine.low %v278_v33, %v282_v34  ;;  %v4843_v48 = vcombine.low %v279_v35, %v283_v36  ;;  %v334_v27 = vld [vmem:[%s7435_s4 + $0x7c0] sm:$0xff]  ;;  %v32_v33 = vld [vmem:[%s7436_s0 + $0x10] sm:$0xff] }
  0x45   :  { %3273 = vmatmul.mubr.bf16.vlgmr.msra.gmra.mrb[0].mxu0 %v5761_v40  ;;  %3445 = vmatmul.mubr.bf16.vlgmr.msra.gmra.mrb[0].mxu1 %v5761_v40  ;;  %v338_v28 = vld [vmem:[%s7435_s4 + $0x7e0] sm:$0xff]  ;;  %v36_v34 = vld [vmem:[%s7436_s0 + $0x30] sm:$0xff] }
  0x46   :  { %3284 = vmatpush1.bf16.msra.mxu0 %v4777_v43  ;;  %3456 = vmatpush1.bf16.msra.mxu1 %v4779_v44  ;;  %v4844_v43 = vcombine.high %v279_v35, %v283_v36  ;;  %v286_v44 = vld [vmem:[%s7435_s4 + $0x640] sm:$0xff]  ;;  %v40_v36 = vld [vmem:[%s7437_s1 + $0x10] sm:$0xff] }
  0x47   :  { %3285 = vmatprep.subr.bf16.mxu0 %v4786_v45  ;;  %3457 = vmatprep.subr.bf16.mxu1 %v4788_v46  ;;  %v290_v45 = vld [vmem:[%s7435_s4 + $0x660] sm:$0xff]  ;;  %v287_v46 = vld [vmem:[%s7435_s4 + $0x648] sm:$0xff] }
  0x48   :  { %3315 = vmatprep.mubr.bf16.mxu0 %v5777_v47  ;;  %3487 = vmatprep.mubr.bf16.mxu1 %v5777_v47  ;;  %v4850_v49 = vcombine.high %v286_v44, %v290_v45  ;;  %v4849_v55 = vcombine.low %v286_v44, %v290_v45  ;;  %v4851_v56 = vcombine.low %v287_v46, %v291_v12  ;;  %v68_v44 = vld [vmem:[%s7439_s3 + $0x30] sm:$0xff] }
  0x4a   :  { %3286 = vmatpush1.bf16.msra.mxu0 %v4785_v50  ;;  %3458 = vmatpush1.bf16.msra.mxu1 %v4787_v51  ;;  %v4852_v50 = vcombine.high %v287_v46, %v291_v12  ;;  %v294_v51 = vld [vmem:[%s7435_s4 + $0x680] sm:$0xff]  ;;  %v4898_v12 = vcombine.high %v334_v27, %v338_v28 }
  0x4b   :  { %3287 = vmatprep.subr.bf16.mxu0 %v4794_v52  ;;  %3459 = vmatprep.subr.bf16.mxu1 %v4796_v53  ;;  %v298_v52 = vld [vmem:[%s7435_s4 + $0x6a0] sm:$0xff]  ;;  %v295_v53 = vld [vmem:[%s7435_s4 + $0x688] sm:$0xff] }
  0x4c   :  { %v4858_v57 = vcombine.high %v294_v51, %v298_v52  ;;  %v4857_v63 = vcombine.low %v294_v51, %v298_v52  ;;  %v4859_v0 = vcombine.low %v295_v53, %v299_v54 }
  0x4e   :  { %3288 = vmatpush1.bf16.msra.mxu0 %v4793_v58  ;;  %3460 = vmatpush1.bf16.msra.mxu1 %v4795_v59  ;;  %v4860_v58 = vcombine.high %v295_v53, %v299_v54  ;;  %v302_v59 = vld [vmem:[%s7435_s4 + $0x6c0] sm:$0xff]  ;;  %v343_v54 = vld [vmem:[%s7435_s4 + $0x808] sm:$0xff] }
  0x4f   :  { %3289 = vmatprep.subr.bf16.mxu0 %v4802_v60  ;;  %3461 = vmatprep.subr.bf16.mxu1 %v4804_v61  ;;  %v306_v60 = vld [vmem:[%s7435_s4 + $0x6e0] sm:$0xff]  ;;  %v303_v61 = vld [vmem:[%s7435_s4 + $0x6c8] sm:$0xff] }
  0x50   :  { %v4866_v1 = vcombine.high %v302_v59, %v306_v60  ;;  %v4865_v7 = vcombine.low %v302_v59, %v306_v60  ;;  %v4867_v8 = vcombine.low %v303_v61, %v307_v62  ;;  %v350_v60 = vld [vmem:[%s7435_s4 + $0x840] sm:$0xff] }
  0x52   :  { %3290 = vmatpush1.bf16.msra.mxu0 %v4801_v2  ;;  %3462 = vmatpush1.bf16.msra.mxu1 %v4803_v3  ;;  %v4868_v2 = vcombine.high %v303_v61, %v307_v62  ;;  %v310_v3 = vld [vmem:[%s7435_s4 + $0x700] sm:$0xff] }
  0x53   :  { %3291 = vmatprep.subr.bf16.mxu0 %v4810_v4  ;;  %3463 = vmatprep.subr.bf16.mxu1 %v4812_v5  ;;  %v314_v4 = vld [vmem:[%s7435_s4 + $0x720] sm:$0xff]  ;;  %v311_v5 = vld [vmem:[%s7435_s4 + $0x708] sm:$0xff] }
  0x54   :  { %v4874_v9 = vcombine.high %v310_v3, %v314_v4  ;;  %v4873_v18 = vcombine.low %v310_v3, %v314_v4  ;;  %v4875_v19 = vcombine.low %v311_v5, %v315_v6  ;;  %v354_v61 = vld [vmem:[%s7435_s4 + $0x860] sm:$0xff] }
  0x56   :  { %3292 = vmatpush1.bf16.msra.mxu0 %v4809_v10  ;;  %3464 = vmatpush1.bf16.msra.mxu1 %v4811_v11  ;;  %v4876_v10 = vcombine.high %v311_v5, %v315_v6  ;;  %v318_v11 = vld [vmem:[%s7435_s4 + $0x740] sm:$0xff]  ;;  %v4914_v5 = vcombine.high %v350_v60, %v354_v61 }
  0x57   :  { %3293 = vmatprep.subr.bf16.mxu0 %v4818_v14  ;;  %3465 = vmatprep.subr.bf16.mxu1 %v4820_v15  ;;  %v322_v14 = vld [vmem:[%s7435_s4 + $0x760] sm:$0xff]  ;;  %v319_v15 = vld [vmem:[%s7435_s4 + $0x748] sm:$0xff] }
  0x58   :  { %v4882_v20 = vcombine.high %v318_v11, %v322_v14  ;;  %v4881_v26 = vcombine.low %v318_v11, %v322_v14 }
  0x5a   :  { %3294 = vmatpush1.bf16.msra.mxu0 %v4817_v21  ;;  %3466 = vmatpush1.bf16.msra.mxu1 %v4819_v22  ;;  %v4884_v21 = vcombine.high %v319_v15, %v323_v16  ;;  %v326_v22 = vld [vmem:[%s7435_s4 + $0x780] sm:$0xff] }
  0x5b   :  { %3295 = vmatprep.subr.bf16.mxu0 %v4826_v23  ;;  %3467 = vmatprep.subr.bf16.mxu1 %v4828_v24  ;;  %v330_v23 = vld [vmem:[%s7435_s4 + $0x7a0] sm:$0xff]  ;;  %v327_v24 = vld [vmem:[%s7435_s4 + $0x788] sm:$0xff] }
  0x5c   :  { %v4892_v35 = vcombine.high %v327_v24, %v331_v25  ;;  %v4889_v45 = vcombine.low %v326_v22, %v330_v23  ;;  %v4891_v46 = vcombine.low %v327_v24, %v331_v25  ;;  %v374_v25 = vld [vmem:[%s7435_s4 + $0x900] sm:$0xff] }
  0x5e   :  { %3296 = vmatpush1.bf16.msra.mxu0 %v4825_v29  ;;  %3468 = vmatpush1.bf16.msra.mxu1 %v4827_v30  ;;  %v335_v29 = vld [vmem:[%s7435_s4 + $0x7c8] sm:$0xff]  ;;  %v4883_v30 = vcombine.low %v319_v15, %v323_v16  ;;  %v366_v16 = vld [vmem:[%s7435_s4 + $0x8c0] sm:$0xff] }
  0x5f   :  { %3297 = vmatprep.subr.bf16.mxu0 %v4834_v31  ;;  %3469 = vmatprep.subr.bf16.mxu1 %v4836_v32  ;;  %v4890_v31 = vcombine.high %v326_v22, %v330_v23  ;;  %v339_v32 = vld [vmem:[%s7435_s4 + $0x7e8] sm:$0xff] }
  0x62   :  { %3298 = vmatpush1.bf16.msra.mxu0 %v4833_v37  ;;  %3470 = vmatpush1.bf16.msra.mxu1 %v4835_v41  ;;  %v44_v37 = vld [vmem:[%s7437_s1 + $0x30] sm:$0xff] }
  0x63   :  { %3299 = vmatprep.subr.bf16.mxu0 %v4842_v42  ;;  %3471 = vmatprep.subr.bf16.mxu1 %v4844_v43  ;;  %v56_v41 = vld [vmem:[%s7438_s2 + $0x10] sm:$0xff]  ;;  %v52_v51 = vmax.bf16 %v44_v37, %v36_v34  ;;  %v386_v34 = vld [vmem:[%s7435_s4 + $0x960] sm:$0xff] }
  0x64   :  { %v60_v42 = vld [vmem:[%s7438_s2 + $0x30] sm:$0xff] }
  0x65   :  { %v64_v43 = vld [vmem:[%s7439_s3 + $0x10] sm:$0xff]  ;;  %v76_v53 = vmax.bf16 %v68_v44, %v60_v42  ;;  %v390_v44 = vld [vmem:[%s7435_s4 + $0x980] sm:$0xff] }
  0x66   :  { %3300 = vmatpush1.bf16.msra.mxu0 %v4841_v13  ;;  %3472 = vmatpush1.bf16.msra.mxu1 %v4843_v48  ;;  %v4900_v13 = vcombine.high %v335_v29, %v339_v32  ;;  %v342_v48 = vld [vmem:[%s7435_s4 + $0x800] sm:$0xff]  ;;  %v72_v52 = vmax.bf16 %v64_v43, %v56_v41 }
  0x67   :  { %3301 = vmatprep.subr.bf16.mxu0 %v4850_v49  ;;  %3473 = vmatprep.subr.bf16.mxu1 %v4852_v50  ;;  %v346_v49 = vld [vmem:[%s7435_s4 + $0x820] sm:$0xff]  ;;  %v48_v50 = vmax.bf16 %v40_v36, %v32_v33  ;;  %v387_v36 = vld [vmem:[%s7435_s4 + $0x968] sm:$0xff] }
  0x68   :  { %v4905_v3 = vcombine.low %v342_v48, %v346_v49  ;;  %v382_v33 = vld [vmem:[%s7435_s4 + $0x940] sm:$0xff] }
  0x69   :  { %v5987_v62 = vmax.bf16 %v72_v52, %v48_v50  ;;  %v4946_v42 = vcombine.high %v382_v33, %v386_v34  ;;  %v402_v52 = vld [vmem:[%s7435_s4 + $0x9e0] sm:$0xff] }
  0x6a   :  { %3302 = vmatpush1.bf16.msra.mxu0 %v4849_v55  ;;  %3474 = vmatpush1.bf16.msra.mxu1 %v4851_v56  ;;  %v347_v55 = vld [vmem:[%s7435_s4 + $0x828] sm:$0xff]  ;;  %v4897_v56 = vcombine.low %v334_v27, %v338_v28 }
  0x6b   :  { %3303 = vmatprep.subr.bf16.mxu0 %v4858_v57  ;;  %3475 = vmatprep.subr.bf16.mxu1 %v4860_v58  ;;  %v4899_v57 = vcombine.low %v335_v29, %v339_v32  ;;  %v4906_v58 = vcombine.high %v342_v48, %v346_v49  ;;  %v4908_v59 = vcombine.high %v343_v54, %v347_v55  ;;  %v375_v27 = vld [vmem:[%s7435_s4 + $0x908] sm:$0xff] }
  0x6c   :  { %v4907_v4 = vcombine.low %v343_v54, %v347_v55  ;;  %v379_v28 = vld [vmem:[%s7435_s4 + $0x928] sm:$0xff] }
  0x6d   :  { %v4940_v32 = vcombine.high %v375_v27, %v379_v28  ;;  %v4939_v41 = vcombine.low %v375_v27, %v379_v28  ;;  %v403_v54 = vld [vmem:[%s7435_s4 + $0x9e8] sm:$0xff] }
  0x6e   :  { %3304 = vmatpush1.bf16.msra.mxu0 %v4857_v63  ;;  %3476 = vmatpush1.bf16.msra.mxu1 %v4859_v0  ;;  %v5989_v63 = vmax.bf16 %v76_v53, %v52_v51  ;;  %v5993_v0 = vcombine.low %v5755_v38, %v5757_v39  ;;  %v358_v38 = vld [vmem:[%s7435_s4 + $0x880] sm:$0xff]  ;;  %v399_v53 = vld [vmem:[%s7435_s4 + $0x9c8] sm:$0xff] }
  0x6f   :  { %3305 = vmatprep.subr.bf16.mxu0 %v4866_v1  ;;  %3477 = vmatprep.subr.bf16.mxu1 %v4868_v2  ;;  %v351_v1 = vld [vmem:[%s7435_s4 + $0x848] sm:$0xff]  ;;  %v362_v39 = vld [vmem:[%s7435_s4 + $0x8a0] sm:$0xff] }
  0x70   :  { %v355_v2 = vld [vmem:[%s7435_s4 + $0x868] sm:$0xff]  ;;  %v4922_v14 = vcombine.high %v358_v38, %v362_v39  ;;  %v398_v51 = vld [vmem:[%s7435_s4 + $0x9c0] sm:$0xff] }
  0x71   :  { %v4916_v6 = vcombine.high %v351_v1, %v355_v2  ;;  %v4915_v11 = vcombine.low %v351_v1, %v355_v2  ;;  %v411_v1 = vld [vmem:[%s7435_s4 + $0xa28] sm:$0xff]  ;;  %v4961_v2 = vcombine.low %v398_v51, %v402_v52 }
  0x72   :  { %3306 = vmatpush1.bf16.msra.mxu0 %v4865_v7  ;;  %3478 = vmatpush1.bf16.msra.mxu1 %v4867_v8  ;;  %v6009_v7 = vcombine.high %v5987_v62, %v5989_v63  ;;  %v359_v8 = vld [vmem:[%s7435_s4 + $0x888] sm:$0xff] }
  0x73   :  { %3307 = vmatprep.subr.bf16.mxu0 %v4874_v9  ;;  %3479 = vmatprep.subr.bf16.mxu1 %v4876_v10  ;;  %v363_v9 = vld [vmem:[%s7435_s4 + $0x8a8] sm:$0xff]  ;;  %v4913_v10 = vcombine.low %v350_v60, %v354_v61  ;;  %v410_v60 = vld [vmem:[%s7435_s4 + $0xa20] sm:$0xff] }
  0x74   :  { %v4924_v15 = vcombine.high %v359_v8, %v363_v9  ;;  %v4923_v22 = vcombine.low %v359_v8, %v363_v9  ;;  %v407_v61 = vld [vmem:[%s7435_s4 + $0xa08] sm:$0xff] }
  0x75   :  { %v419_v8 = vld [vmem:[%s7435_s4 + $0xa68] sm:$0xff] }
  0x76   :  { %3308 = vmatpush1.bf16.msra.mxu0 %v4873_v18  ;;  %3480 = vmatpush1.bf16.msra.mxu1 %v4875_v19  ;;  %v370_v18 = vld [vmem:[%s7435_s4 + $0x8e0] sm:$0xff]  ;;  %v367_v19 = vld [vmem:[%s7435_s4 + $0x8c8] sm:$0xff] }
  0x77   :  { %3309 = vmatprep.subr.bf16.mxu0 %v4882_v20  ;;  %3481 = vmatprep.subr.bf16.mxu1 %v4884_v21  ;;  %v371_v20 = vld [vmem:[%s7435_s4 + $0x8e8] sm:$0xff]  ;;  %v4921_v21 = vcombine.low %v358_v38, %v362_v39  ;;  %v4930_v23 = vcombine.high %v366_v16, %v370_v18  ;;  %v4929_v29 = vcombine.low %v366_v16, %v370_v18  ;;  %v418_v38 = vld [vmem:[%s7435_s4 + $0xa60] sm:$0xff] }
  0x78   :  { %v4932_v24 = vcombine.high %v367_v19, %v371_v20  ;;  %v415_v39 = vld [vmem:[%s7435_s4 + $0xa48] sm:$0xff]  ;;  %v426_v16 = vld [vmem:[%s7435_s4 + $0xaa0] sm:$0xff] }
  0x79   :  { %v423_v18 = vld [vmem:[%s7435_s4 + $0xa88] sm:$0xff] }
  0x7a   :  { %3310 = vmatpush1.bf16.msra.mxu0 %v4881_v26  ;;  %3482 = vmatpush1.bf16.msra.mxu1 %v4883_v30  ;;  %v378_v26 = vld [vmem:[%s7435_s4 + $0x920] sm:$0xff]  ;;  %v4931_v30 = vcombine.low %v367_v19, %v371_v20  ;;  %v427_v19 = vld [vmem:[%s7435_s4 + $0xaa8] sm:$0xff] }
  0x7b   :  { %3311 = vmatprep.subr.bf16.mxu0 %v4890_v31  ;;  %3483 = vmatprep.subr.bf16.mxu1 %v4892_v35  ;;  %v4938_v31 = vcombine.high %v374_v25, %v378_v26  ;;  %v383_v35 = vld [vmem:[%s7435_s4 + $0x948] sm:$0xff]  ;;  %v4937_v37 = vcombine.low %v374_v25, %v378_v26  ;;  %v434_v25 = vld [vmem:[%s7435_s4 + $0xae0] sm:$0xff] }
  0x7c   :  { %v4948_v43 = vcombine.high %v383_v35, %v387_v36  ;;  %v4947_v48 = vcombine.low %v383_v35, %v387_v36  ;;  %v431_v26 = vld [vmem:[%s7435_s4 + $0xac8] sm:$0xff] }
  0x7d   :  { %v435_v27 = vld [vmem:[%s7435_s4 + $0xae8] sm:$0xff] }
  0x7e   :  { %3312 = vmatpush1.bf16.msra.mxu0 %v4889_v45  ;;  %3484 = vmatpush1.bf16.msra.mxu1 %v4891_v46  ;;  %v394_v45 = vld [vmem:[%s7435_s4 + $0x9a0] sm:$0xff]  ;;  %v391_v46 = vld [vmem:[%s7435_s4 + $0x988] sm:$0xff] }
  0x7f   :  { %3313 = vmatprep.subr.bf16.mxu0 %v4898_v12  ;;  %3485 = vmatprep.subr.bf16.mxu1 %v4900_v13  ;;  %v395_v12 = vld [vmem:[%s7435_s4 + $0x9a8] sm:$0xff]  ;;  %v4945_v13 = vcombine.low %v382_v33, %v386_v34  ;;  %v4954_v49 = vcombine.high %v390_v44, %v394_v45  ;;  %v4953_v55 = vcombine.low %v390_v44, %v394_v45  ;;  %v442_v33 = vld [vmem:[%s7435_s4 + $0xb20] sm:$0xff] }
  0x80   :  { %v4956_v50 = vcombine.high %v391_v46, %v395_v12  ;;  %v439_v34 = vld [vmem:[%s7435_s4 + $0xb08] sm:$0xff]  ;;  %v450_v44 = vld [vmem:[%s7435_s4 + $0xb60] sm:$0xff] }
  0x81   :  { %v443_v35 = vld [vmem:[%s7435_s4 + $0xb28] sm:$0xff] }
  0x82   :  { %3314 = vmatpush1.bf16.msra.mxu0 %v4897_v56  ;;  %3486 = vmatpush1.bf16.msra.mxu1 %v4899_v57  ;;  %v4955_v56 = vcombine.low %v391_v46, %v395_v12  ;;  %v4962_v57 = vcombine.high %v398_v51, %v402_v52  ;;  %v447_v45 = vld [vmem:[%s7435_s4 + $0xb48] sm:$0xff]  ;;  %v458_v51 = vld [vmem:[%s7435_s4 + $0xba0] sm:$0xff] }
  0x83   :  { %3326 = vmatprep.subr.bf16.mxu0 %v4906_v58  ;;  %3498 = vmatprep.subr.bf16.mxu1 %v4908_v59  ;;  %v4964_v58 = vcombine.high %v399_v53, %v403_v54  ;;  %v406_v59 = vld [vmem:[%s7435_s4 + $0xa00] sm:$0xff]  ;;  %v451_v46 = vld [vmem:[%s7435_s4 + $0xb68] sm:$0xff] }
  0x84   :  { %v4969_v9 = vcombine.low %v406_v59, %v410_v60  ;;  %v455_v52 = vld [vmem:[%s7435_s4 + $0xb88] sm:$0xff] }
  0x85   :  { %3316 = vmatmul.mubr.bf16.vlgmr.msra.gmra.mrb[0].mxu0 %v5993_v0  ;;  %3488 = vmatmul.mubr.bf16.vlgmr.msra.gmra.mrb[0].mxu1 %v5993_v0 }
  0x86   :  { %3327 = vmatpush1.bf16.msra.mxu0 %v4905_v3  ;;  %3499 = vmatpush1.bf16.msra.mxu1 %v4907_v4  ;;  %v4963_v3 = vcombine.low %v399_v53, %v403_v54  ;;  %v4970_v4 = vcombine.high %v406_v59, %v410_v60  ;;  %v459_v53 = vld [vmem:[%s7435_s4 + $0xba8] sm:$0xff] }
  0x87   :  { %3328 = vmatprep.subr.bf16.mxu0 %v4914_v5  ;;  %3500 = vmatprep.subr.bf16.mxu1 %v4916_v6  ;;  %v4972_v5 = vcombine.high %v407_v61, %v411_v1  ;;  %v414_v6 = vld [vmem:[%s7435_s4 + $0xa40] sm:$0xff]  ;;  %v467_v60 = vld [vmem:[%s7435_s4 + $0xbe8] sm:$0xff] }
  0x88   :  { %3358 = vmatprep.mubr.bf16.mxu0 %v6009_v7  ;;  %3530 = vmatprep.mubr.bf16.mxu1 %v6009_v7  ;;  %v4977_v20 = vcombine.low %v414_v6, %v418_v38 }
  0x8a   :  { %3329 = vmatpush1.bf16.msra.mxu0 %v4913_v10  ;;  %3501 = vmatpush1.bf16.msra.mxu1 %v4915_v11  ;;  %v4971_v10 = vcombine.low %v407_v61, %v411_v1  ;;  %v4978_v11 = vcombine.high %v414_v6, %v418_v38  ;;  %v33_v61 = vld [vmem:[%s7436_s0 + $0x18] sm:$0xff] }
  0x8b   :  { %3330 = vmatprep.subr.bf16.mxu0 %v4922_v14  ;;  %3502 = vmatprep.subr.bf16.mxu1 %v4924_v15  ;;  %v4980_v14 = vcombine.high %v415_v39, %v419_v8  ;;  %v422_v15 = vld [vmem:[%s7435_s4 + $0xa80] sm:$0xff]  ;;  %v37_v1 = vld [vmem:[%s7436_s0 + $0x38] sm:$0xff] }
  0x8c   :  { %v4985_v28 = vcombine.low %v422_v15, %v426_v16  ;;  %v61_v6 = vld [vmem:[%s7438_s2 + $0x38] sm:$0xff] }
  0x8d   :  { %v65_v38 = vld [vmem:[%s7439_s3 + $0x18] sm:$0xff] }
  0x8e   :  { %3331 = vmatpush1.bf16.msra.mxu0 %v4921_v21  ;;  %3503 = vmatpush1.bf16.msra.mxu1 %v4923_v22  ;;  %v4979_v21 = vcombine.low %v415_v39, %v419_v8  ;;  %v4986_v22 = vcombine.high %v422_v15, %v426_v16  ;;  %v69_v39 = vld [vmem:[%s7439_s3 + $0x38] sm:$0xff]  ;;  %v474_v15 = vld [vmem:[%s7435_s4 + $0xc20] sm:$0xff] }
  0x8f   :  { %3332 = vmatprep.subr.bf16.mxu0 %v4930_v23  ;;  %3504 = vmatprep.subr.bf16.mxu1 %v4932_v24  ;;  %v4988_v23 = vcombine.high %v423_v18, %v427_v19  ;;  %v430_v24 = vld [vmem:[%s7435_s4 + $0xac0] sm:$0xff] }
  0x90   :  { %v4993_v36 = vcombine.low %v430_v24, %v434_v25 }
  0x92   :  { %3333 = vmatpush1.bf16.msra.mxu0 %v4929_v29  ;;  %3505 = vmatpush1.bf16.msra.mxu1 %v4931_v30  ;;  %v4987_v29 = vcombine.low %v423_v18, %v427_v19  ;;  %v4994_v30 = vcombine.high %v430_v24, %v434_v25 }
  0x93   :  { %3334 = vmatprep.subr.bf16.mxu0 %v4938_v31  ;;  %3506 = vmatprep.subr.bf16.mxu1 %v4940_v32  ;;  %v4996_v31 = vcombine.high %v431_v26, %v435_v27  ;;  %v438_v32 = vld [vmem:[%s7435_s4 + $0xb00] sm:$0xff] }
  0x94   :  { %v5001_v12 = vcombine.low %v438_v32, %v442_v33 }
  0x96   :  { %3335 = vmatpush1.bf16.msra.mxu0 %v4937_v37  ;;  %3507 = vmatpush1.bf16.msra.mxu1 %v4939_v41  ;;  %v4995_v37 = vcombine.low %v431_v26, %v435_v27  ;;  %v5002_v41 = vcombine.high %v438_v32, %v442_v33  ;;  %v478_v27 = vld [vmem:[%s7435_s4 + $0xc40] sm:$0xff]  ;;  %v479_v32 = vld [vmem:[%s7435_s4 + $0xc48] sm:$0xff] }
  0x97   :  { %3336 = vmatprep.subr.bf16.mxu0 %v4946_v42  ;;  %3508 = vmatprep.subr.bf16.mxu1 %v4948_v43  ;;  %v5004_v42 = vcombine.high %v439_v34, %v443_v35  ;;  %v446_v43 = vld [vmem:[%s7435_s4 + $0xb40] sm:$0xff]  ;;  %v483_v33 = vld [vmem:[%s7435_s4 + $0xc68] sm:$0xff] }
  0x98   :  { %v5009_v54 = vcombine.low %v446_v43, %v450_v44 }
  0x9a   :  { %3337 = vmatpush1.bf16.msra.mxu0 %v4945_v13  ;;  %3509 = vmatpush1.bf16.msra.mxu1 %v4947_v48  ;;  %v5003_v13 = vcombine.low %v439_v34, %v443_v35  ;;  %v5010_v48 = vcombine.high %v446_v43, %v450_v44  ;;  %v491_v43 = vld [vmem:[%s7435_s4 + $0xca8] sm:$0xff] }
  0x9b   :  { %3338 = vmatprep.subr.bf16.mxu0 %v4954_v49  ;;  %3510 = vmatprep.subr.bf16.mxu1 %v4956_v50  ;;  %v5012_v49 = vcombine.high %v447_v45, %v451_v46  ;;  %v454_v50 = vld [vmem:[%s7435_s4 + $0xb80] sm:$0xff] }
  0x9c   :  { %v5018_v59 = vcombine.high %v454_v50, %v458_v51  ;;  %v5017_v8 = vcombine.low %v454_v50, %v458_v51  ;;  %v499_v50 = vld [vmem:[%s7435_s4 + $0xce8] sm:$0xff] }
  0x9e   :  { %3339 = vmatpush1.bf16.msra.mxu0 %v4953_v55  ;;  %3511 = vmatpush1.bf16.msra.mxu1 %v4955_v56  ;;  %v462_v55 = vld [vmem:[%s7435_s4 + $0xbc0] sm:$0xff] }
  0x9f   :  { %3340 = vmatprep.subr.bf16.mxu0 %v4962_v57  ;;  %3512 = vmatprep.subr.bf16.mxu1 %v4964_v58  ;;  %v466_v56 = vld [vmem:[%s7435_s4 + $0xbe0] sm:$0xff]  ;;  %v463_v57 = vld [vmem:[%s7435_s4 + $0xbc8] sm:$0xff]  ;;  %v5011_v58 = vcombine.low %v447_v45, %v451_v46  ;;  %v5043_v45 = vcombine.low %v479_v32, %v483_v33 }
  0xa0   :  { %v5027_v24 = vcombine.low %v463_v57, %v467_v60 }
  0xa2   :  { %3341 = vmatpush1.bf16.msra.mxu0 %v4961_v2  ;;  %3513 = vmatpush1.bf16.msra.mxu1 %v4963_v3  ;;  %v5020_v2 = vcombine.high %v455_v52, %v459_v53  ;;  %v41_v3 = vld [vmem:[%s7437_s1 + $0x18] sm:$0xff] }
  0xa3   :  { %3342 = vmatprep.subr.bf16.mxu0 %v4970_v4  ;;  %3514 = vmatprep.subr.bf16.mxu1 %v4972_v5  ;;  %v45_v4 = vld [vmem:[%s7437_s1 + $0x38] sm:$0xff]  ;;  %v49_v16 = vmax.bf16 %v41_v3, %v33_v61  ;;  %v514_v3 = vld [vmem:[%s7435_s4 + $0xd60] sm:$0xff] }
  0xa4   :  { %v57_v5 = vld [vmem:[%s7438_s2 + $0x18] sm:$0xff]  ;;  %v53_v18 = vmax.bf16 %v45_v4, %v37_v1  ;;  %v511_v4 = vld [vmem:[%s7435_s4 + $0xd48] sm:$0xff] }
  0xa5   :  { %v73_v19 = vmax.bf16 %v65_v38, %v57_v5  ;;  %v515_v5 = vld [vmem:[%s7435_s4 + $0xd68] sm:$0xff] }
  0xa6   :  { %3343 = vmatpush1.bf16.msra.mxu0 %v4969_v9  ;;  %3515 = vmatpush1.bf16.msra.mxu1 %v4971_v10  ;;  %v5019_v9 = vcombine.low %v455_v52, %v459_v53  ;;  %v5026_v10 = vcombine.high %v462_v55, %v466_v56 }
  0xa7   :  { %3344 = vmatprep.subr.bf16.mxu0 %v4978_v11  ;;  %3516 = vmatprep.subr.bf16.mxu1 %v4980_v14  ;;  %v5028_v11 = vcombine.high %v463_v57, %v467_v60  ;;  %v470_v14 = vld [vmem:[%s7435_s4 + $0xc00] sm:$0xff]  ;;  %v503_v57 = vld [vmem:[%s7435_s4 + $0xd08] sm:$0xff] }
  0xa8   :  { %v5034_v25 = vcombine.high %v470_v14, %v474_v15  ;;  %v5033_v34 = vcombine.low %v470_v14, %v474_v15  ;;  %v523_v14 = vld [vmem:[%s7435_s4 + $0xda8] sm:$0xff] }
  0xaa   :  { %3345 = vmatpush1.bf16.msra.mxu0 %v4977_v20  ;;  %3517 = vmatpush1.bf16.msra.mxu1 %v4979_v21  ;;  %v77_v20 = vmax.bf16 %v69_v39, %v61_v6  ;;  %v471_v21 = vld [vmem:[%s7435_s4 + $0xc08] sm:$0xff] }
  0xab   :  { %3346 = vmatprep.subr.bf16.mxu0 %v4986_v22  ;;  %3518 = vmatprep.subr.bf16.mxu1 %v4988_v23  ;;  %v475_v22 = vld [vmem:[%s7435_s4 + $0xc28] sm:$0xff]  ;;  %v5025_v23 = vcombine.low %v462_v55, %v466_v56  ;;  %v502_v55 = vld [vmem:[%s7435_s4 + $0xd00] sm:$0xff] }
  0xac   :  { %v5036_v26 = vcombine.high %v471_v21, %v475_v22  ;;  %v5035_v35 = vcombine.low %v471_v21, %v475_v22  ;;  %v506_v56 = vld [vmem:[%s7435_s4 + $0xd20] sm:$0xff]  ;;  %v527_v22 = vld [vmem:[%s7435_s4 + $0xdc8] sm:$0xff] }
  0xad   :  { %v5066_v61 = vcombine.high %v502_v55, %v506_v56  ;;  %v5065_v6 = vcombine.low %v502_v55, %v506_v56  ;;  %v530_v21 = vld [vmem:[%s7435_s4 + $0xde0] sm:$0xff] }
  0xae   :  { %3347 = vmatpush1.bf16.msra.mxu0 %v4985_v28  ;;  %3519 = vmatpush1.bf16.msra.mxu1 %v4987_v29  ;;  %v482_v28 = vld [vmem:[%s7435_s4 + $0xc60] sm:$0xff]  ;;  %v6219_v29 = vmax.bf16 %v73_v19, %v49_v16  ;;  %v5075_v16 = vcombine.low %v511_v4, %v515_v5 }
  0xaf   :  { %3348 = vmatprep.subr.bf16.mxu0 %v4994_v30  ;;  %3520 = vmatprep.subr.bf16.mxu1 %v4996_v31  ;;  %v6221_v30 = vmax.bf16 %v77_v20, %v53_v18  ;;  %v6225_v31 = vcombine.low %v5987_v62, %v5989_v63  ;;  %v486_v62 = vld [vmem:[%s7435_s4 + $0xc80] sm:$0xff]  ;;  %v5041_v44 = vcombine.low %v478_v27, %v482_v28 }
  0xb0   :  { %v490_v63 = vld [vmem:[%s7435_s4 + $0xca0] sm:$0xff] }
  0xb1   :  { %v5050_v46 = vcombine.high %v486_v62, %v490_v63  ;;  %v5049_v51 = vcombine.low %v486_v62, %v490_v63  ;;  %v526_v20 = vld [vmem:[%s7435_s4 + $0xdc0] sm:$0xff] }
  0xb2   :  { %3349 = vmatpush1.bf16.msra.mxu0 %v4993_v36  ;;  %3521 = vmatpush1.bf16.msra.mxu1 %v4995_v37  ;;  %v5042_v36 = vcombine.high %v478_v27, %v482_v28  ;;  %v5044_v37 = vcombine.high %v479_v32, %v483_v33  ;;  %v534_v28 = vld [vmem:[%s7435_s4 + $0xe00] sm:$0xff]  ;;  %v535_v33 = vld [vmem:[%s7435_s4 + $0xe08] sm:$0xff] }
  0xb3   :  { %3350 = vmatprep.subr.bf16.mxu0 %v5002_v41  ;;  %3522 = vmatprep.subr.bf16.mxu1 %v5004_v42  ;;  %v6241_v41 = vcombine.high %v6219_v29, %v6221_v30  ;;  %v487_v42 = vld [vmem:[%s7435_s4 + $0xc88] sm:$0xff]  ;;  %v538_v32 = vld [vmem:[%s7435_s4 + $0xe20] sm:$0xff] }
  0xb4   :  { %v5051_v52 = vcombine.low %v487_v42, %v491_v43  ;;  %v542_v63 = vld [vmem:[%s7435_s4 + $0xe40] sm:$0xff] }
  0xb5   :  { %v558_v56 = vld [vmem:[%s7435_s4 + $0xec0] sm:$0xff] }
  0xb6   :  { %3351 = vmatpush1.bf16.msra.mxu0 %v5001_v12  ;;  %3523 = vmatpush1.bf16.msra.mxu1 %v5003_v13  ;;  %v5052_v12 = vcombine.high %v487_v42, %v491_v43  ;;  %v494_v13 = vld [vmem:[%s7435_s4 + $0xcc0] sm:$0xff]  ;;  %v543_v43 = vld [vmem:[%s7435_s4 + $0xe48] sm:$0xff] }
  0xb7   :  { %3352 = vmatprep.subr.bf16.mxu0 %v5010_v48  ;;  %3524 = vmatprep.subr.bf16.mxu1 %v5012_v49  ;;  %v498_v48 = vld [vmem:[%s7435_s4 + $0xce0] sm:$0xff]  ;;  %v495_v49 = vld [vmem:[%s7435_s4 + $0xcc8] sm:$0xff] }
  0xb8   :  { %v5058_v53 = vcombine.high %v494_v13, %v498_v48  ;;  %v5059_v60 = vcombine.low %v495_v49, %v499_v50  ;;  %v546_v42 = vld [vmem:[%s7435_s4 + $0xe60] sm:$0xff] }
  0xba   :  { %3353 = vmatpush1.bf16.msra.mxu0 %v5009_v54  ;;  %3525 = vmatpush1.bf16.msra.mxu1 %v5011_v58  ;;  %v5060_v54 = vcombine.high %v495_v49, %v499_v50  ;;  %v507_v58 = vld [vmem:[%s7435_s4 + $0xd28] sm:$0xff]  ;;  %v554_v49 = vld [vmem:[%s7435_s4 + $0xea0] sm:$0xff] }
  0xbb   :  { %3354 = vmatprep.subr.bf16.mxu0 %v5018_v59  ;;  %3526 = vmatprep.subr.bf16.mxu1 %v5020_v2  ;;  %v5057_v59 = vcombine.low %v494_v13, %v498_v48  ;;  %v5068_v1 = vcombine.high %v503_v57, %v507_v58  ;;  %v510_v2 = vld [vmem:[%s7435_s4 + $0xd40] sm:$0xff]  ;;  %v5067_v38 = vcombine.low %v503_v57, %v507_v58  ;;  %v551_v50 = vld [vmem:[%s7435_s4 + $0xe88] sm:$0xff] }
  0xbc   :  { %v5074_v39 = vcombine.high %v510_v2, %v514_v3  ;;  %v5073_v15 = vcombine.low %v510_v2, %v514_v3  ;;  %v550_v48 = vld [vmem:[%s7435_s4 + $0xe80] sm:$0xff]  ;;  %v559_v58 = vld [vmem:[%s7435_s4 + $0xec8] sm:$0xff] }
  0xbd   :  { %v562_v57 = vld [vmem:[%s7435_s4 + $0xee0] sm:$0xff] }
  0xbe   :  { %3355 = vmatpush1.bf16.msra.mxu0 %v5017_v8  ;;  %3527 = vmatpush1.bf16.msra.mxu1 %v5019_v9  ;;  %v5076_v8 = vcombine.high %v511_v4, %v515_v5  ;;  %v518_v9 = vld [vmem:[%s7435_s4 + $0xd80] sm:$0xff]  ;;  %v567_v5 = vld [vmem:[%s7435_s4 + $0xf08] sm:$0xff] }
  0xbf   :  { %3356 = vmatprep.subr.bf16.mxu0 %v5026_v10  ;;  %3528 = vmatprep.subr.bf16.mxu1 %v5028_v11  ;;  %v522_v10 = vld [vmem:[%s7435_s4 + $0xda0] sm:$0xff]  ;;  %v519_v11 = vld [vmem:[%s7435_s4 + $0xd88] sm:$0xff] }
  0xc0   :  { %v5082_v18 = vcombine.high %v518_v9, %v522_v10  ;;  %v5084_v19 = vcombine.high %v519_v11, %v523_v14  ;;  %v566_v3 = vld [vmem:[%s7435_s4 + $0xf00] sm:$0xff] }
  0xc1   :  { %v570_v4 = vld [vmem:[%s7435_s4 + $0xf20] sm:$0xff] }
  0xc2   :  { %3357 = vmatpush1.bf16.msra.mxu0 %v5025_v23  ;;  %3529 = vmatpush1.bf16.msra.mxu1 %v5027_v24  ;;  %v531_v23 = vld [vmem:[%s7435_s4 + $0xde8] sm:$0xff]  ;;  %v5081_v24 = vcombine.low %v518_v9, %v522_v10  ;;  %v574_v10 = vld [vmem:[%s7435_s4 + $0xf40] sm:$0xff] }
  0xc3   :  { %3369 = vmatprep.subr.bf16.mxu0 %v5034_v25  ;;  %3541 = vmatprep.subr.bf16.mxu1 %v5036_v26  ;;  %v5083_v25 = vcombine.low %v519_v11, %v523_v14  ;;  %v5090_v26 = vcombine.high %v526_v20, %v530_v21  ;;  %v5092_v27 = vcombine.high %v527_v22, %v531_v23  ;;  %v578_v11 = vld [vmem:[%s7435_s4 + $0xf60] sm:$0xff]  ;;  %v575_v14 = vld [vmem:[%s7435_s4 + $0xf48] sm:$0xff] }
  0xc5   :  { %3359 = vmatmul.mubr.bf16.vlgmr.msra.gmra.mrb[0].mxu0 %v6225_v31  ;;  %3531 = vmatmul.mubr.bf16.vlgmr.msra.gmra.mrb[0].mxu1 %v6225_v31 }
  0xc6   :  { %3370 = vmatpush1.bf16.msra.mxu0 %v5033_v34  ;;  %3542 = vmatpush1.bf16.msra.mxu1 %v5035_v35  ;;  %v539_v34 = vld [vmem:[%s7435_s4 + $0xe28] sm:$0xff]  ;;  %v5089_v35 = vcombine.low %v526_v20, %v530_v21  ;;  %v582_v21 = vld [vmem:[%s7435_s4 + $0xf80] sm:$0xff] }
  0xc7   :  { %3371 = vmatprep.subr.bf16.mxu0 %v5042_v36  ;;  %3543 = vmatprep.subr.bf16.mxu1 %v5044_v37  ;;  %v5091_v36 = vcombine.low %v527_v22, %v531_v23  ;;  %v5098_v37 = vcombine.high %v534_v28, %v538_v32  ;;  %v5100_v62 = vcombine.high %v535_v33, %v539_v34  ;;  %v586_v22 = vld [vmem:[%s7435_s4 + $0xfa0] sm:$0xff]  ;;  %v583_v23 = vld [vmem:[%s7435_s4 + $0xf88] sm:$0xff] }
  0xc8   :  { %3401 = vmatprep.mubr.bf16.mxu0 %v6241_v41  ;;  %3573 = vmatprep.mubr.bf16.mxu1 %v6241_v41 }
  0xca   :  { %3372 = vmatpush1.bf16.msra.mxu0 %v5041_v44  ;;  %3544 = vmatpush1.bf16.msra.mxu1 %v5043_v45  ;;  %v547_v44 = vld [vmem:[%s7435_s4 + $0xe68] sm:$0xff]  ;;  %v5097_v45 = vcombine.low %v534_v28, %v538_v32  ;;  %v590_v32 = vld [vmem:[%s7435_s4 + $0xfc0] sm:$0xff] }
  0xcb   :  { %3373 = vmatprep.subr.bf16.mxu0 %v5050_v46  ;;  %3545 = vmatprep.subr.bf16.mxu1 %v5052_v12  ;;  %v5099_v46 = vcombine.low %v535_v33, %v539_v34  ;;  %v5106_v12 = vcombine.high %v542_v63, %v546_v42  ;;  %v5108_v13 = vcombine.high %v543_v43, %v547_v44  ;;  %v594_v33 = vld [vmem:[%s7435_s4 + $0xfe0] sm:$0xff]  ;;  %v591_v34 = vld [vmem:[%s7435_s4 + $0xfc8] sm:$0xff] }
  0xce   :  { %3374 = vmatpush1.bf16.msra.mxu0 %v5049_v51  ;;  %3546 = vmatpush1.bf16.msra.mxu1 %v5051_v52  ;;  %v555_v51 = vld [vmem:[%s7435_s4 + $0xea8] sm:$0xff]  ;;  %v5105_v52 = vcombine.low %v542_v63, %v546_v42  ;;  %v88_v42 = vld [vmem:[%s7435_s4 + $0x10] sm:$0xff] }
  0xcf   :  { %3375 = vmatprep.subr.bf16.mxu0 %v5058_v53  ;;  %3547 = vmatprep.subr.bf16.mxu1 %v5060_v54  ;;  %v5107_v53 = vcombine.low %v543_v43, %v547_v44  ;;  %v5114_v54 = vcombine.high %v550_v48, %v554_v49  ;;  %v5116_v55 = vcombine.high %v551_v50, %v555_v51  ;;  %v92_v43 = vld [vmem:[%s7435_s4 + $0x30] sm:$0xff]  ;;  %v89_v44 = vld [vmem:[%s7435_s4 + $0x18] sm:$0xff] }
  0xd2   :  { %3376 = vmatpush1.bf16.msra.mxu0 %v5057_v59  ;;  %3548 = vmatpush1.bf16.msra.mxu1 %v5059_v60  ;;  %v563_v59 = vld [vmem:[%s7435_s4 + $0xee8] sm:$0xff]  ;;  %v5113_v60 = vcombine.low %v550_v48, %v554_v49  ;;  %v96_v49 = vld [vmem:[%s7435_s4 + $0x50] sm:$0xff] }
  0xd3   :  { %3377 = vmatprep.subr.bf16.mxu0 %v5066_v61  ;;  %3549 = vmatprep.subr.bf16.mxu1 %v5068_v1  ;;  %v5115_v61 = vcombine.low %v551_v50, %v555_v51  ;;  %v5122_v1 = vcombine.high %v558_v56, %v562_v57  ;;  %v5124_v2 = vcombine.high %v559_v58, %v563_v59  ;;  %v100_v50 = vld [vmem:[%s7435_s4 + $0x70] sm:$0xff] }
  0xd4   :  { %v6429_v51 = vcombine.low %v6219_v29, %v6221_v30  ;;  %v104_v29 = vld [vmem:[%s7435_s4 + $0x90] sm:$0xff] }
  0xd5   :  { %v108_v30 = vld [vmem:[%s7435_s4 + $0xb0] sm:$0xff] }
  0xd6   :  { %3378 = vmatpush1.bf16.msra.mxu0 %v5065_v6  ;;  %3550 = vmatpush1.bf16.msra.mxu1 %v5067_v38  ;;  %v571_v6 = vld [vmem:[%s7435_s4 + $0xf28] sm:$0xff]  ;;  %v5121_v38 = vcombine.low %v558_v56, %v562_v57  ;;  %v4662_v56 = vcombine.high %v96_v49, %v100_v50 }
  0xd7   :  { %3379 = vmatprep.subr.bf16.mxu0 %v5074_v39  ;;  %3551 = vmatprep.subr.bf16.mxu1 %v5076_v8  ;;  %v5123_v39 = vcombine.low %v559_v58, %v563_v59  ;;  %v5130_v8 = vcombine.high %v566_v3, %v570_v4  ;;  %v5132_v9 = vcombine.high %v567_v5, %v571_v6  ;;  %v105_v58 = vld [vmem:[%s7435_s4 + $0x98] sm:$0xff] }
  0xd8   :  { %v109_v59 = vld [vmem:[%s7435_s4 + $0xb8] sm:$0xff] }
  0xda   :  { %3380 = vmatpush1.bf16.msra.mxu0 %v5073_v15  ;;  %3552 = vmatpush1.bf16.msra.mxu1 %v5075_v16  ;;  %v579_v15 = vld [vmem:[%s7435_s4 + $0xf68] sm:$0xff]  ;;  %v5129_v16 = vcombine.low %v566_v3, %v570_v4  ;;  %v112_v3 = vld [vmem:[%s7435_s4 + $0xd0] sm:$0xff] }
  0xdb   :  { %3381 = vmatprep.subr.bf16.mxu0 %v5082_v18  ;;  %3553 = vmatprep.subr.bf16.mxu1 %v5084_v19  ;;  %v5131_v18 = vcombine.low %v567_v5, %v571_v6  ;;  %v5138_v19 = vcombine.high %v574_v10, %v578_v11  ;;  %v5140_v20 = vcombine.high %v575_v14, %v579_v15  ;;  %v116_v4 = vld [vmem:[%s7435_s4 + $0xf0] sm:$0xff]  ;;  %v113_v5 = vld [vmem:[%s7435_s4 + $0xd8] sm:$0xff] }
  0xdc   :  { %v117_v6 = vld [vmem:[%s7435_s4 + $0xf8] sm:$0xff] }
  0xde   :  { %3382 = vmatpush1.bf16.msra.mxu0 %v5081_v24  ;;  %3554 = vmatpush1.bf16.msra.mxu1 %v5083_v25  ;;  %v587_v24 = vld [vmem:[%s7435_s4 + $0xfa8] sm:$0xff]  ;;  %v5137_v25 = vcombine.low %v574_v10, %v578_v11  ;;  %v120_v10 = vld [vmem:[%s7435_s4 + $0x110] sm:$0xff] }
  0xdf   :  { %3383 = vmatprep.subr.bf16.mxu0 %v5090_v26  ;;  %3555 = vmatprep.subr.bf16.mxu1 %v5092_v27  ;;  %v5139_v26 = vcombine.low %v575_v14, %v579_v15  ;;  %v5146_v27 = vcombine.high %v582_v21, %v586_v22  ;;  %v5148_v28 = vcombine.high %v583_v23, %v587_v24  ;;  %v124_v11 = vld [vmem:[%s7435_s4 + $0x130] sm:$0xff]  ;;  %v125_v14 = vld [vmem:[%s7435_s4 + $0x138] sm:$0xff] }
  0xe0   :  { %v4677_v15 = vcombine.low %v112_v3, %v116_v4 }
  0xe2   :  { %3384 = vmatpush1.bf16.msra.mxu0 %v5089_v35  ;;  %3556 = vmatpush1.bf16.msra.mxu1 %v5091_v36  ;;  %v595_v35 = vld [vmem:[%s7435_s4 + $0xfe8] sm:$0xff]  ;;  %v5145_v36 = vcombine.low %v582_v21, %v586_v22  ;;  %v132_v21 = vld [vmem:[%s7435_s4 + $0x170] sm:$0xff]  ;;  %v129_v22 = vld [vmem:[%s7435_s4 + $0x158] sm:$0xff] }
  0xe3   :  { %3385 = vmatprep.subr.bf16.mxu0 %v5098_v37  ;;  %3557 = vmatprep.subr.bf16.mxu1 %v5100_v62  ;;  %v5147_v37 = vcombine.low %v583_v23, %v587_v24  ;;  %v5154_v62 = vcombine.high %v590_v32, %v594_v33  ;;  %v5156_v63 = vcombine.high %v591_v34, %v595_v35  ;;  %v133_v23 = vld [vmem:[%s7435_s4 + $0x178] sm:$0xff] }
  0xe4   :  { %v4685_v24 = vcombine.low %v120_v10, %v124_v11 }
  0xe6   :  { %3386 = vmatpush1.bf16.msra.mxu0 %v5097_v45  ;;  %3558 = vmatpush1.bf16.msra.mxu1 %v5099_v46  ;;  %v93_v45 = vld [vmem:[%s7435_s4 + $0x38] sm:$0xff]  ;;  %v5153_v46 = vcombine.low %v590_v32, %v594_v33  ;;  %v140_v32 = vld [vmem:[%s7435_s4 + $0x1b0] sm:$0xff] }
  0xe7   :  { %3387 = vmatprep.subr.bf16.mxu0 %v5106_v12  ;;  %3559 = vmatprep.subr.bf16.mxu1 %v5108_v13  ;;  %v5155_v12 = vcombine.low %v591_v34, %v595_v35  ;;  %v4654_v13 = vcombine.high %v88_v42, %v92_v43  ;;  %v4656_v48 = vcombine.high %v89_v44, %v93_v45  ;;  %v137_v33 = vld [vmem:[%s7435_s4 + $0x198] sm:$0xff] }
  0xe8   :  { %v141_v34 = vld [vmem:[%s7435_s4 + $0x1b8] sm:$0xff] }
  0xea   :  { %3388 = vmatpush1.bf16.msra.mxu0 %v5105_v52  ;;  %3560 = vmatpush1.bf16.msra.mxu1 %v5107_v53  ;;  %v97_v52 = vld [vmem:[%s7435_s4 + $0x58] sm:$0xff] }
  0xeb   :  { %3389 = vmatprep.subr.bf16.mxu0 %v5114_v54  ;;  %3561 = vmatprep.subr.bf16.mxu1 %v5116_v55  ;;  %v101_v53 = vld [vmem:[%s7435_s4 + $0x78] sm:$0xff]  ;;  %v4653_v54 = vcombine.low %v88_v42, %v92_v43  ;;  %v4655_v55 = vcombine.low %v89_v44, %v93_v45  ;;  %v148_v42 = vld [vmem:[%s7435_s4 + $0x1f0] sm:$0xff] }
  0xec   :  { %v4664_v57 = vcombine.high %v97_v52, %v101_v53  ;;  %v145_v43 = vld [vmem:[%s7435_s4 + $0x1d8] sm:$0xff] }
  0xed   :  { %v149_v44 = vld [vmem:[%s7435_s4 + $0x1f8] sm:$0xff] }
  0xee   :  { %3390 = vmatpush1.bf16.msra.mxu0 %v5113_v60  ;;  %3562 = vmatpush1.bf16.msra.mxu1 %v5115_v61  ;;  %v4661_v60 = vcombine.low %v96_v49, %v100_v50  ;;  %v4663_v61 = vcombine.low %v97_v52, %v101_v53  ;;  %v156_v49 = vld [vmem:[%s7435_s4 + $0x230] sm:$0xff]  ;;  %v153_v50 = vld [vmem:[%s7435_s4 + $0x218] sm:$0xff] }
  0xef   :  { %3391 = vmatprep.subr.bf16.mxu0 %v5122_v1  ;;  %3563 = vmatprep.subr.bf16.mxu1 %v5124_v2  ;;  %v4670_v1 = vcombine.high %v104_v29, %v108_v30  ;;  %v4672_v2 = vcombine.high %v105_v58, %v109_v59  ;;  %v157_v52 = vld [vmem:[%s7435_s4 + $0x238] sm:$0xff] }
  0xf2   :  { %3392 = vmatpush1.bf16.msra.mxu0 %v5121_v38  ;;  %3564 = vmatpush1.bf16.msra.mxu1 %v5123_v39  ;;  %v4669_v38 = vcombine.low %v104_v29, %v108_v30  ;;  %v4671_v39 = vcombine.low %v105_v58, %v109_v59  ;;  %v164_v29 = vld [vmem:[%s7435_s4 + $0x270] sm:$0xff]  ;;  %v161_v30 = vld [vmem:[%s7435_s4 + $0x258] sm:$0xff] }
  0xf3   :  { %3393 = vmatprep.subr.bf16.mxu0 %v5130_v8  ;;  %3565 = vmatprep.subr.bf16.mxu1 %v5132_v9  ;;  %v4678_v8 = vcombine.high %v112_v3, %v116_v4  ;;  %v4680_v9 = vcombine.high %v113_v5, %v117_v6  ;;  %v165_v58 = vld [vmem:[%s7435_s4 + $0x278] sm:$0xff]  ;;  %v172_v3 = vld [vmem:[%s7435_s4 + $0x2b0] sm:$0xff] }
  0xf4   :  { %v169_v4 = vld [vmem:[%s7435_s4 + $0x298] sm:$0xff] }
  0xf6   :  { %3394 = vmatpush1.bf16.msra.mxu0 %v5129_v16  ;;  %3566 = vmatpush1.bf16.msra.mxu1 %v5131_v18  ;;  %v4679_v16 = vcombine.low %v113_v5, %v117_v6  ;;  %v4686_v18 = vcombine.high %v120_v10, %v124_v11  ;;  %v173_v5 = vld [vmem:[%s7435_s4 + $0x2b8] sm:$0xff]  ;;  %v180_v10 = vld [vmem:[%s7435_s4 + $0x2f0] sm:$0xff] }
  0xf7   :  { %3395 = vmatprep.subr.bf16.mxu0 %v5138_v19  ;;  %3567 = vmatprep.subr.bf16.mxu1 %v5140_v20  ;;  %v128_v20 = vld [vmem:[%s7435_s4 + $0x150] sm:$0xff]  ;;  %v177_v11 = vld [vmem:[%s7435_s4 + $0x2d8] sm:$0xff] }
  0xf8   :  { %v4693_v35 = vcombine.low %v128_v20, %v132_v21 }
  0xfa   :  { %3396 = vmatpush1.bf16.msra.mxu0 %v5137_v25  ;;  %3568 = vmatpush1.bf16.msra.mxu1 %v5139_v26  ;;  %v4694_v26 = vcombine.high %v128_v20, %v132_v21  ;;  %v188_v20 = vld [vmem:[%s7435_s4 + $0x330] sm:$0xff]  ;;  %v185_v21 = vld [vmem:[%s7435_s4 + $0x318] sm:$0xff] }
  0xfb   :  { %3397 = vmatprep.subr.bf16.mxu0 %v5146_v27  ;;  %3569 = vmatprep.subr.bf16.mxu1 %v5148_v28  ;;  %v4696_v27 = vcombine.high %v129_v22, %v133_v23  ;;  %v136_v28 = vld [vmem:[%s7435_s4 + $0x190] sm:$0xff] }
  0xfc   :  { %v4701_v45 = vcombine.low %v136_v28, %v140_v32 }
  0xfe   :  { %3398 = vmatpush1.bf16.msra.mxu0 %v5145_v36  ;;  %3570 = vmatpush1.bf16.msra.mxu1 %v5147_v37  ;;  %v4695_v36 = vcombine.low %v129_v22, %v133_v23  ;;  %v4702_v37 = vcombine.high %v136_v28, %v140_v32  ;;  %v189_v22 = vld [vmem:[%s7435_s4 + $0x338] sm:$0xff]  ;;  %v196_v28 = vld [vmem:[%s7435_s4 + $0x370] sm:$0xff] }
  0xff   :  { %3399 = vmatprep.subr.bf16.mxu0 %v5154_v62  ;;  %3571 = vmatprep.subr.bf16.mxu1 %v5156_v63  ;;  %v4704_v62 = vcombine.high %v137_v33, %v141_v34  ;;  %v144_v63 = vld [vmem:[%s7435_s4 + $0x1d0] sm:$0xff]  ;;  %v193_v32 = vld [vmem:[%s7435_s4 + $0x358] sm:$0xff] }
 0x100   :  { %v4709_v53 = vcombine.low %v144_v63, %v148_v42 }
 0x102   :  { %3400 = vmatpush1.bf16.msra.mxu0 %v5153_v46  ;;  %3572 = vmatpush1.bf16.msra.mxu1 %v5155_v12  ;;  %v4703_v46 = vcombine.low %v137_v33, %v141_v34  ;;  %v4710_v12 = vcombine.high %v144_v63, %v148_v42  ;;  %v197_v33 = vld [vmem:[%s7435_s4 + $0x378] sm:$0xff]  ;;  %v204_v63 = vld [vmem:[%s7435_s4 + $0x3b0] sm:$0xff] }
 0x103   :  { %3584 = vmatprep.subr.bf16.mxu0 %v4654_v13  ;;  %3756 = vmatprep.subr.bf16.mxu1 %v4656_v48  ;;  %v4712_v13 = vcombine.high %v145_v43, %v149_v44  ;;  %v152_v48 = vld [vmem:[%s7435_s4 + $0x210] sm:$0xff]  ;;  %v201_v42 = vld [vmem:[%s7435_s4 + $0x398] sm:$0xff] }
 0x104   :  { %v4717_v59 = vcombine.low %v152_v48, %v156_v49 }
 0x105   :  { %3402 = vmatmul.mubr.bf16.vlgmr.msra.gmra.mrb[0].mxu0 %v6429_v51  ;;  %3574 = vmatmul.mubr.bf16.vlgmr.msra.gmra.mrb[0].mxu1 %v6429_v51 }
 0x106   :  { %3585 = vmatpush1.bf16.msra.mxu0 %v4653_v54  ;;  %3757 = vmatpush1.bf16.msra.mxu1 %v4655_v55  ;;  %v4711_v54 = vcombine.low %v145_v43, %v149_v44  ;;  %v4718_v55 = vcombine.high %v152_v48, %v156_v49  ;;  %v205_v43 = vld [vmem:[%s7435_s4 + $0x3b8] sm:$0xff]  ;;  %v212_v48 = vld [vmem:[%s7435_s4 + $0x3f0] sm:$0xff] }
 0x107   :  { %3586 = vmatprep.subr.bf16.mxu0 %v4662_v56  ;;  %3758 = vmatprep.subr.bf16.mxu1 %v4664_v57  ;;  %v4720_v56 = vcombine.high %v153_v50, %v157_v52  ;;  %v160_v57 = vld [vmem:[%s7435_s4 + $0x250] sm:$0xff]  ;;  %v209_v49 = vld [vmem:[%s7435_s4 + $0x3d8] sm:$0xff] }
 0x108   :  { %3616 = vmatprep.mubr.bf16.mxu0 %v5625_v17  ;;  %3788 = vmatprep.mubr.bf16.mxu1 %v5625_v17  ;;  %v121_v17 = vld [vmem:[%s7435_s4 + $0x118] sm:$0xff]  ;;  %v4725_v6 = vcombine.low %v160_v57, %v164_v29 }
 0x109   :  { %v4688_v19 = vcombine.high %v121_v17, %v125_v14  ;;  %v4687_v25 = vcombine.low %v121_v17, %v125_v14  ;;  %v181_v17 = vld [vmem:[%s7435_s4 + $0x2f8] sm:$0xff] }
 0x10a   :  { %3587 = vmatpush1.bf16.msra.mxu0 %v4661_v60  ;;  %3759 = vmatpush1.bf16.msra.mxu1 %v4663_v61  ;;  %v4719_v60 = vcombine.low %v153_v50, %v157_v52  ;;  %v4726_v61 = vcombine.high %v160_v57, %v164_v29  ;;  %v213_v50 = vld [vmem:[%s7435_s4 + $0x3f8] sm:$0xff]  ;;  %v220_v57 = vld [vmem:[%s7435_s4 + $0x430] sm:$0xff] }
 0x10b   :  { %3588 = vmatprep.subr.bf16.mxu0 %v4670_v1  ;;  %3760 = vmatprep.subr.bf16.mxu1 %v4672_v2  ;;  %v4728_v1 = vcombine.high %v161_v30, %v165_v58  ;;  %v168_v2 = vld [vmem:[%s7435_s4 + $0x290] sm:$0xff]  ;;  %v217_v29 = vld [vmem:[%s7435_s4 + $0x418] sm:$0xff] }
 0x10c   :  { %v4733_v14 = vcombine.low %v168_v2, %v172_v3 }
 0x10e   :  { %3589 = vmatpush1.bf16.msra.mxu0 %v4669_v38  ;;  %3761 = vmatpush1.bf16.msra.mxu1 %v4671_v39  ;;  %v4727_v38 = vcombine.low %v161_v30, %v165_v58  ;;  %v4734_v39 = vcombine.high %v168_v2, %v172_v3  ;;  %v221_v30 = vld [vmem:[%s7435_s4 + $0x438] sm:$0xff]  ;;  %v228_v2 = vld [vmem:[%s7435_s4 + $0x470] sm:$0xff] }
 0x10f   :  { %3590 = vmatprep.subr.bf16.mxu0 %v4678_v8  ;;  %3762 = vmatprep.subr.bf16.mxu1 %v4680_v9  ;;  %v4736_v8 = vcombine.high %v169_v4, %v173_v5  ;;  %v176_v9 = vld [vmem:[%s7435_s4 + $0x2d0] sm:$0xff]  ;;  %v225_v3 = vld [vmem:[%s7435_s4 + $0x458] sm:$0xff] }
 0x110   :  { %v4741_v23 = vcombine.low %v176_v9, %v180_v10 }
 0x112   :  { %3591 = vmatpush1.bf16.msra.mxu0 %v4677_v15  ;;  %3763 = vmatpush1.bf16.msra.mxu1 %v4679_v16  ;;  %v4735_v15 = vcombine.low %v169_v4, %v173_v5  ;;  %v4742_v16 = vcombine.high %v176_v9, %v180_v10  ;;  %v229_v4 = vld [vmem:[%s7435_s4 + $0x478] sm:$0xff]  ;;  %v236_v9 = vld [vmem:[%s7435_s4 + $0x4b0] sm:$0xff] }
 0x113   :  { %3592 = vmatprep.subr.bf16.mxu0 %v4686_v18  ;;  %3764 = vmatprep.subr.bf16.mxu1 %v4688_v19  ;;  %v4744_v18 = vcombine.high %v177_v11, %v181_v17  ;;  %v184_v19 = vld [vmem:[%s7435_s4 + $0x310] sm:$0xff]  ;;  %v233_v10 = vld [vmem:[%s7435_s4 + $0x498] sm:$0xff] }
 0x114   :  { %v4749_v34 = vcombine.low %v184_v19, %v188_v20 }
 0x116   :  { %3593 = vmatpush1.bf16.msra.mxu0 %v4685_v24  ;;  %3765 = vmatpush1.bf16.msra.mxu1 %v4687_v25  ;;  %v4743_v24 = vcombine.low %v177_v11, %v181_v17  ;;  %v4750_v25 = vcombine.high %v184_v19, %v188_v20  ;;  %v237_v11 = vld [vmem:[%s7435_s4 + $0x4b8] sm:$0xff]  ;;  %v244_v19 = vld [vmem:[%s7435_s4 + $0x4f0] sm:$0xff] }
 0x117   :  { %3594 = vmatprep.subr.bf16.mxu0 %v4694_v26  ;;  %3766 = vmatprep.subr.bf16.mxu1 %v4696_v27  ;;  %v4752_v26 = vcombine.high %v185_v21, %v189_v22  ;;  %v192_v27 = vld [vmem:[%s7435_s4 + $0x350] sm:$0xff]  ;;  %v245_v20 = vld [vmem:[%s7435_s4 + $0x4f8] sm:$0xff] }
 0x118   :  { %v4757_v44 = vcombine.low %v192_v27, %v196_v28 }
 0x11a   :  { %3595 = vmatpush1.bf16.msra.mxu0 %v4693_v35  ;;  %3767 = vmatpush1.bf16.msra.mxu1 %v4695_v36  ;;  %v4751_v35 = vcombine.low %v185_v21, %v189_v22  ;;  %v4758_v36 = vcombine.high %v192_v27, %v196_v28  ;;  %v4799_v22 = vcombine.low %v233_v10, %v237_v11  ;;  %v253_v27 = vld [vmem:[%s7435_s4 + $0x538] sm:$0xff] }
 0x11b   :  { %3596 = vmatprep.subr.bf16.mxu0 %v4702_v37  ;;  %3768 = vmatprep.subr.bf16.mxu1 %v4704_v62  ;;  %v4760_v37 = vcombine.high %v193_v32, %v197_v33  ;;  %v200_v62 = vld [vmem:[%s7435_s4 + $0x390] sm:$0xff] }
 0x11c   :  { %v4765_v52 = vcombine.low %v200_v62, %v204_v63 }
 0x11e   :  { %3597 = vmatpush1.bf16.msra.mxu0 %v4701_v45  ;;  %3769 = vmatpush1.bf16.msra.mxu1 %v4703_v46  ;;  %v4759_v45 = vcombine.low %v193_v32, %v197_v33  ;;  %v4766_v46 = vcombine.high %v200_v62, %v204_v63  ;;  %v261_v62 = vld [vmem:[%s7435_s4 + $0x578] sm:$0xff] }
 0x11f   :  { %3598 = vmatprep.subr.bf16.mxu0 %v4710_v12  ;;  %3770 = vmatprep.subr.bf16.mxu1 %v4712_v13  ;;  %v4768_v12 = vcombine.high %v201_v42, %v205_v43  ;;  %v208_v13 = vld [vmem:[%s7435_s4 + $0x3d0] sm:$0xff] }
 0x120   :  { %v4773_v58 = vcombine.low %v208_v13, %v212_v48 }
 0x122   :  { %3599 = vmatpush1.bf16.msra.mxu0 %v4709_v53  ;;  %3771 = vmatpush1.bf16.msra.mxu1 %v4711_v54  ;;  %v4767_v53 = vcombine.low %v201_v42, %v205_v43  ;;  %v4774_v54 = vcombine.high %v208_v13, %v212_v48  ;;  %v269_v13 = vld [vmem:[%s7435_s4 + $0x5b8] sm:$0xff] }
 0x123   :  { %3600 = vmatprep.subr.bf16.mxu0 %v4718_v55  ;;  %3772 = vmatprep.subr.bf16.mxu1 %v4720_v56  ;;  %v4776_v55 = vcombine.high %v209_v49, %v213_v50  ;;  %v216_v56 = vld [vmem:[%s7435_s4 + $0x410] sm:$0xff] }
 0x124   :  { %v4781_v5 = vcombine.low %v216_v56, %v220_v57 }
 0x126   :  { %3601 = vmatpush1.bf16.msra.mxu0 %v4717_v59  ;;  %3773 = vmatpush1.bf16.msra.mxu1 %v4719_v60  ;;  %v4775_v59 = vcombine.low %v209_v49, %v213_v50  ;;  %v4782_v60 = vcombine.high %v216_v56, %v220_v57  ;;  %v277_v56 = vld [vmem:[%s7435_s4 + $0x5f8] sm:$0xff] }
 0x127   :  { %3602 = vmatprep.subr.bf16.mxu0 %v4726_v61  ;;  %3774 = vmatprep.subr.bf16.mxu1 %v4728_v1  ;;  %v4784_v61 = vcombine.high %v217_v29, %v221_v30  ;;  %v224_v1 = vld [vmem:[%s7435_s4 + $0x450] sm:$0xff] }
 0x128   :  { %v4789_v17 = vcombine.low %v224_v1, %v228_v2 }
 0x12a   :  { %3603 = vmatpush1.bf16.msra.mxu0 %v4725_v6  ;;  %3775 = vmatpush1.bf16.msra.mxu1 %v4727_v38  ;;  %v4783_v6 = vcombine.low %v217_v29, %v221_v30  ;;  %v4790_v38 = vcombine.high %v224_v1, %v228_v2  ;;  %v285_v1 = vld [vmem:[%s7435_s4 + $0x638] sm:$0xff] }
 0x12b   :  { %3604 = vmatprep.subr.bf16.mxu0 %v4734_v39  ;;  %3776 = vmatprep.subr.bf16.mxu1 %v4736_v8  ;;  %v4792_v39 = vcombine.high %v225_v3, %v229_v4  ;;  %v232_v8 = vld [vmem:[%s7435_s4 + $0x490] sm:$0xff] }
 0x12c   :  { %v4797_v21 = vcombine.low %v232_v8, %v236_v9 }
 0x12e   :  { %3605 = vmatpush1.bf16.msra.mxu0 %v4733_v14  ;;  %3777 = vmatpush1.bf16.msra.mxu1 %v4735_v15  ;;  %v4791_v14 = vcombine.low %v225_v3, %v229_v4  ;;  %v4798_v15 = vcombine.high %v232_v8, %v236_v9  ;;  %v293_v8 = vld [vmem:[%s7435_s4 + $0x678] sm:$0xff] }
 0x12f   :  { %3606 = vmatprep.subr.bf16.mxu0 %v4742_v16  ;;  %3778 = vmatprep.subr.bf16.mxu1 %v4744_v18  ;;  %v4800_v16 = vcombine.high %v233_v10, %v237_v11  ;;  %v240_v18 = vld [vmem:[%s7435_s4 + $0x4d0] sm:$0xff] }
 0x130   :  { %v4805_v28 = vcombine.low %v240_v18, %v244_v19 }
 0x132   :  { %3607 = vmatpush1.bf16.msra.mxu0 %v4741_v23  ;;  %3779 = vmatpush1.bf16.msra.mxu1 %v4743_v24  ;;  %v4806_v23 = vcombine.high %v240_v18, %v244_v19  ;;  %v301_v18 = vld [vmem:[%s7435_s4 + $0x6b8] sm:$0xff] }
 0x133   :  { %3608 = vmatprep.subr.bf16.mxu0 %v4750_v25  ;;  %3780 = vmatprep.subr.bf16.mxu1 %v4752_v26  ;;  %v248_v25 = vld [vmem:[%s7435_s4 + $0x510] sm:$0xff] }
 0x134   :  { %v252_v26 = vld [vmem:[%s7435_s4 + $0x530] sm:$0xff] }
 0x135   :  { %v4814_v33 = vcombine.high %v248_v25, %v252_v26  ;;  %v4813_v63 = vcombine.low %v248_v25, %v252_v26  ;;  %v309_v25 = vld [vmem:[%s7435_s4 + $0x6f8] sm:$0xff] }
 0x136   :  { %3609 = vmatpush1.bf16.msra.mxu0 %v4749_v34  ;;  %3781 = vmatpush1.bf16.msra.mxu1 %v4751_v35  ;;  %v256_v35 = vld [vmem:[%s7435_s4 + $0x550] sm:$0xff] }
 0x137   :  { %3610 = vmatprep.subr.bf16.mxu0 %v4758_v36  ;;  %3782 = vmatprep.subr.bf16.mxu1 %v4760_v37  ;;  %v260_v36 = vld [vmem:[%s7435_s4 + $0x570] sm:$0xff]  ;;  %v257_v37 = vld [vmem:[%s7435_s4 + $0x558] sm:$0xff] }
 0x138   :  { %v4822_v43 = vcombine.high %v256_v35, %v260_v36  ;;  %v4821_v48 = vcombine.low %v256_v35, %v260_v36  ;;  %v4823_v49 = vcombine.low %v257_v37, %v261_v62  ;;  %v317_v35 = vld [vmem:[%s7435_s4 + $0x738] sm:$0xff] }
 0x13a   :  { %3611 = vmatpush1.bf16.msra.mxu0 %v4757_v44  ;;  %3783 = vmatpush1.bf16.msra.mxu1 %v4759_v45  ;;  %v4824_v44 = vcombine.high %v257_v37, %v261_v62  ;;  %v264_v45 = vld [vmem:[%s7435_s4 + $0x590] sm:$0xff] }
 0x13b   :  { %3612 = vmatprep.subr.bf16.mxu0 %v4766_v46  ;;  %3784 = vmatprep.subr.bf16.mxu1 %v4768_v12  ;;  %v268_v46 = vld [vmem:[%s7435_s4 + $0x5b0] sm:$0xff]  ;;  %v265_v12 = vld [vmem:[%s7435_s4 + $0x598] sm:$0xff] }
 0x13c   :  { %v4830_v50 = vcombine.high %v264_v45, %v268_v46  ;;  %v4829_v57 = vcombine.low %v264_v45, %v268_v46  ;;  %v4831_v29 = vcombine.low %v265_v12, %v269_v13  ;;  %v325_v45 = vld [vmem:[%s7435_s4 + $0x778] sm:$0xff] }
 0x13e   :  { %3613 = vmatpush1.bf16.msra.mxu0 %v4765_v52  ;;  %3785 = vmatpush1.bf16.msra.mxu1 %v4767_v53  ;;  %v4832_v52 = vcombine.high %v265_v12, %v269_v13  ;;  %v272_v53 = vld [vmem:[%s7435_s4 + $0x5d0] sm:$0xff] }
 0x13f   :  { %3614 = vmatprep.subr.bf16.mxu0 %v4774_v54  ;;  %3786 = vmatprep.subr.bf16.mxu1 %v4776_v55  ;;  %v276_v54 = vld [vmem:[%s7435_s4 + $0x5f0] sm:$0xff]  ;;  %v273_v55 = vld [vmem:[%s7435_s4 + $0x5d8] sm:$0xff] }
 0x140   :  { %v4838_v30 = vcombine.high %v272_v53, %v276_v54  ;;  %v4837_v2 = vcombine.low %v272_v53, %v276_v54  ;;  %v4839_v3 = vcombine.low %v273_v55, %v277_v56  ;;  %v333_v53 = vld [vmem:[%s7435_s4 + $0x7b8] sm:$0xff] }
 0x142   :  { %3615 = vmatpush1.bf16.msra.mxu0 %v4773_v58  ;;  %3787 = vmatpush1.bf16.msra.mxu1 %v4775_v59  ;;  %v4840_v58 = vcombine.high %v273_v55, %v277_v56  ;;  %v280_v59 = vld [vmem:[%s7435_s4 + $0x610] sm:$0xff] }
 0x143   :  { %3627 = vmatprep.subr.bf16.mxu0 %v4782_v60  ;;  %3799 = vmatprep.subr.bf16.mxu1 %v4784_v61  ;;  %v284_v60 = vld [vmem:[%s7435_s4 + $0x630] sm:$0xff]  ;;  %v281_v61 = vld [vmem:[%s7435_s4 + $0x618] sm:$0xff] }
 0x144   :  { %v4846_v4 = vcombine.high %v280_v59, %v284_v60  ;;  %v4845_v9 = vcombine.low %v280_v59, %v284_v60  ;;  %v4847_v10 = vcombine.low %v281_v61, %v285_v1  ;;  %v341_v59 = vld [vmem:[%s7435_s4 + $0x7f8] sm:$0xff] }
 0x145   :  { %3617 = vmatmul.mubr.bf16.vlgmr.msra.gmra.mrb[4].mxu0 %v5761_v40  ;;  %3789 = vmatmul.mubr.bf16.vlgmr.msra.gmra.mrb[4].mxu1 %v5761_v40  ;;  %v241_v40 = vld [vmem:[%s7435_s4 + $0x4d8] sm:$0xff] }
 0x146   :  { %3628 = vmatpush1.bf16.msra.mxu0 %v4781_v5  ;;  %3800 = vmatpush1.bf16.msra.mxu1 %v4783_v6  ;;  %v4808_v24 = vcombine.high %v241_v40, %v245_v20  ;;  %v4807_v32 = vcombine.low %v241_v40, %v245_v20  ;;  %v4848_v5 = vcombine.high %v281_v61, %v285_v1  ;;  %v288_v6 = vld [vmem:[%s7435_s4 + $0x650] sm:$0xff] }
 0x147   :  { %3629 = vmatprep.subr.bf16.mxu0 %v4790_v38  ;;  %3801 = vmatprep.subr.bf16.mxu1 %v4792_v39  ;;  %v292_v38 = vld [vmem:[%s7435_s4 + $0x670] sm:$0xff]  ;;  %v289_v39 = vld [vmem:[%s7435_s4 + $0x658] sm:$0xff] }
 0x148   :  { %3659 = vmatprep.mubr.bf16.mxu0 %v5777_v47  ;;  %3831 = vmatprep.mubr.bf16.mxu1 %v5777_v47  ;;  %v249_v47 = vld [vmem:[%s7435_s4 + $0x518] sm:$0xff]  ;;  %v4854_v11 = vcombine.high %v288_v6, %v292_v38  ;;  %v4853_v19 = vcombine.low %v288_v6, %v292_v38  ;;  %v4855_v40 = vcombine.low %v289_v39, %v293_v8 }
 0x149   :  { %v4816_v34 = vcombine.high %v249_v47, %v253_v27  ;;  %v4815_v42 = vcombine.low %v249_v47, %v253_v27  ;;  %v349_v6 = vld [vmem:[%s7435_s4 + $0x838] sm:$0xff] }
 0x14a   :  { %3630 = vmatpush1.bf16.msra.mxu0 %v4789_v17  ;;  %3802 = vmatpush1.bf16.msra.mxu1 %v4791_v14  ;;  %v4856_v17 = vcombine.high %v289_v39, %v293_v8  ;;  %v296_v14 = vld [vmem:[%s7435_s4 + $0x690] sm:$0xff] }
 0x14b   :  { %3631 = vmatprep.subr.bf16.mxu0 %v4798_v15  ;;  %3803 = vmatprep.subr.bf16.mxu1 %v4800_v16  ;;  %v300_v15 = vld [vmem:[%s7435_s4 + $0x6b0] sm:$0xff]  ;;  %v297_v16 = vld [vmem:[%s7435_s4 + $0x698] sm:$0xff] }
 0x14c   :  { %v4862_v20 = vcombine.high %v296_v14, %v300_v15  ;;  %v4861_v26 = vcombine.low %v296_v14, %v300_v15  ;;  %v4863_v47 = vcombine.low %v297_v16, %v301_v18  ;;  %v357_v14 = vld [vmem:[%s7435_s4 + $0x878] sm:$0xff] }
 0x14e   :  { %3632 = vmatpush1.bf16.msra.mxu0 %v4797_v21  ;;  %3804 = vmatpush1.bf16.msra.mxu1 %v4799_v22  ;;  %v4864_v21 = vcombine.high %v297_v16, %v301_v18  ;;  %v304_v22 = vld [vmem:[%s7435_s4 + $0x6d0] sm:$0xff] }
 0x14f   :  { %3633 = vmatprep.subr.bf16.mxu0 %v4806_v23  ;;  %3805 = vmatprep.subr.bf16.mxu1 %v4808_v24  ;;  %v308_v23 = vld [vmem:[%s7435_s4 + $0x6f0] sm:$0xff]  ;;  %v305_v24 = vld [vmem:[%s7435_s4 + $0x6d8] sm:$0xff] }
 0x150   :  { %v4870_v27 = vcombine.high %v304_v22, %v308_v23  ;;  %v4869_v36 = vcombine.low %v304_v22, %v308_v23  ;;  %v4871_v37 = vcombine.low %v305_v24, %v309_v25  ;;  %v365_v22 = vld [vmem:[%s7435_s4 + $0x8b8] sm:$0xff] }
 0x152   :  { %3634 = vmatpush1.bf16.msra.mxu0 %v4805_v28  ;;  %3806 = vmatpush1.bf16.msra.mxu1 %v4807_v32  ;;  %v4872_v28 = vcombine.high %v305_v24, %v309_v25  ;;  %v312_v32 = vld [vmem:[%s7435_s4 + $0x710] sm:$0xff] }
 0x153   :  { %3635 = vmatprep.subr.bf16.mxu0 %v4814_v33  ;;  %3807 = vmatprep.subr.bf16.mxu1 %v4816_v34  ;;  %v316_v33 = vld [vmem:[%s7435_s4 + $0x730] sm:$0xff]  ;;  %v313_v34 = vld [vmem:[%s7435_s4 + $0x718] sm:$0xff] }
 0x154   :  { %v4878_v62 = vcombine.high %v312_v32, %v316_v33  ;;  %v4877_v46 = vcombine.low %v312_v32, %v316_v33  ;;  %v4879_v12 = vcombine.low %v313_v34, %v317_v35  ;;  %v368_v24 = vld [vmem:[%s7435_s4 + $0x8d0] sm:$0xff] }
 0x155   :  { %v376_v33 = vld [vmem:[%s7435_s4 + $0x910] sm:$0xff] }
 0x156   :  { %3636 = vmatpush1.bf16.msra.mxu0 %v4813_v63  ;;  %3808 = vmatpush1.bf16.msra.mxu1 %v4815_v42  ;;  %v4880_v63 = vcombine.high %v313_v34, %v317_v35  ;;  %v320_v42 = vld [vmem:[%s7435_s4 + $0x750] sm:$0xff] }
 0x157   :  { %3637 = vmatprep.subr.bf16.mxu0 %v4822_v43  ;;  %3809 = vmatprep.subr.bf16.mxu1 %v4824_v44  ;;  %v324_v43 = vld [vmem:[%s7435_s4 + $0x770] sm:$0xff]  ;;  %v321_v44 = vld [vmem:[%s7435_s4 + $0x758] sm:$0xff] }
 0x158   :  { %v4886_v13 = vcombine.high %v320_v42, %v324_v43  ;;  %v4885_v54 = vcombine.low %v320_v42, %v324_v43  ;;  %v4887_v55 = vcombine.low %v321_v44, %v325_v45  ;;  %v384_v42 = vld [vmem:[%s7435_s4 + $0x950] sm:$0xff] }
 0x15a   :  { %3638 = vmatpush1.bf16.msra.mxu0 %v4821_v48  ;;  %3810 = vmatpush1.bf16.msra.mxu1 %v4823_v49  ;;  %v4888_v48 = vcombine.high %v321_v44, %v325_v45  ;;  %v328_v49 = vld [vmem:[%s7435_s4 + $0x790] sm:$0xff] }
 0x15b   :  { %3639 = vmatprep.subr.bf16.mxu0 %v4830_v50  ;;  %3811 = vmatprep.subr.bf16.mxu1 %v4832_v52  ;;  %v332_v50 = vld [vmem:[%s7435_s4 + $0x7b0] sm:$0xff]  ;;  %v329_v52 = vld [vmem:[%s7435_s4 + $0x798] sm:$0xff] }
 0x15c   :  { %v4894_v56 = vcombine.high %v328_v49, %v332_v50  ;;  %v4893_v60 = vcombine.low %v328_v49, %v332_v50  ;;  %v4895_v61 = vcombine.low %v329_v52, %v333_v53  ;;  %v388_v45 = vld [vmem:[%s7435_s4 + $0x970] sm:$0xff] }
 0x15d   :  { %v392_v49 = vld [vmem:[%s7435_s4 + $0x990] sm:$0xff] }
 0x15e   :  { %3640 = vmatpush1.bf16.msra.mxu0 %v4829_v57  ;;  %3812 = vmatpush1.bf16.msra.mxu1 %v4831_v29  ;;  %v4896_v57 = vcombine.high %v329_v52, %v333_v53  ;;  %v336_v29 = vld [vmem:[%s7435_s4 + $0x7d0] sm:$0xff]  ;;  %v4950_v52 = vcombine.high %v384_v42, %v388_v45 }
 0x15f   :  { %3641 = vmatprep.subr.bf16.mxu0 %v4838_v30  ;;  %3813 = vmatprep.subr.bf16.mxu1 %v4840_v58  ;;  %v340_v30 = vld [vmem:[%s7435_s4 + $0x7f0] sm:$0xff]  ;;  %v337_v58 = vld [vmem:[%s7435_s4 + $0x7d8] sm:$0xff] }
 0x160   :  { %v4902_v1 = vcombine.high %v336_v29, %v340_v30  ;;  %v4901_v38 = vcombine.low %v336_v29, %v340_v30  ;;  %v4903_v39 = vcombine.low %v337_v58, %v341_v59  ;;  %v396_v53 = vld [vmem:[%s7435_s4 + $0x9b0] sm:$0xff] }
 0x161   :  { %v400_v29 = vld [vmem:[%s7435_s4 + $0x9d0] sm:$0xff] }
 0x162   :  { %3642 = vmatpush1.bf16.msra.mxu0 %v4837_v2  ;;  %3814 = vmatpush1.bf16.msra.mxu1 %v4839_v3  ;;  %v4904_v2 = vcombine.high %v337_v58, %v341_v59  ;;  %v344_v3 = vld [vmem:[%s7435_s4 + $0x810] sm:$0xff]  ;;  %v4958_v58 = vcombine.high %v392_v49, %v396_v53 }
 0x163   :  { %3643 = vmatprep.subr.bf16.mxu0 %v4846_v4  ;;  %3815 = vmatprep.subr.bf16.mxu1 %v4848_v5  ;;  %v348_v4 = vld [vmem:[%s7435_s4 + $0x830] sm:$0xff]  ;;  %v345_v5 = vld [vmem:[%s7435_s4 + $0x818] sm:$0xff] }
 0x164   :  { %v4910_v8 = vcombine.high %v344_v3, %v348_v4  ;;  %v4909_v15 = vcombine.low %v344_v3, %v348_v4  ;;  %v4911_v16 = vcombine.low %v345_v5, %v349_v6  ;;  %v404_v59 = vld [vmem:[%s7435_s4 + $0x9f0] sm:$0xff] }
 0x165   :  { %v408_v3 = vld [vmem:[%s7435_s4 + $0xa10] sm:$0xff] }
 0x166   :  { %3644 = vmatpush1.bf16.msra.mxu0 %v4845_v9  ;;  %3816 = vmatpush1.bf16.msra.mxu1 %v4847_v10  ;;  %v4912_v9 = vcombine.high %v345_v5, %v349_v6  ;;  %v352_v10 = vld [vmem:[%s7435_s4 + $0x850] sm:$0xff]  ;;  %v4966_v5 = vcombine.high %v400_v29, %v404_v59 }
 0x167   :  { %3645 = vmatprep.subr.bf16.mxu0 %v4854_v11  ;;  %3817 = vmatprep.subr.bf16.mxu1 %v4856_v17  ;;  %v356_v11 = vld [vmem:[%s7435_s4 + $0x870] sm:$0xff]  ;;  %v353_v17 = vld [vmem:[%s7435_s4 + $0x858] sm:$0xff] }
 0x168   :  { %v4918_v18 = vcombine.high %v352_v10, %v356_v11  ;;  %v4917_v23 = vcombine.low %v352_v10, %v356_v11  ;;  %v4919_v25 = vcombine.low %v353_v17, %v357_v14  ;;  %v412_v6 = vld [vmem:[%s7435_s4 + $0xa30] sm:$0xff] }
 0x169   :  { %v416_v10 = vld [vmem:[%s7435_s4 + $0xa50] sm:$0xff] }
 0x16a   :  { %3646 = vmatpush1.bf16.msra.mxu0 %v4853_v19  ;;  %3818 = vmatpush1.bf16.msra.mxu1 %v4855_v40  ;;  %v360_v19 = vld [vmem:[%s7435_s4 + $0x890] sm:$0xff] }
 0x16b   :  { %3647 = vmatprep.subr.bf16.mxu0 %v4862_v20  ;;  %3819 = vmatprep.subr.bf16.mxu1 %v4864_v21  ;;  %v364_v40 = vld [vmem:[%s7435_s4 + $0x8b0] sm:$0xff]  ;;  %v4920_v20 = vcombine.high %v353_v17, %v357_v14  ;;  %v361_v21 = vld [vmem:[%s7435_s4 + $0x898] sm:$0xff]  ;;  %v4974_v17 = vcombine.high %v408_v3, %v412_v6 }
 0x16c   :  { %v4925_v32 = vcombine.low %v360_v19, %v364_v40  ;;  %v4927_v34 = vcombine.low %v361_v21, %v365_v22  ;;  %v420_v14 = vld [vmem:[%s7435_s4 + $0xa70] sm:$0xff] }
 0x16e   :  { %3648 = vmatpush1.bf16.msra.mxu0 %v4861_v26  ;;  %3820 = vmatpush1.bf16.msra.mxu1 %v4863_v47  ;;  %v4926_v26 = vcombine.high %v360_v19, %v364_v40  ;;  %v372_v47 = vld [vmem:[%s7435_s4 + $0x8f0] sm:$0xff]  ;;  %v4973_v19 = vcombine.low %v408_v3, %v412_v6  ;;  %v465_v3 = vld [vmem:[%s7435_s4 + $0xbd8] sm:$0xff] }
 0x16f   :  { %3649 = vmatprep.subr.bf16.mxu0 %v4870_v27  ;;  %3821 = vmatprep.subr.bf16.mxu1 %v4872_v28  ;;  %v4928_v27 = vcombine.high %v361_v21, %v365_v22  ;;  %v369_v28 = vld [vmem:[%s7435_s4 + $0x8d8] sm:$0xff]  ;;  %v4934_v35 = vcombine.high %v368_v24, %v372_v47  ;;  %v424_v40 = vld [vmem:[%s7435_s4 + $0xa90] sm:$0xff]  ;;  %v4982_v22 = vcombine.high %v416_v10, %v420_v14 }
 0x170   :  { %v472_v6 = vld [vmem:[%s7435_s4 + $0xc10] sm:$0xff] }
 0x172   :  { %3650 = vmatpush1.bf16.msra.mxu0 %v4869_v36  ;;  %3822 = vmatpush1.bf16.msra.mxu1 %v4871_v37  ;;  %v380_v36 = vld [vmem:[%s7435_s4 + $0x930] sm:$0xff] }
 0x173   :  { %3651 = vmatprep.subr.bf16.mxu0 %v4878_v62  ;;  %3823 = vmatprep.subr.bf16.mxu1 %v4880_v63  ;;  %v381_v62 = vld [vmem:[%s7435_s4 + $0x938] sm:$0xff]  ;;  %v4933_v63 = vcombine.low %v368_v24, %v372_v47  ;;  %v4942_v44 = vcombine.high %v376_v33, %v380_v36  ;;  %v432_v47 = vld [vmem:[%s7435_s4 + $0xad0] sm:$0xff] }
 0x174   :  { %v429_v24 = vld [vmem:[%s7435_s4 + $0xab8] sm:$0xff] }
 0x176   :  { %3652 = vmatpush1.bf16.msra.mxu0 %v4877_v46  ;;  %3824 = vmatpush1.bf16.msra.mxu1 %v4879_v12  ;;  %v385_v12 = vld [vmem:[%s7435_s4 + $0x958] sm:$0xff] }
 0x177   :  { %3653 = vmatprep.subr.bf16.mxu0 %v4886_v13  ;;  %3825 = vmatprep.subr.bf16.mxu1 %v4888_v48  ;;  %v389_v13 = vld [vmem:[%s7435_s4 + $0x978] sm:$0xff]  ;;  %v4941_v48 = vcombine.low %v376_v33, %v380_v36  ;;  %v440_v36 = vld [vmem:[%s7435_s4 + $0xb10] sm:$0xff] }
 0x178   :  { %v4951_v30 = vcombine.low %v385_v12, %v389_v13  ;;  %v433_v33 = vld [vmem:[%s7435_s4 + $0xad8] sm:$0xff] }
 0x17a   :  { %3654 = vmatpush1.bf16.msra.mxu0 %v4885_v54  ;;  %3826 = vmatpush1.bf16.msra.mxu1 %v4887_v55  ;;  %v4952_v54 = vcombine.high %v385_v12, %v389_v13  ;;  %v393_v55 = vld [vmem:[%s7435_s4 + $0x998] sm:$0xff]  ;;  %v452_v13 = vld [vmem:[%s7435_s4 + $0xb70] sm:$0xff] }
 0x17b   :  { %3655 = vmatprep.subr.bf16.mxu0 %v4894_v56  ;;  %3827 = vmatprep.subr.bf16.mxu1 %v4896_v57  ;;  %v397_v56 = vld [vmem:[%s7435_s4 + $0x9b8] sm:$0xff]  ;;  %v4949_v57 = vcombine.low %v384_v42, %v388_v45  ;;  %v448_v45 = vld [vmem:[%s7435_s4 + $0xb50] sm:$0xff] }
 0x17c   :  { %v4959_v4 = vcombine.low %v393_v55, %v397_v56  ;;  %v441_v42 = vld [vmem:[%s7435_s4 + $0xb18] sm:$0xff] }
 0x17e   :  { %3656 = vmatpush1.bf16.msra.mxu0 %v4893_v60  ;;  %3828 = vmatpush1.bf16.msra.mxu1 %v4895_v61  ;;  %v4960_v60 = vcombine.high %v393_v55, %v397_v56  ;;  %v401_v61 = vld [vmem:[%s7435_s4 + $0x9d8] sm:$0xff]  ;;  %v5014_v55 = vcombine.high %v448_v45, %v452_v13  ;;  %v460_v56 = vld [vmem:[%s7435_s4 + $0xbb0] sm:$0xff] }
 0x17f   :  { %3657 = vmatprep.subr.bf16.mxu0 %v4902_v1  ;;  %3829 = vmatprep.subr.bf16.mxu1 %v4904_v2  ;;  %v405_v1 = vld [vmem:[%s7435_s4 + $0x9f8] sm:$0xff]  ;;  %v4957_v2 = vcombine.low %v392_v49, %v396_v53  ;;  %v456_v53 = vld [vmem:[%s7435_s4 + $0xb90] sm:$0xff] }
 0x180   :  { %v4967_v11 = vcombine.low %v401_v61, %v405_v1  ;;  %v449_v49 = vld [vmem:[%s7435_s4 + $0xb58] sm:$0xff] }
 0x182   :  { %3658 = vmatpush1.bf16.msra.mxu0 %v4901_v38  ;;  %3830 = vmatpush1.bf16.msra.mxu1 %v4903_v39  ;;  %v4968_v38 = vcombine.high %v401_v61, %v405_v1  ;;  %v409_v39 = vld [vmem:[%s7435_s4 + $0xa18] sm:$0xff]  ;;  %v5022_v61 = vcombine.high %v456_v53, %v460_v56  ;;  %v468_v1 = vld [vmem:[%s7435_s4 + $0xbf0] sm:$0xff] }
 0x183   :  { %3670 = vmatprep.subr.bf16.mxu0 %v4910_v8  ;;  %3842 = vmatprep.subr.bf16.mxu1 %v4912_v9  ;;  %v413_v8 = vld [vmem:[%s7435_s4 + $0xa38] sm:$0xff]  ;;  %v4965_v9 = vcombine.low %v400_v29, %v404_v59  ;;  %v464_v59 = vld [vmem:[%s7435_s4 + $0xbd0] sm:$0xff] }
 0x184   :  { %v4975_v21 = vcombine.low %v409_v39, %v413_v8  ;;  %v457_v29 = vld [vmem:[%s7435_s4 + $0xb98] sm:$0xff] }
 0x185   :  { %3660 = vmatmul.mubr.bf16.vlgmr.msra.gmra.mrb[4].mxu0 %v5993_v0  ;;  %3832 = vmatmul.mubr.bf16.vlgmr.msra.gmra.mrb[4].mxu1 %v5993_v0  ;;  %v373_v0 = vld [vmem:[%s7435_s4 + $0x8f8] sm:$0xff] }
 0x186   :  { %3671 = vmatpush1.bf16.msra.mxu0 %v4909_v15  ;;  %3843 = vmatpush1.bf16.msra.mxu1 %v4911_v16  ;;  %v4936_v37 = vcombine.high %v369_v28, %v373_v0  ;;  %v4935_v43 = vcombine.low %v369_v28, %v373_v0  ;;  %v4976_v15 = vcombine.high %v409_v39, %v413_v8  ;;  %v417_v16 = vld [vmem:[%s7435_s4 + $0xa58] sm:$0xff]  ;;  %v436_v0 = vld [vmem:[%s7435_s4 + $0xaf0] sm:$0xff] }
 0x187   :  { %3672 = vmatprep.subr.bf16.mxu0 %v4918_v18  ;;  %3844 = vmatprep.subr.bf16.mxu1 %v4920_v20  ;;  %v421_v18 = vld [vmem:[%s7435_s4 + $0xa78] sm:$0xff]  ;;  %v428_v20 = vld [vmem:[%s7435_s4 + $0xab0] sm:$0xff]  ;;  %v5030_v8 = vcombine.high %v464_v59, %v468_v1 }
 0x188   :  { %3702 = vmatprep.mubr.bf16.mxu0 %v6009_v7  ;;  %3874 = vmatprep.mubr.bf16.mxu1 %v6009_v7  ;;  %v377_v7 = vld [vmem:[%s7435_s4 + $0x918] sm:$0xff]  ;;  %v4990_v28 = vcombine.high %v424_v40, %v428_v20 }
 0x189   :  { %v4944_v46 = vcombine.high %v377_v7, %v381_v62  ;;  %v4943_v50 = vcombine.low %v377_v7, %v381_v62  ;;  %v4998_v7 = vcombine.high %v432_v47, %v436_v0  ;;  %v444_v62 = vld [vmem:[%s7435_s4 + $0xb30] sm:$0xff] }
 0x18a   :  { %3673 = vmatpush1.bf16.msra.mxu0 %v4917_v23  ;;  %3845 = vmatpush1.bf16.msra.mxu1 %v4919_v25  ;;  %v425_v23 = vld [vmem:[%s7435_s4 + $0xa98] sm:$0xff]  ;;  %v4984_v25 = vcombine.high %v417_v16, %v421_v18  ;;  %v5006_v12 = vcombine.high %v440_v36, %v444_v62 }
 0x18b   :  { %3674 = vmatprep.subr.bf16.mxu0 %v4926_v26  ;;  %3846 = vmatprep.subr.bf16.mxu1 %v4928_v27  ;;  %v4981_v26 = vcombine.low %v416_v10, %v420_v14  ;;  %v4983_v27 = vcombine.low %v417_v16, %v421_v18  ;;  %v477_v10 = vld [vmem:[%s7435_s4 + $0xc38] sm:$0xff]  ;;  %v480_v14 = vld [vmem:[%s7435_s4 + $0xc50] sm:$0xff] }
 0x18e   :  { %3675 = vmatpush1.bf16.msra.mxu0 %v4925_v32  ;;  %3847 = vmatpush1.bf16.msra.mxu1 %v4927_v34  ;;  %v4992_v32 = vcombine.high %v425_v23, %v429_v24  ;;  %v437_v34 = vld [vmem:[%s7435_s4 + $0xaf8] sm:$0xff] }
 0x18f   :  { %3676 = vmatprep.subr.bf16.mxu0 %v4934_v35  ;;  %3848 = vmatprep.subr.bf16.mxu1 %v4936_v37  ;;  %v4989_v35 = vcombine.low %v424_v40, %v428_v20  ;;  %v4991_v37 = vcombine.low %v425_v23, %v429_v24  ;;  %v481_v40 = vld [vmem:[%s7435_s4 + $0xc58] sm:$0xff] }
 0x190   :  { %v485_v20 = vld [vmem:[%s7435_s4 + $0xc78] sm:$0xff] }
 0x191   :  { %v5048_v24 = vcombine.high %v481_v40, %v485_v20 }
 0x192   :  { %3677 = vmatpush1.bf16.msra.mxu0 %v4933_v63  ;;  %3849 = vmatpush1.bf16.msra.mxu1 %v4935_v43  ;;  %v5000_v63 = vcombine.high %v433_v33, %v437_v34  ;;  %v445_v43 = vld [vmem:[%s7435_s4 + $0xb38] sm:$0xff] }
 0x193   :  { %3678 = vmatprep.subr.bf16.mxu0 %v4942_v44  ;;  %3850 = vmatprep.subr.bf16.mxu1 %v4944_v46  ;;  %v4997_v44 = vcombine.low %v432_v47, %v436_v0  ;;  %v4999_v46 = vcombine.low %v433_v33, %v437_v34  ;;  %v489_v47 = vld [vmem:[%s7435_s4 + $0xc98] sm:$0xff]  ;;  %v5047_v0 = vcombine.low %v481_v40, %v485_v20  ;;  %v496_v34 = vld [vmem:[%s7435_s4 + $0xcd0] sm:$0xff] }
 0x194   :  { %v529_v40 = vld [vmem:[%s7435_s4 + $0xdd8] sm:$0xff] }
 0x195   :  { %v533_v20 = vld [vmem:[%s7435_s4 + $0xdf8] sm:$0xff] }
 0x196   :  { %3679 = vmatpush1.bf16.msra.mxu0 %v4941_v48  ;;  %3851 = vmatpush1.bf16.msra.mxu1 %v4943_v50  ;;  %v5008_v48 = vcombine.high %v441_v42, %v445_v43  ;;  %v453_v50 = vld [vmem:[%s7435_s4 + $0xb78] sm:$0xff] }
 0x197   :  { %3680 = vmatprep.subr.bf16.mxu0 %v4950_v52  ;;  %3852 = vmatprep.subr.bf16.mxu1 %v4952_v54  ;;  %v5005_v52 = vcombine.low %v440_v36, %v444_v62  ;;  %v5007_v54 = vcombine.low %v441_v42, %v445_v43  ;;  %v501_v36 = vld [vmem:[%s7435_s4 + $0xcf8] sm:$0xff]  ;;  %v504_v43 = vld [vmem:[%s7435_s4 + $0xd10] sm:$0xff] }
 0x19a   :  { %3681 = vmatpush1.bf16.msra.mxu0 %v4949_v57  ;;  %3853 = vmatpush1.bf16.msra.mxu1 %v4951_v30  ;;  %v5016_v57 = vcombine.high %v449_v49, %v453_v50  ;;  %v461_v30 = vld [vmem:[%s7435_s4 + $0xbb8] sm:$0xff] }
 0x19b   :  { %3682 = vmatprep.subr.bf16.mxu0 %v4958_v58  ;;  %3854 = vmatprep.subr.bf16.mxu1 %v4960_v60  ;;  %v5013_v58 = vcombine.low %v448_v45, %v452_v13  ;;  %v5015_v60 = vcombine.low %v449_v49, %v453_v50  ;;  %v5023_v39 = vcombine.low %v457_v29, %v461_v30  ;;  %v509_v45 = vld [vmem:[%s7435_s4 + $0xd38] sm:$0xff]  ;;  %v512_v50 = vld [vmem:[%s7435_s4 + $0xd50] sm:$0xff] }
 0x19e   :  { %3683 = vmatpush1.bf16.msra.mxu0 %v4957_v2  ;;  %3855 = vmatpush1.bf16.msra.mxu1 %v4959_v4  ;;  %v5024_v2 = vcombine.high %v457_v29, %v461_v30  ;;  %v469_v4 = vld [vmem:[%s7435_s4 + $0xbf8] sm:$0xff] }
 0x19f   :  { %3684 = vmatprep.subr.bf16.mxu0 %v4966_v5  ;;  %3856 = vmatprep.subr.bf16.mxu1 %v4968_v38  ;;  %v5021_v5 = vcombine.low %v456_v53, %v460_v56  ;;  %v476_v38 = vld [vmem:[%s7435_s4 + $0xc30] sm:$0xff] }
 0x1a0   :  { %v5038_v16 = vcombine.high %v472_v6, %v476_v38 }
 0x1a2   :  { %3685 = vmatpush1.bf16.msra.mxu0 %v4965_v9  ;;  %3857 = vmatpush1.bf16.msra.mxu1 %v4967_v11  ;;  %v473_v9 = vld [vmem:[%s7435_s4 + $0xc18] sm:$0xff]  ;;  %v5032_v11 = vcombine.high %v465_v3, %v469_v4 }
 0x1a3   :  { %3686 = vmatprep.subr.bf16.mxu0 %v4974_v17  ;;  %3858 = vmatprep.subr.bf16.mxu1 %v4976_v15  ;;  %v5029_v17 = vcombine.low %v464_v59, %v468_v1  ;;  %v5031_v15 = vcombine.low %v465_v3, %v469_v4  ;;  %v5040_v18 = vcombine.high %v473_v9, %v477_v10  ;;  %v520_v1 = vld [vmem:[%s7435_s4 + $0xd90] sm:$0xff]  ;;  %v521_v4 = vld [vmem:[%s7435_s4 + $0xd98] sm:$0xff] }
 0x1a6   :  { %3687 = vmatpush1.bf16.msra.mxu0 %v4973_v19  ;;  %3859 = vmatpush1.bf16.msra.mxu1 %v4975_v21  ;;  %v484_v19 = vld [vmem:[%s7435_s4 + $0xc70] sm:$0xff]  ;;  %v5037_v21 = vcombine.low %v472_v6, %v476_v38 }
 0x1a7   :  { %3688 = vmatprep.subr.bf16.mxu0 %v4982_v22  ;;  %3860 = vmatprep.subr.bf16.mxu1 %v4984_v25  ;;  %v5039_v22 = vcombine.low %v473_v9, %v477_v10  ;;  %v5046_v23 = vcombine.high %v480_v14, %v484_v19  ;;  %v488_v25 = vld [vmem:[%s7435_s4 + $0xc90] sm:$0xff] }
 0x1aa   :  { %3689 = vmatpush1.bf16.msra.mxu0 %v4981_v26  ;;  %3861 = vmatpush1.bf16.msra.mxu1 %v4983_v27  ;;  %v492_v26 = vld [vmem:[%s7435_s4 + $0xcb0] sm:$0xff]  ;;  %v493_v27 = vld [vmem:[%s7435_s4 + $0xcb8] sm:$0xff] }
 0x1ab   :  { %3690 = vmatprep.subr.bf16.mxu0 %v4990_v28  ;;  %3862 = vmatprep.subr.bf16.mxu1 %v4992_v32  ;;  %v5045_v28 = vcombine.low %v480_v14, %v484_v19  ;;  %v5054_v32 = vcombine.high %v488_v25, %v492_v26  ;;  %v5056_v33 = vcombine.high %v489_v47, %v493_v27  ;;  %v528_v14 = vld [vmem:[%s7435_s4 + $0xdd0] sm:$0xff] }
 0x1ac   :  { %v5055_v62 = vcombine.low %v489_v47, %v493_v27 }
 0x1ae   :  { %3691 = vmatpush1.bf16.msra.mxu0 %v4989_v35  ;;  %3863 = vmatpush1.bf16.msra.mxu1 %v4991_v37  ;;  %v500_v35 = vld [vmem:[%s7435_s4 + $0xcf0] sm:$0xff]  ;;  %v600_v37 = vlaneseq }
 0x1af   :  { %3692 = vmatprep.subr.bf16.mxu0 %v4998_v7  ;;  %3864 = vmatprep.subr.bf16.mxu1 %v5000_v63  ;;  %v5053_v7 = vcombine.low %v488_v25, %v492_v26  ;;  %v5062_v63 = vcombine.high %v496_v34, %v500_v35 }
 0x1b2   :  { %3693 = vmatpush1.bf16.msra.mxu0 %v4997_v44  ;;  %3865 = vmatpush1.bf16.msra.mxu1 %v4999_v46  ;;  %v508_v44 = vld [vmem:[%s7435_s4 + $0xd30] sm:$0xff]  ;;  %v7065_v46 = vshrl.u32 %v600_v37, 7 }
 0x1b3   :  { %3694 = vmatprep.subr.bf16.mxu0 %v5006_v12  ;;  %3866 = vmatprep.subr.bf16.mxu1 %v5008_v48  ;;  %v5061_v12 = vcombine.low %v496_v34, %v500_v35  ;;  %v5070_v48 = vcombine.high %v504_v43, %v508_v44  ;;  %v5069_v56 = vcombine.low %v504_v43, %v508_v44  ;;  %v536_v37 = vld [vmem:[%s7435_s4 + $0xe10] sm:$0xff]  ;;  %v537_v44 = vld [vmem:[%s7435_s4 + $0xe18] sm:$0xff] }
 0x1b4   :  { %v602_v53 = vsub.s32 0, %v7065_v46  ;;  %v610_v29 = vsub.s32 2, %v7065_v46  ;;  %v606_v30 = vsub.s32 1, %v7065_v46  ;;  %v614_v59 = vsub.s32 3, %v7065_v46 }
 0x1b5   :  { %v5095_v43 = vcombine.low %v529_v40, %v533_v20 }
 0x1b6   :  { %3695 = vmatpush1.bf16.msra.mxu0 %v5005_v52  ;;  %3867 = vmatpush1.bf16.msra.mxu1 %v5007_v54  ;;  %v516_v52 = vld [vmem:[%s7435_s4 + $0xd70] sm:$0xff]  ;;  %v513_v54 = vld [vmem:[%s7435_s4 + $0xd58] sm:$0xff] }
 0x1b7   :  { %3696 = vmatprep.subr.bf16.mxu0 %v5014_v55  ;;  %3868 = vmatprep.subr.bf16.mxu1 %v5016_v57  ;;  %v517_v55 = vld [vmem:[%s7435_s4 + $0xd78] sm:$0xff]  ;;  %v7083_v57 = vld [vmem:[%s7441_s5] sm:$0xff] }
 0x1b8   :  { %v603_v3 = vrot.slane %v7083_v57, %v602_v53  ;;  %v611_v6 = vrot.slane %v7083_v57, %v610_v29  ;;  %v607_v38 = vrot.slane %v7083_v57, %v606_v30  ;;  %v5079_v9 = vcombine.low %v513_v54, %v517_v55  ;;  %v544_v29 = vld [vmem:[%s7435_s4 + $0xe50] sm:$0xff] }
 0x1b9   :  { %v548_v30 = vld [vmem:[%s7435_s4 + $0xe70] sm:$0xff] }
 0x1ba   :  { %3697 = vmatpush1.bf16.msra.mxu0 %v5013_v58  ;;  %3869 = vmatpush1.bf16.msra.mxu1 %v5015_v60  ;;  %v5078_v60 = vcombine.high %v512_v50, %v516_v52 }
 0x1bb   :  { %3698 = vmatprep.subr.bf16.mxu0 %v5022_v61  ;;  %3870 = vmatprep.subr.bf16.mxu1 %v5024_v2  ;;  %v5080_v61 = vcombine.high %v513_v54, %v517_v55  ;;  %v524_v2 = vld [vmem:[%s7435_s4 + $0xdb0] sm:$0xff] }
 0x1bc   :  { %v5086_v10 = vcombine.high %v520_v1, %v524_v2  ;;  %v5085_v25 = vcombine.low %v520_v1, %v524_v2  ;;  %v5110_v2 = vcombine.high %v544_v29, %v548_v30 }
 0x1be   :  { %3699 = vmatpush1.bf16.msra.mxu0 %v5021_v5  ;;  %3871 = vmatpush1.bf16.msra.mxu1 %v5023_v39  ;;  %v525_v5 = vld [vmem:[%s7435_s4 + $0xdb8] sm:$0xff]  ;;  %v5077_v39 = vcombine.low %v512_v50, %v516_v52 }
 0x1bf   :  { %3700 = vmatprep.subr.bf16.mxu0 %v5030_v8  ;;  %3872 = vmatprep.subr.bf16.mxu1 %v5032_v11  ;;  %v615_v8 = vrot.slane %v7083_v57, %v614_v59  ;;  %v5087_v26 = vcombine.low %v521_v4, %v525_v5  ;;  %v545_v59 = vld [vmem:[%s7435_s4 + $0xe58] sm:$0xff] }
 0x1c2   :  { %3701 = vmatpush1.bf16.msra.mxu0 %v5029_v17  ;;  %3873 = vmatpush1.bf16.msra.mxu1 %v5031_v15  ;;  %v5088_v17 = vcombine.high %v521_v4, %v525_v5  ;;  %v532_v15 = vld [vmem:[%s7435_s4 + $0xdf0] sm:$0xff] }
 0x1c3   :  { %3713 = vmatprep.subr.bf16.mxu0 %v5038_v16  ;;  %3885 = vmatprep.subr.bf16.mxu1 %v5040_v18  ;;  %v552_v4 = vld [vmem:[%s7435_s4 + $0xe90] sm:$0xff] }
 0x1c4   :  { %v556_v5 = vld [vmem:[%s7435_s4 + $0xeb0] sm:$0xff] }
 0x1c5   :  { %3703 = vmatmul.mubr.bf16.vlgmr.msra.gmra.mrb[4].mxu0 %v6225_v31  ;;  %3875 = vmatmul.mubr.bf16.vlgmr.msra.gmra.mrb[4].mxu1 %v6225_v31  ;;  %v497_v31 = vld [vmem:[%s7435_s4 + $0xcd8] sm:$0xff] }
 0x1c6   :  { %3714 = vmatpush1.bf16.msra.mxu0 %v5037_v21  ;;  %3886 = vmatpush1.bf16.msra.mxu1 %v5039_v22  ;;  %v5064_v42 = vcombine.high %v497_v31, %v501_v36  ;;  %v5063_v13 = vcombine.low %v497_v31, %v501_v36  ;;  %v5093_v31 = vcombine.low %v528_v14, %v532_v15 }
 0x1c7   :  { %3715 = vmatprep.subr.bf16.mxu0 %v5046_v23  ;;  %3887 = vmatprep.subr.bf16.mxu1 %v5048_v24  ;;  %v5096_v36 = vcombine.high %v529_v40, %v533_v20  ;;  %v568_v20 = vld [vmem:[%s7435_s4 + $0xf10] sm:$0xff] }
 0x1c8   :  { %3745 = vmatprep.mubr.bf16.mxu0 %v6241_v41  ;;  %3917 = vmatprep.mubr.bf16.mxu1 %v6241_v41  ;;  %v505_v41 = vld [vmem:[%s7435_s4 + $0xd18] sm:$0xff] }
 0x1c9   :  { %v5072_v49 = vcombine.high %v505_v41, %v509_v45  ;;  %v5071_v58 = vcombine.low %v505_v41, %v509_v45  ;;  %v541_v41 = vld [vmem:[%s7435_s4 + $0xe38] sm:$0xff] }
 0x1ca   :  { %3716 = vmatpush1.bf16.msra.mxu0 %v5045_v28  ;;  %3888 = vmatpush1.bf16.msra.mxu1 %v5047_v0  ;;  %v5103_v1 = vcombine.low %v537_v44, %v541_v41 }
 0x1cb   :  { %3717 = vmatprep.subr.bf16.mxu0 %v5054_v32  ;;  %3889 = vmatprep.subr.bf16.mxu1 %v5056_v33  ;;  %v5094_v32 = vcombine.high %v528_v14, %v532_v15  ;;  %v561_v14 = vld [vmem:[%s7435_s4 + $0xed8] sm:$0xff] }
 0x1cc   :  { %v565_v15 = vld [vmem:[%s7435_s4 + $0xef8] sm:$0xff] }
 0x1cd   :  { %v5128_v40 = vcombine.high %v561_v14, %v565_v15 }
 0x1ce   :  { %3718 = vmatpush1.bf16.msra.mxu0 %v5053_v7  ;;  %3890 = vmatpush1.bf16.msra.mxu1 %v5055_v62  ;;  %v540_v7 = vld [vmem:[%s7435_s4 + $0xe30] sm:$0xff] }
 0x1cf   :  { %3719 = vmatprep.subr.bf16.mxu0 %v5062_v63  ;;  %3891 = vmatprep.subr.bf16.mxu1 %v5064_v42  ;;  %v5102_v53 = vcombine.high %v536_v37, %v540_v7 }
 0x1d2   :  { %3720 = vmatpush1.bf16.msra.mxu0 %v5061_v12  ;;  %3892 = vmatpush1.bf16.msra.mxu1 %v5063_v13 }
 0x1d3   :  { %3721 = vmatprep.subr.bf16.mxu0 %v5070_v48  ;;  %3893 = vmatprep.subr.bf16.mxu1 %v5072_v49 }
 0x1d6   :  { %3722 = vmatpush1.bf16.msra.mxu0 %v5069_v56  ;;  %3894 = vmatpush1.bf16.msra.mxu1 %v5071_v58  ;;  %v5104_v56 = vcombine.high %v537_v44, %v541_v41  ;;  %v592_v41 = vld [vmem:[%s7435_s4 + $0xfd0] sm:$0xff] }
 0x1d7   :  { %3723 = vmatprep.subr.bf16.mxu0 %v5078_v60  ;;  %3895 = vmatprep.subr.bf16.mxu1 %v5080_v61  ;;  %v549_v60 = vld [vmem:[%s7435_s4 + $0xe78] sm:$0xff]  ;;  %v5101_v61 = vcombine.low %v536_v37, %v540_v7  ;;  %v588_v37 = vld [vmem:[%s7435_s4 + $0xfb0] sm:$0xff] }
 0x1d8   :  { %v3403_v11 = vpop.f32.mrb[0].mxu0  ;;  %v3575_v18 = vpop.f32.mrb[0].mxu1  ;;  %v585_v7 = vld [vmem:[%s7435_s4 + $0xf98] sm:$0xff] }
 0x1d9   :  { %v5314_v16 = vadd.f32 %v3403_v11, %v603_v3  ;;  %v3405_v19 = vpop.f32.mrb[1].mxu0  ;;  %v5318_v21 = vadd.f32 %v3575_v18, %v611_v6  ;;  %v3577_v23 = vpop.f32.mrb[1].mxu1  ;;  %v560_v11 = vld [vmem:[%s7435_s4 + $0xed0] sm:$0xff] }
 0x1da   :  { %v5315_v22 = vadd.f32 %v3405_v19, %v607_v38  ;;  %v3407_v24 = vpop.f32.mrb[2].mxu0  ;;  %3724 = vmatpush1.bf16.msra.mxu0 %v5077_v39  ;;  %v5319_v47 = vadd.f32 %v3577_v23, %v615_v8  ;;  %v3579_v28 = vpop.f32.mrb[2].mxu1  ;;  %3896 = vmatpush1.bf16.msra.mxu1 %v5079_v9  ;;  %v5109_v39 = vcombine.low %v544_v29, %v548_v30  ;;  %v573_v23 = vld [vmem:[%s7435_s4 + $0xf38] sm:$0xff]  ;;  %v5378_v30 = vld [vmem:[%s7440_s6 + $0x40] sm:$0xff]  }
 0x1db   :  { %v5316_v27 = vadd.f32 %v3407_v24, %v603_v3  ;;  %v3409_v0 = vpop.f32.mrb[3].mxu0  ;;  %3725 = vmatprep.subr.bf16.mxu0 %v5086_v10  ;;  %v5320_v33 = vadd.f32 %v3579_v28, %v611_v6  ;;  %v3581_v35 = vpop.f32.mrb[3].mxu1  ;;  %3897 = vmatprep.subr.bf16.mxu1 %v5088_v17  ;;  %v3928_v62 = vmax.f32 %v5314_v16, 0.0  ;;  %v3930_v45 = vmax.f32 %v5318_v21, 0.0  ;;  %v553_v6 = vld [vmem:[%s7435_s4 + $0xe98] sm:$0xff]  ;;  %v564_v17 = vld [vmem:[%s7435_s4 + $0xef0] sm:$0xff] }
 0x1dc   :  { %v5317_v34 = vadd.f32 %v3409_v0, %v607_v38  ;;  %v5321_v42 = vadd.f32 %v3581_v35, %v615_v8  ;;  %v3929_v12 = vmax.f32 %v5315_v22, 0.0  ;;  %v3931_v49 = vmax.f32 %v5319_v47, 0.0  ;;  %v557_v38 = vld [vmem:[%s7435_s4 + $0xeb8] sm:$0xff]  ;;  %v572_v21 = vld [vmem:[%s7435_s4 + $0xf30] sm:$0xff] }
 0x1dd   :  { %v3936_v63 = vmax.f32 %v5316_v27, 0.0  ;;  %v3938_v13 = vmax.f32 %v5320_v33, 0.0  ;;  %v5112_v3 = vcombine.high %v545_v59, %v549_v60  ;;  %v5111_v8 = vcombine.low %v545_v59, %v549_v60  ;;  %v569_v22 = vld [vmem:[%s7435_s4 + $0xf18] sm:$0xff]  ;;  %v576_v27 = vld [vmem:[%s7435_s4 + $0xf50] sm:$0xff]  ;;  %v5379_v59 = vld [vmem:[%s7440_s6 + $0xc0] sm:$0xff]  }
 0x1de   :  { %v3937_v48 = vmax.f32 %v5317_v34, 0.0  ;;  %3726 = vmatpush1.bf16.msra.mxu0 %v5085_v25  ;;  %v3939_v52 = vmax.f32 %v5321_v42, 0.0  ;;  %3898 = vmatpush1.bf16.msra.mxu1 %v5087_v26  ;;  %v5118_v9 = vcombine.high %v552_v4, %v556_v5  ;;  %v5120_v10 = vcombine.high %v553_v6, %v557_v38  ;;  %v580_v28 = vld [vmem:[%s7435_s4 + $0xf70] sm:$0xff]  ;;  %v577_v0 = vld [vmem:[%s7435_s4 + $0xf58] sm:$0xff]  ;;  %v5380_v60 = vld [vmem:[%s7440_s6] sm:$0xff]  }
 0x1df   :  { %v7128_v50 = vpack.c.bf16 %v3936_v63, %v3928_v62  ;;  %3727 = vmatprep.subr.bf16.mxu0 %v5094_v32  ;;  %v7130_v54 = vpack.c.bf16 %v3938_v13, %v3930_v45  ;;  %3899 = vmatprep.subr.bf16.mxu1 %v5096_v36  ;;  %v5117_v16 = vcombine.low %v552_v4, %v556_v5  ;;  %v581_v32 = vld [vmem:[%s7435_s4 + $0xf78] sm:$0xff]  ;;  %v584_v36 = vld [vmem:[%s7435_s4 + $0xf90] sm:$0xff]  ;;  %v5385_v4 = vld [vmem:[%s7440_s6 + $0x88] sm:$0xff]  }
 0x1e0   :  { %v7132_v55 = vpack.c.bf16 %v3937_v48, %v3929_v12  ;;  %v7140_v58 = vpack.c.bf16 %v3939_v52, %v3931_v49  ;;  %v5119_v18 = vcombine.low %v553_v6, %v557_v38  ;;  %v5126_v19 = vcombine.high %v560_v11, %v564_v17  ;;  %v589_v62 = vld [vmem:[%s7435_s4 + $0xfb8] sm:$0xff]  ;;  %v596_v45 = vld [vmem:[%s7435_s4 + $0xff0] sm:$0xff] }
 0x1e1   :  { %v5125_v24 = vcombine.low %v560_v11, %v564_v17  ;;  %v5127_v25 = vcombine.low %v561_v14, %v565_v15  ;;  %v5134_v26 = vcombine.high %v568_v20, %v572_v21  ;;  %v5136_v47 = vcombine.high %v569_v22, %v573_v23  ;;  %v593_v12 = vld [vmem:[%s7435_s4 + $0xfd8] sm:$0xff]  ;;  %v5386_v5 = vld [vmem:[%s7440_s6 + $0x50] sm:$0xff]   ;;  %v5396_v11 = vld [vmem:[%s7440_s6 + $0x20] sm:$0xff]  }
 0x1e2   :  { %3728 = vmatpush1.bf16.msra.mxu0 %v5093_v31  ;;  %3900 = vmatpush1.bf16.msra.mxu1 %v5095_v43  ;;  %v5133_v33 = vcombine.low %v568_v20, %v572_v21  ;;  %v5135_v34 = vcombine.low %v569_v22, %v573_v23  ;;  %v5142_v35 = vcombine.high %v576_v27, %v580_v28  ;;  %v597_v13 = vld [vmem:[%s7435_s4 + $0xff8] sm:$0xff]  ;;  %v5389_v6 = vld [vmem:[%s7440_s6 + $0x90] sm:$0xff]   ;;  %v5397_v17 = vld [vmem:[%s7440_s6 + $0xa0] sm:$0xff]  }
 0x1e3   :  { %3729 = vmatprep.subr.bf16.mxu0 %v5102_v53  ;;  %3901 = vmatprep.subr.bf16.mxu1 %v5104_v56  ;;  %v5144_v31 = vcombine.high %v577_v0, %v581_v32  ;;  %v5141_v63 = vcombine.low %v576_v27, %v580_v28  ;;  %v5143_v42 = vcombine.low %v577_v0, %v581_v32  ;;  %v5391_v38 = vld [vmem:[%s7440_s6 + $0xd8] sm:$0xff]   ;;  %v5398_v14 = vld [vmem:[%s7440_s6 + $0x68] sm:$0xff]   ;;  %v5404_v20 = vld [vmem:[%s7440_s6 + $0x30] sm:$0xff]  }
 0x1e4   :  { %v5150_v43 = vcombine.high %v584_v36, %v588_v37  ;;  %v5152_v44 = vcombine.high %v585_v7, %v589_v62  ;;  %v5149_v48 = vcombine.low %v584_v36, %v588_v37  ;;  %v5151_v49 = vcombine.low %v585_v7, %v589_v62  ;;  %v5399_v15 = vld [vmem:[%s7440_s6 + $0xe8] sm:$0xff]   ;;  %v5405_v21 = vld [vmem:[%s7440_s6 + $0xb0] sm:$0xff]   ;;  %v5406_v22 = vld [vmem:[%s7440_s6 + $0x78] sm:$0xff]  }
 0x1e5   :  { %v5158_v52 = vcombine.high %v592_v41, %v596_v45  ;;  %v5160_v53 = vcombine.high %v593_v12, %v597_v13  ;;  %v5157_v56 = vcombine.low %v592_v41, %v596_v45  ;;  %v5159_v29 = vcombine.low %v593_v12, %v597_v13  ;;  %v5407_v23 = vld [vmem:[%s7440_s6 + $0xf8] sm:$0xff]   ;;  %v5412_v27 = vld [vmem:[%s7440_s6 + $0x100] sm:$0xff]   ;;  %v5414_v0 = vld [vmem:[%s7440_s6 + $0x148] sm:$0xff]  }
 0x1e6   :  { %3730 = vmatpush1.bf16.msra.mxu0 %v5101_v61  ;;  %3902 = vmatpush1.bf16.msra.mxu1 %v5103_v1  ;;  %v5381_v61 = vld [vmem:[%s7440_s6 + $0x80] sm:$0xff]   ;;  %v5382_v1 = vld [vmem:[%s7440_s6 + $0x48] sm:$0xff]   ;;  %v5422_v36 = vld [vmem:[%s7440_s6 + $0x158] sm:$0xff]  }
 0x1e7   :  { %3731 = vmatprep.subr.bf16.mxu0 %v5110_v2  ;;  %3903 = vmatprep.subr.bf16.mxu1 %v5112_v3  ;;  %v5383_v2 = vld [vmem:[%s7440_s6 + $0xc8] sm:$0xff]   ;;  %v5413_v28 = vld [vmem:[%s7440_s6 + $0x180] sm:$0xff]   ;;  %v5423_v37 = vld [vmem:[%s7440_s6 + $0x1d8] sm:$0xff]  }
 0x1e8   :  { %v5384_v3 = vld [vmem:[%s7440_s6 + $0x8] sm:$0xff]   ;;  %v5424_v7 = vld [vmem:[%s7440_s6 + $0x118] sm:$0xff]  }
 0x1e9   :  { %v5415_v32 = vld [vmem:[%s7440_s6 + $0x1c8] sm:$0xff]   ;;  %v5425_v62 = vld [vmem:[%s7440_s6 + $0x198] sm:$0xff]  }
 0x1ea   :  { %3732 = vmatpush1.bf16.msra.mxu0 %v5109_v39  ;;  %3904 = vmatpush1.bf16.msra.mxu1 %v5111_v8  ;;  %v5392_v39 = vld [vmem:[%s7440_s6 + $0x18] sm:$0xff]   ;;  %v5430_v41 = vld [vmem:[%s7440_s6 + $0x168] sm:$0xff]  }
 0x1eb   :  { %3733 = vmatprep.subr.bf16.mxu0 %v5118_v9  ;;  %3905 = vmatprep.subr.bf16.mxu1 %v5120_v10  ;;  %v5393_v8 = vld [vmem:[%s7440_s6 + $0x98] sm:$0xff]   ;;  %v5394_v9 = vld [vmem:[%s7440_s6 + $0x60] sm:$0xff]   ;;  %v5431_v45 = vld [vmem:[%s7440_s6 + $0x1e8] sm:$0xff]  }
 0x1ec   :  { %v5395_v10 = vld [vmem:[%s7440_s6 + $0xe0] sm:$0xff]   ;;  %v5432_v12 = vld [vmem:[%s7440_s6 + $0x128] sm:$0xff]  }
 0x1ed   :  { %v5433_v13 = vld [vmem:[%s7440_s6 + $0x1a8] sm:$0xff]  }
 0x1ee   :  { %3734 = vmatpush1.bf16.msra.mxu0 %v5117_v16  ;;  %3906 = vmatpush1.bf16.msra.mxu1 %v5119_v18  ;;  %v5400_v16 = vld [vmem:[%s7440_s6 + $0x28] sm:$0xff]  }
 0x1ef   :  { %3735 = vmatprep.subr.bf16.mxu0 %v5126_v19  ;;  %3907 = vmatprep.subr.bf16.mxu1 %v5128_v40  ;;  %v5401_v18 = vld [vmem:[%s7440_s6 + $0xa8] sm:$0xff]   ;;  %v5402_v19 = vld [vmem:[%s7440_s6 + $0x70] sm:$0xff]  }
 0x1f0   :  { %v5403_v40 = vld [vmem:[%s7440_s6 + $0xf0] sm:$0xff]  }
 0x1f2   :  { %3736 = vmatpush1.bf16.msra.mxu0 %v5125_v24  ;;  %3908 = vmatpush1.bf16.msra.mxu1 %v5127_v25  ;;  %v5408_v24 = vld [vmem:[%s7440_s6 + $0x38] sm:$0xff]  }
 0x1f3   :  { %3737 = vmatprep.subr.bf16.mxu0 %v5134_v26  ;;  %3909 = vmatprep.subr.bf16.mxu1 %v5136_v47  ;;  %v5409_v25 = vld [vmem:[%s7440_s6 + $0xb8] sm:$0xff]   ;;  %v5410_v26 = vld [vmem:[%s7440_s6 + $0x140] sm:$0xff]  }
 0x1f4   :  { %v5411_v47 = vld [vmem:[%s7440_s6 + $0x1c0] sm:$0xff]  }
 0x1f6   :  { %3738 = vmatpush1.bf16.msra.mxu0 %v5133_v33  ;;  %3910 = vmatpush1.bf16.msra.mxu1 %v5135_v34  ;;  %v5416_v33 = vld [vmem:[%s7440_s6 + $0x108] sm:$0xff]  }
 0x1f7   :  { %3739 = vmatprep.subr.bf16.mxu0 %v5142_v35  ;;  %3911 = vmatprep.subr.bf16.mxu1 %v5144_v31  ;;  %v5417_v34 = vld [vmem:[%s7440_s6 + $0x188] sm:$0xff]   ;;  %v5418_v35 = vld [vmem:[%s7440_s6 + $0x150] sm:$0xff]  }
 0x1f8   :  { %v5421_v31 = vld [vmem:[%s7440_s6 + $0x190] sm:$0xff]  }
 0x1fa   :  { %3740 = vmatpush1.bf16.msra.mxu0 %v5141_v63  ;;  %3912 = vmatpush1.bf16.msra.mxu1 %v5143_v42  ;;  %v5426_v63 = vld [vmem:[%s7440_s6 + $0x160] sm:$0xff]  }
 0x1fb   :  { %3741 = vmatprep.subr.bf16.mxu0 %v5150_v43  ;;  %3913 = vmatprep.subr.bf16.mxu1 %v5152_v44  ;;  %v5427_v42 = vld [vmem:[%s7440_s6 + $0x1e0] sm:$0xff]  }
 0x1fc   :  { %v5428_v43 = vld [vmem:[%s7440_s6 + $0x120] sm:$0xff]  }
 0x1fd   :  { %v5429_v44 = vld [vmem:[%s7440_s6 + $0x1a0] sm:$0xff]  }
 0x1fe   :  { %3742 = vmatpush1.bf16.msra.mxu0 %v5149_v48  ;;  %3914 = vmatpush1.bf16.msra.mxu1 %v5151_v49  ;;  %v5434_v48 = vld [vmem:[%s7440_s6 + $0x170] sm:$0xff]  }
 0x1ff   :  { %3743 = vmatprep.subr.bf16.mxu0 %v5158_v52  ;;  %3915 = vmatprep.subr.bf16.mxu1 %v5160_v53  ;;  %v5435_v49 = vld [vmem:[%s7440_s6 + $0x1f0] sm:$0xff]  }
 0x200   :  { %v5436_v52 = vld [vmem:[%s7440_s6 + $0x130] sm:$0xff]  }
 0x201   :  { %v5437_v53 = vld [vmem:[%s7440_s6 + $0x1b0] sm:$0xff]  }
 0x202   :  { %3744 = vmatpush1.bf16.msra.mxu0 %v5157_v56  ;;  %3916 = vmatpush1.bf16.msra.mxu1 %v5159_v29  ;;  %v5438_v56 = vld [vmem:[%s7440_s6 + $0x178] sm:$0xff]  }
 0x203   :  { %5226 = vmatprep.subr.bf16.mxu0 %v5378_v30  ;;  %5248 = vmatprep.subr.bf16.mxu1 %v5379_v59  ;;  %v5439_v29 = vld [vmem:[%s7440_s6 + $0x1f8] sm:$0xff]  }
 0x204   :  { %v5440_v30 = vld [vmem:[%s7440_s6 + $0x138] sm:$0xff]  }
 0x205   :  { %3746 = vmatmul.mubr.bf16.vlgmr.msra.gmra.mrb[4].mxu0 %v6429_v51  ;;  %3918 = vmatmul.mubr.bf16.vlgmr.msra.gmra.mrb[4].mxu1 %v6429_v51  ;;  %v5387_v51 = vld [vmem:[%s7440_s6 + $0xd0] sm:$0xff]   ;;  %v5441_v59 = vld [vmem:[%s7440_s6 + $0x1b8] sm:$0xff]  }
 0x206   :  { %5227 = vmatpush3.bf16.msra.mxu0 %v5380_v60  ;;  %4503 = vmatprep.mubr.bf16.mxu0 %v7132_v55  ;;  %v5388_v55 = vld [vmem:[%s7440_s6 + $0x10] sm:$0xff]   ;;  %v618_v60 = vsub.s32 4, %v7065_v46 }
 0x207   :  { %5249 = vmatpush3.bf16.msra.mxu1 %v5381_v61  ;;  %4544 = vmatprep.mubr.bf16.mxu1 %v7140_v58  ;;  %v5390_v58 = vld [vmem:[%s7440_s6 + $0x58] sm:$0xff]   ;;  %v626_v61 = vsub.s32 6, %v7065_v46 }
 0x208   :  { %5228 = vmatprep.subr.bf16.mxu0 %v5382_v1  ;;  %5250 = vmatprep.subr.bf16.mxu1 %v5383_v2  ;;  %v622_v1 = vsub.s32 5, %v7065_v46  ;;  %v630_v2 = vsub.s32 7, %v7065_v46 }
 0x20a   :  { %5229 = vmatpush3.bf16.msra.mxu0 %v5384_v3  ;;  %v619_v3 = vrot.slane %v7083_v57, %v618_v60 }
 0x20b   :  { %5251 = vmatpush3.bf16.msra.mxu1 %v5385_v4  ;;  %5230 = vmatprep.subr.bf16.mxu0 %v5386_v5  ;;  %v627_v4 = vrot.slane %v7083_v57, %v626_v61  ;;  %v623_v5 = vrot.slane %v7083_v57, %v622_v1 }
 0x20c   :  { %5252 = vmatprep.subr.bf16.mxu1 %v5387_v51  ;;  %v631_v51 = vrot.slane %v7083_v57, %v630_v2 }
 0x20e   :  { %5231 = vmatpush3.bf16.msra.mxu0 %v5388_v55 }
 0x20f   :  { %5253 = vmatpush3.bf16.msra.mxu1 %v5389_v6  ;;  %5232 = vmatprep.subr.bf16.mxu0 %v5390_v58 }
 0x210   :  { %5254 = vmatprep.subr.bf16.mxu1 %v5391_v38 }
 0x212   :  { %5233 = vmatpush3.bf16.msra.mxu0 %v5392_v39 }
 0x213   :  { %5255 = vmatpush3.bf16.msra.mxu1 %v5393_v8  ;;  %5234 = vmatprep.subr.bf16.mxu0 %v5394_v9 }
 0x214   :  { %5256 = vmatprep.subr.bf16.mxu1 %v5395_v10 }
 0x216   :  { %5235 = vmatpush3.bf16.msra.mxu0 %v5396_v11 }
 0x217   :  { %5257 = vmatpush3.bf16.msra.mxu1 %v5397_v17  ;;  %5236 = vmatprep.subr.bf16.mxu0 %v5398_v14 }
 0x218   :  { %5258 = vmatprep.subr.bf16.mxu1 %v5399_v15 }
 0x21a   :  { %5237 = vmatpush3.bf16.msra.mxu0 %v5400_v16 }
 0x21b   :  { %5259 = vmatpush3.bf16.msra.mxu1 %v5401_v18  ;;  %5238 = vmatprep.subr.bf16.mxu0 %v5402_v19 }
 0x21c   :  { %5260 = vmatprep.subr.bf16.mxu1 %v5403_v40 }
 0x21e   :  { %5239 = vmatpush3.bf16.msra.mxu0 %v5404_v20 }
 0x21f   :  { %5261 = vmatpush3.bf16.msra.mxu1 %v5405_v21  ;;  %5240 = vmatprep.subr.bf16.mxu0 %v5406_v22 }
 0x220   :  { %5262 = vmatprep.subr.bf16.mxu1 %v5407_v23 }
 0x222   :  { %5241 = vmatpush3.bf16.msra.mxu0 %v5408_v24 }
 0x223   :  { %5263 = vmatpush3.bf16.msra.mxu1 %v5409_v25  ;;  %5270 = vmatprep.subr.bf16.mxu0 %v5410_v26 }
 0x224   :  { %5292 = vmatprep.subr.bf16.mxu1 %v5411_v47 }
 0x225   :  { %4504 = vmatmul.mubr.bf16.vlgmr.msra.gmra.mrb[8].mxu0 %v7128_v50  ;;  %v5419_v50 = vld [vmem:[%s7440_s6 + $0x1d0] sm:$0xff]  }
 0x226   :  { %4545 = vmatmul.mubr.bf16.vlgmr.msra.gmra.mrb[8].mxu1 %v7130_v54  ;;  %5271 = vmatpush3.bf16.msra.mxu0 %v5412_v27  ;;  %v5420_v54 = vld [vmem:[%s7440_s6 + $0x110] sm:$0xff]  }
 0x227   :  { %5293 = vmatpush3.bf16.msra.mxu1 %v5413_v28  ;;  %5272 = vmatprep.subr.bf16.mxu0 %v5414_v0 }
 0x228   :  { %5294 = vmatprep.subr.bf16.mxu1 %v5415_v32 }
 0x22a   :  { %5273 = vmatpush3.bf16.msra.mxu0 %v5416_v33  ;;  %v5161_v33 = vld [vmem:[%s7442_s7] ss:$0 sm:$0xff] }
 0x22b   :  { %5295 = vmatpush3.bf16.msra.mxu1 %v5417_v34  ;;  %5274 = vmatprep.subr.bf16.mxu0 %v5418_v35 }
 0x22c   :  { %5296 = vmatprep.subr.bf16.mxu1 %v5419_v50 }
 0x22e   :  { %5275 = vmatpush3.bf16.msra.mxu0 %v5420_v54 }
 0x22f   :  { %5297 = vmatpush3.bf16.msra.mxu1 %v5421_v31  ;;  %5276 = vmatprep.subr.bf16.mxu0 %v5422_v36 }
 0x230   :  { %5298 = vmatprep.subr.bf16.mxu1 %v5423_v37 }
 0x232   :  { %5277 = vmatpush3.bf16.msra.mxu0 %v5424_v7 }
 0x233   :  { %5299 = vmatpush3.bf16.msra.mxu1 %v5425_v62  ;;  %5278 = vmatprep.subr.bf16.mxu0 %v5426_v63 }
 0x234   :  { %5300 = vmatprep.subr.bf16.mxu1 %v5427_v42 }
 0x236   :  { %5279 = vmatpush3.bf16.msra.mxu0 %v5428_v43 }
 0x237   :  { %5301 = vmatpush3.bf16.msra.mxu1 %v5429_v44  ;;  %5280 = vmatprep.subr.bf16.mxu0 %v5430_v41 }
 0x238   :  { %5302 = vmatprep.subr.bf16.mxu1 %v5431_v45 }
 0x23a   :  { %5281 = vmatpush3.bf16.msra.mxu0 %v5432_v12 }
 0x23b   :  { %5303 = vmatpush3.bf16.msra.mxu1 %v5433_v13  ;;  %5282 = vmatprep.subr.bf16.mxu0 %v5434_v48 }
 0x23c   :  { %5304 = vmatprep.subr.bf16.mxu1 %v5435_v49 }
 0x23e   :  { %5283 = vmatpush3.bf16.msra.mxu0 %v5436_v52 }
 0x23f   :  { %5305 = vmatpush3.bf16.msra.mxu1 %v5437_v53  ;;  %5284 = vmatprep.subr.bf16.mxu0 %v5438_v56 }
 0x240   :  { %5306 = vmatprep.subr.bf16.mxu1 %v5439_v29 }
 0x242   :  { %5285 = vmatpush3.bf16.msra.mxu0 %v5440_v30 }
 0x243   :  { %5307 = vmatpush3.bf16.msra.mxu1 %v5441_v59 }
 0x2d8   :  { %v3747_v55 = vpop.f32.mrb[4].mxu0  ;;  %v3919_v58 = vpop.f32.mrb[4].mxu1 }
 0x2d9   :  { %v5322_v6 = vadd.f32 %v3747_v55, %v619_v3  ;;  %v3749_v38 = vpop.f32.mrb[5].mxu0  ;;  %v5326_v39 = vadd.f32 %v3919_v58, %v627_v4  ;;  %v3921_v9 = vpop.f32.mrb[5].mxu1 }
 0x2da   :  { %v5323_v8 = vadd.f32 %v3749_v38, %v623_v5  ;;  %v3751_v10 = vpop.f32.mrb[6].mxu0  ;;  %v5327_v11 = vadd.f32 %v3921_v9, %v631_v51  ;;  %v3923_v14 = vpop.f32.mrb[6].mxu1 }
 0x2db   :  { %v5324_v17 = vadd.f32 %v3751_v10, %v619_v3  ;;  %v3753_v46 = vpop.f32.mrb[7].mxu0  ;;  %v5328_v15 = vadd.f32 %v3923_v14, %v627_v4  ;;  %v3925_v18 = vpop.f32.mrb[7].mxu1  ;;  %v3932_v19 = vmax.f32 %v5322_v6, 0.0  ;;  %v3934_v21 = vmax.f32 %v5326_v39, 0.0 }
 0x2dc   :  { %v5325_v16 = vadd.f32 %v3753_v46, %v623_v5  ;;  %v5329_v20 = vadd.f32 %v3925_v18, %v631_v51  ;;  %v3933_v57 = vmax.f32 %v5323_v8, 0.0  ;;  %v3935_v24 = vmax.f32 %v5327_v11, 0.0 }
 0x2dd   :  { %v3940_v40 = vmax.f32 %v5324_v17, 0.0  ;;  %v3942_v22 = vmax.f32 %v5328_v15, 0.0 }
 0x2de   :  { %v3941_v23 = vmax.f32 %v5325_v16, 0.0  ;;  %v3943_v26 = vmax.f32 %v5329_v20, 0.0 }
 0x2df   :  { %v3948_v25 = vpack.c.bf16 %v3940_v40, %v3932_v19  ;;  %v3950_v47 = vpack.c.bf16 %v3942_v22, %v3934_v21 }
 0x2e0   :  { %v3949_v27 = vpack.c.bf16 %v3941_v23, %v3933_v57  ;;  %v3951_v28 = vpack.c.bf16 %v3943_v26, %v3935_v24 }
 0x2e2   :  { %4585 = vmatprep.mubr.bf16.mxu0 %v3949_v27  ;;  %4626 = vmatprep.mubr.bf16.mxu1 %v3951_v28 }
 0x2e3   :  { %4586 = vmatmul.mubr.bf16.vlgmr.msra.gmra.mrb[12].mxu0 %v3948_v25  ;;  %4627 = vmatmul.mubr.bf16.vlgmr.msra.gmra.mrb[12].mxu1 %v3950_v47 }
 0x2f8   :  { %v5242_v0 = vpop.f32.mrb[8].mxu0 }
 0x2f9   :  { %v5264_v32 = vpop.f32.mrb[8].mxu1  ;;  %v5243_v34 = vpop.f32.mrb[9].mxu0 }
 0x2fa   :  { %v5244_v35 = vadd.f32 %v5243_v34, %v5242_v0  ;;  %v5265_v50 = vpop.f32.mrb[9].mxu1  ;;  %v5245_v54 = vpop.f32.mrb[10].mxu0 }
 0x2fb   :  { %v5266_v31 = vadd.f32 %v5265_v50, %v5264_v32  ;;  %v5267_v36 = vpop.f32.mrb[10].mxu1  ;;  %v5246_v37 = vpop.f32.mrb[11].mxu0 }
 0x2fc   :  { %v4506_v7 = vadd.f32 %v5244_v35, %v5161_v33  ;;  %v5247_v62 = vadd.f32 %v5246_v37, %v5245_v54  ;;  %v5268_v63 = vpop.f32.mrb[11].mxu1 }
 0x2fd   :  { %v5269_v42 = vadd.f32 %v5268_v63, %v5267_v36 }
 0x2fe   :  { %v4547_v43 = vadd.f32 %v5266_v31, %v4506_v7  ;;  %v4509_v44 = vadd.f32 %v5247_v62, %v5161_v33 }
 0x300   :  { %v4550_v41 = vadd.f32 %v5269_v42, %v4509_v44 }
 0x3b6   :  { %v5286_v45 = vpop.f32.mrb[12].mxu0  ;;  %v5308_v12 = vpop.f32.mrb[12].mxu1 }
 0x3b7   :  { %v5287_v13 = vpop.f32.mrb[13].mxu0  ;;  %v5309_v49 = vpop.f32.mrb[13].mxu1 }
 0x3b8   :  { %v5288_v48 = vadd.f32 %v5287_v13, %v5286_v45  ;;  %v5289_v52 = vpop.f32.mrb[14].mxu0  ;;  %v5310_v53 = vadd.f32 %v5309_v49, %v5308_v12  ;;  %v5311_v56 = vpop.f32.mrb[14].mxu1 }
 0x3b9   :  { %v5290_v29 = vpop.f32.mrb[15].mxu0  ;;  %v5312_v60 = vpop.f32.mrb[15].mxu1 }
 0x3ba   :  { %v4588_v30 = vadd.f32 %v5288_v48, %v4547_v43  ;;  %v5291_v59 = vadd.f32 %v5290_v29, %v5289_v52  ;;  %v5313_v61 = vadd.f32 %v5312_v60, %v5311_v56 }
 0x3bc   :  { %v4629_v1 = vadd.f32 %v5310_v53, %v4588_v30  ;;  %v4591_v2 = vadd.f32 %v5291_v59, %v4550_v41 }
 0x3be   :  { %4635 = vst [vmem:[%s7443_s8] sm:$0xff] %v4629_v1  ;;  %v4632_v3 = vadd.f32 %v5313_v61, %v4591_v2 }
 0x3c0   :  { %4636 = vst [vmem:[%s7443_s8 + $0x8] sm:$0xff] %v4632_v3 }

</bundles_post_ra>
